<compile_context>
chip_gen: v6e
topology: v6e:2x2x1
jax: 0.10.0
libtpu: 0.0.40
codegen_flags: <defaults>
</compile_context>

<pallas_src>
import functools

import jax
import jax.numpy as jnp
import numpy as np
from jax.experimental import pallas as pl
from jax.experimental.pallas import tpu as pltpu

LANE = 128


def _round_up(x, m):
    return (x + m - 1) // m * m


def _pad_to(a, shape):
    return jnp.pad(a, [(0, t - s) for s, t in zip(a.shape, shape)])


def bn_fold(gamma, beta, mean, var, eps=1e-5):
    scale = gamma / jnp.sqrt(var + eps)
    shift = beta - mean * scale
    return scale.astype(jnp.float32), shift.astype(jnp.float32)


def _block_kernel(x_ref, w1_ref, b1_ref, w2_ref, b2_ref, w3_ref, bout_ref,
                  *rest, H, W, stride, needs_res, cdt):
    if needs_res:
        wr_ref, out_ref, ypad_ref = rest
    else:
        out_ref, ypad_ref = rest

    Cin = x_ref.shape[-1]
    Cm = w1_ref.shape[-1]        # lane-padded mid channels
    Co = w3_ref.shape[-1]        # lane-padded out channels
    Ho, Wo = H // stride, W // stride

    x = x_ref[0]                              # (H, W, Cin), already f32
    x2d = x.reshape(H * W, Cin)

    # ---- conv1 (1x1, BN scale folded into weight) + bias + ReLU ----
    y = jnp.dot(x2d.astype(cdt), w1_ref[...], preferred_element_type=jnp.float32)
    y = jnp.maximum(y + b1_ref[...], 0.0)                      # (H*W, Cm) f32

    # ---- conv2 (3x3, pad=1, stride) via zero-padded scratch ----
    # Zero only the 1-pixel halo; the interior is overwritten every step.
    ypad_ref[0:1, :, :] = jnp.zeros((1, W + 2, Cm), jnp.float32)
    ypad_ref[H + 1:H + 2, :, :] = jnp.zeros((1, W + 2, Cm), jnp.float32)
    ypad_ref[1:H + 1, 0:1, :] = jnp.zeros((H, 1, Cm), jnp.float32)
    ypad_ref[1:H + 1, W + 1:W + 2, :] = jnp.zeros((H, 1, Cm), jnp.float32)
    ypad_ref[1:H + 1, 1:W + 1, :] = y.reshape(H, W, Cm)

    # 9 shifted matmuls; for stride>1 read only the Ho*Wo strided output taps.
    acc = jnp.zeros((Ho * Wo, Cm), jnp.float32)
    for ky in range(3):
        for kx in range(3):
            if stride == 1:
                patch = ypad_ref[ky:ky + H, kx:kx + W, :]
            else:
                patch = ypad_ref[pl.ds(ky, Ho, stride), pl.ds(kx, Wo, stride), :]
            # W is a multiple of 8 and Cm == 128, so this reshape is layout-free.
            patch = patch.reshape(Ho * Wo, Cm).astype(cdt)
            acc = acc + jnp.dot(patch, w2_ref[ky, kx],
                                preferred_element_type=jnp.float32)
    y = jnp.maximum(acc + b2_ref[...], 0.0)                    # (Ho*Wo, Cm)

    # ---- conv3 (1x1, BN folded); its bias is merged into bout ----
    y = jnp.dot(y.astype(cdt), w3_ref[...], preferred_element_type=jnp.float32)

    # ---- residual branch ----
    if needs_res:
        if stride > 1:
            xr = x.reshape(Ho, stride, Wo, stride, Cin)[:, 0, :, 0, :]
            xr = xr.reshape(Ho * Wo, Cin)
        else:
            xr = x2d
        res = jnp.dot(xr.astype(cdt), wr_ref[...],
                      preferred_element_type=jnp.float32)
    else:
        res = x2d    # identity: Cin == Cout (padded to Co in wrapper), stride==1

    out = (y + res + bout_ref[...]).reshape(Ho, Wo, Co)
    out_ref[0] = out.astype(out_ref.dtype)


def bottleneck_res_block(x_nchw, params, stride=1, compute_dtype=jnp.bfloat16):
    N, Cin, H, W = x_nchw.shape
    assert H % stride == 0 and W % stride == 0
    Cmid = params["w1"].shape[0]
    Cout = params["w3"].shape[0]
    needs_res = (stride > 1) or (Cin != Cout)
    Ho, Wo = H // stride, W // stride

    Cm_p = _round_up(Cmid, LANE)      # lane-dense mid channels
    Co_p = _round_up(Cout, LANE)      # lane-dense out channels

    x = jnp.transpose(x_nchw, (0, 2, 3, 1)).astype(jnp.float32)   # NCHW -> NHWC
    if not needs_res:
        # identity residual: Cin == Cout, pad the input channels so x can be
        # added directly to the lane-padded output slab.
        x = _pad_to(x, (N, H, W, Co_p))
    Cin_k = x.shape[-1]

    s1, b1 = bn_fold(*params["bn1"])
    s2, b2 = bn_fold(*params["bn2"])
    s3, b3 = bn_fold(*params["bn3"])

    # Fold BN scales into the conv weights, pad channel dims to lane width,
    # cast the matmul operands to compute_dtype (bf16 -> fast MXU path).
    w1k = jnp.transpose(params["w1"][:, :, 0, 0], (1, 0)) * s1      # (Cin, Cmid)
    w2k = jnp.transpose(params["w2"], (2, 3, 1, 0)) * s2            # (3,3,Cmid,Cmid)
    w3k = jnp.transpose(params["w3"][:, :, 0, 0], (1, 0)) * s3      # (Cmid, Cout)
    w1k = _pad_to(w1k, (Cin_k, Cm_p)).astype(compute_dtype)
    w2k = _pad_to(w2k, (3, 3, Cm_p, Cm_p)).astype(compute_dtype)
    w3k = _pad_to(w3k, (Cm_p, Co_p)).astype(compute_dtype)
    b1p = _pad_to(b1.reshape(1, -1), (1, Cm_p))
    b2p = _pad_to(b2.reshape(1, -1), (1, Cm_p))

    bout = b3
    args = [x, w1k, b1p, w2k, b2p, w3k]
    in_specs = [
        pl.BlockSpec((1, H, W, Cin_k), lambda n: (n, 0, 0, 0)),
        pl.BlockSpec((Cin_k, Cm_p), lambda n: (0, 0)),
        pl.BlockSpec((1, Cm_p), lambda n: (0, 0)),
        pl.BlockSpec((3, 3, Cm_p, Cm_p), lambda n: (0, 0, 0, 0)),
        pl.BlockSpec((1, Cm_p), lambda n: (0, 0)),
        pl.BlockSpec((Cm_p, Co_p), lambda n: (0, 0)),
    ]
    if needs_res:
        sr, br = bn_fold(*params["bn_res"])
        wrk = jnp.transpose(params["w_res"][:, :, 0, 0], (1, 0)) * sr  # (Cin, Cout)
        wrk = _pad_to(wrk, (Cin, Co_p)).astype(compute_dtype)
        bout = bout + br               # merge bn3 + bn_res shifts: one add total

    boutp = _pad_to(bout.reshape(1, -1), (1, Co_p))
    args.append(boutp)
    in_specs.append(pl.BlockSpec((1, Co_p), lambda n: (0, 0)))
    if needs_res:
        args.append(wrk)
        in_specs.append(pl.BlockSpec((Cin, Co_p), lambda n: (0, 0)))

    kernel = functools.partial(_block_kernel, H=H, W=W, stride=stride,
                               needs_res=needs_res, cdt=compute_dtype)
    out_nhwc = pl.pallas_call(
        kernel,
        out_shape=jax.ShapeDtypeStruct((N, Ho, Wo, Co_p), jnp.float32),
        grid_spec=pltpu.PrefetchScalarGridSpec(
            num_scalar_prefetch=0,
            grid=(N,),
            in_specs=in_specs,
            out_specs=pl.BlockSpec((1, Ho, Wo, Co_p), lambda n: (n, 0, 0, 0)),
            scratch_shapes=[pltpu.VMEM((H + 2, W + 2, Cm_p), jnp.float32)],
        ),
        compiler_params=pltpu.CompilerParams(dimension_semantics=("parallel",)),
    )(*args)
    out_nhwc = out_nhwc[..., :Cout]                 # drop lane padding
    return jnp.transpose(out_nhwc, (0, 3, 1, 2))    # NHWC -> NCHW


def ref_forward(x_nchw, params, stride=1, compute_dtype=jnp.bfloat16):
    """Pure-JAX reference (lax.conv) mirroring the kernel's BN fold & dtype."""
    x = jnp.transpose(x_nchw, (0, 2, 3, 1)).astype(jnp.float32)
    Cin = x.shape[-1]
    Cout = params["w3"].shape[0]

    def conv_bn(v, w_oihw, bn_p, s, pad):
        scale, shift = bn_fold(*bn_p)
        w = jnp.transpose(w_oihw, (2, 3, 1, 0)).astype(jnp.float32) * scale
        out = jax.lax.conv_general_dilated(
            v.astype(compute_dtype), w.astype(compute_dtype), (s, s), pad,
            dimension_numbers=("NHWC", "HWIO", "NHWC"),
            preferred_element_type=jnp.float32)
        return out + shift

    y = jax.nn.relu(conv_bn(x, params["w1"], params["bn1"], 1, "VALID"))
    y = jax.nn.relu(conv_bn(y, params["w2"], params["bn2"], stride,
                            ((1, 1), (1, 1))))
    y = conv_bn(y, params["w3"], params["bn3"], 1, "VALID")
    if stride > 1 or Cin != Cout:
        res = conv_bn(x, params["w_res"], params["bn_res"], stride, "VALID")
    else:
        res = x
    return jnp.transpose(y + res, (0, 3, 1, 2))


def make_params(key, in_channels, out_channels, expansion=4):
    cmid = out_channels
    cout = out_channels * expansion
    ks = jax.random.split(key, 8)

    def kaiming(k, shape):
        fan_in = int(np.prod(shape[1:]))
        return jax.random.normal(k, shape, jnp.float32) * np.sqrt(2.0 / fan_in)

    def bn_params(k, c):
        k1, k2, k3, k4 = jax.random.split(k, 4)
        gamma = 1.0 + 0.1 * jax.random.normal(k1, (c,), jnp.float32)
        beta = 0.1 * jax.random.normal(k2, (c,), jnp.float32)
        mean = 0.1 * jax.random.normal(k3, (c,), jnp.float32)
        var = 1.0 + 0.5 * jax.random.uniform(k4, (c,), jnp.float32)
        return (gamma, beta, mean, var)

    return {
        "w1": kaiming(ks[0], (cmid, in_channels, 1, 1)),
        "w2": kaiming(ks[1], (cmid, cmid, 3, 3)),
        "w3": kaiming(ks[2], (cout, cmid, 1, 1)),
        "w_res": kaiming(ks[3], (cout, in_channels, 1, 1)),
        "bn1": bn_params(ks[4], cmid),
        "bn2": bn_params(ks[5], cmid),
        "bn3": bn_params(ks[6], cout),
        "bn_res": bn_params(ks[7], cout),
    }


if __name__ == "__main__":
    key = jax.random.PRNGKey(0)
    kp1, kp2, kx1, kx2 = jax.random.split(key, 4)
    N, H, W = 2, 16, 16

    # Case 1: projection residual (in_channels != out_channels*expansion).
    p1 = make_params(kp1, in_channels=16, out_channels=8)
    x1 = jax.random.normal(kx1, (N, 16, H, W), jnp.float32)
    out1 = jax.block_until_ready(bottleneck_res_block(x1, p1, stride=1))
    ref1 = ref_forward(x1, p1, stride=1)
    np.testing.assert_allclose(np.asarray(out1), np.asarray(ref1),
                               rtol=2e-3, atol=2e-3)

    # Case 2: identity residual (in_channels == out_channels*expansion).
    p2 = make_params(kp2, in_channels=32, out_channels=8)
    x2 = jax.random.normal(kx2, (N, 32, H, W), jnp.float32)
    out2 = jax.block_until_ready(bottleneck_res_block(x2, p2, stride=1))
    ref2 = ref_forward(x2, p2, stride=1)
    np.testing.assert_allclose(np.asarray(out2), np.asarray(ref2),
                               rtol=2e-3, atol=2e-3)

    print("KERNEL_OK")
</pallas_src>

<mosaic_0001>
module attributes {stable_mosaic.version = 11 : i64} {
  func.func @_block_kernel(%arg0: i32, %arg1: memref<1x16x16x16xf32, #tpu.memory_space<vmem>>, %arg2: memref<16x128xbf16, #tpu.memory_space<vmem>>, %arg3: memref<1x128xf32, #tpu.memory_space<vmem>>, %arg4: memref<3x3x128x128xbf16, #tpu.memory_space<vmem>>, %arg5: memref<1x128xf32, #tpu.memory_space<vmem>>, %arg6: memref<128x128xbf16, #tpu.memory_space<vmem>>, %arg7: memref<1x128xf32, #tpu.memory_space<vmem>>, %arg8: memref<16x128xbf16, #tpu.memory_space<vmem>>, %arg9: memref<1x16x16x128xf32, #tpu.memory_space<vmem>>, %arg10: memref<18x18x128xf32, #tpu.memory_space<vmem>>) attributes {dimension_semantics = [#tpu.dimension_semantics<parallel>], iteration_bounds = array<i64: 2>, scalar_prefetch = 0 : i64, scratch_operands = 1 : i64, tpu.core_type = #tpu.core_type<tc>, window_params = [{transform_indices = @transform_0, window_bounds = array<i64: 1, 16, 16, 16>}, {pipeline_mode = #tpu.pipeline_mode<synchronous>, transform_indices = @transform_1, window_bounds = array<i64: 16, 128>}, {pipeline_mode = #tpu.pipeline_mode<synchronous>, transform_indices = @transform_2, window_bounds = array<i64: 1, 128>}, {pipeline_mode = #tpu.pipeline_mode<synchronous>, transform_indices = @transform_3, window_bounds = array<i64: 3, 3, 128, 128>}, {pipeline_mode = #tpu.pipeline_mode<synchronous>, transform_indices = @transform_4, window_bounds = array<i64: 1, 128>}, {pipeline_mode = #tpu.pipeline_mode<synchronous>, transform_indices = @transform_5, window_bounds = array<i64: 128, 128>}, {pipeline_mode = #tpu.pipeline_mode<synchronous>, transform_indices = @transform_6, window_bounds = array<i64: 1, 128>}, {pipeline_mode = #tpu.pipeline_mode<synchronous>, transform_indices = @transform_7, window_bounds = array<i64: 16, 128>}, {transform_indices = @transform_8, window_bounds = array<i64: 1, 16, 16, 128>}]} {
    %c0 = arith.constant 0 : index
    %c0_0 = arith.constant 0 : index
    %c0_1 = arith.constant 0 : index
    %c0_2 = arith.constant 0 : index
    %0 = vector.load %arg1[%c0, %c0_0, %c0_1, %c0_2] : memref<1x16x16x16xf32, #tpu.memory_space<vmem>>, vector<1x16x16x16xf32>
    %1 = vector.shape_cast %0 : vector<1x16x16x16xf32> to vector<16x16x16xf32>
    %2 = vector.shape_cast %1 : vector<16x16x16xf32> to vector<256x16xf32>
    %3 = arith.truncf %2 : vector<256x16xf32> to vector<256x16xbf16>
    %c0_3 = arith.constant 0 : index
    %c0_4 = arith.constant 0 : index
    %4 = vector.load %arg2[%c0_3, %c0_4] : memref<16x128xbf16, #tpu.memory_space<vmem>>, vector<16x128xbf16>
    %cst = arith.constant dense<0.000000e+00> : vector<256x128xf32>
    %5 = tpu.matmul %3, %4, %cst {dimension_numbers = #tpu.dot_dimension_numbers<[1], [0], [0], [1], [0, 0, 1, 1], [], []>} : vector<256x16xbf16>, vector<16x128xbf16>, vector<256x128xf32> -> vector<256x128xf32>
    %c0_5 = arith.constant 0 : index
    %c0_6 = arith.constant 0 : index
    %6 = vector.load %arg3[%c0_5, %c0_6] : memref<1x128xf32, #tpu.memory_space<vmem>>, vector<1x128xf32>
    %7 = vector.broadcast %6 : vector<1x128xf32> to vector<256x128xf32>
    %8 = arith.addf %5, %7 : vector<256x128xf32>
    %cst_7 = arith.constant 0.000000e+00 : f32
    %9 = vector.broadcast %cst_7 : f32 to vector<256x128xf32>
    %10 = arith.maximumf %8, %9 : vector<256x128xf32>
    %cst_8 = arith.constant 0.000000e+00 : f32
    %11 = vector.broadcast %cst_8 : f32 to vector<1x18x128xf32>
    %c0_9 = arith.constant 0 : index
    %c0_10 = arith.constant 0 : index
    %c0_11 = arith.constant 0 : index
    %12 = vector.load %arg10[%c0_9, %c0_10, %c0_11] : memref<18x18x128xf32, #tpu.memory_space<vmem>>, vector<1x18x128xf32>
    tpu.vector_store %arg10[%c0_9, %c0_10, %c0_11], %11 {strides = array<i32>} : memref<18x18x128xf32, #tpu.memory_space<vmem>>, vector<1x18x128xf32>,
    %cst_12 = arith.constant 0.000000e+00 : f32
    %13 = vector.broadcast %cst_12 : f32 to vector<1x18x128xf32>
    %c17 = arith.constant 17 : index
    %c0_13 = arith.constant 0 : index
    %c0_14 = arith.constant 0 : index
    %14 = vector.load %arg10[%c17, %c0_13, %c0_14] : memref<18x18x128xf32, #tpu.memory_space<vmem>>, vector<1x18x128xf32>
    tpu.vector_store %arg10[%c17, %c0_13, %c0_14], %13 {strides = array<i32>} : memref<18x18x128xf32, #tpu.memory_space<vmem>>, vector<1x18x128xf32>,
    %cst_15 = arith.constant 0.000000e+00 : f32
    %15 = vector.broadcast %cst_15 : f32 to vector<16x1x128xf32>
    %c1 = arith.constant 1 : index
    %c0_16 = arith.constant 0 : index
    %c0_17 = arith.constant 0 : index
    %16 = vector.load %arg10[%c1, %c0_16, %c0_17] : memref<18x18x128xf32, #tpu.memory_space<vmem>>, vector<16x1x128xf32>
    tpu.vector_store %arg10[%c1, %c0_16, %c0_17], %15 {strides = array<i32>} : memref<18x18x128xf32, #tpu.memory_space<vmem>>, vector<16x1x128xf32>,
    %cst_18 = arith.constant 0.000000e+00 : f32
    %17 = vector.broadcast %cst_18 : f32 to vector<16x1x128xf32>
    %c1_19 = arith.constant 1 : index
    %c17_20 = arith.constant 17 : index
    %c0_21 = arith.constant 0 : index
    %18 = vector.load %arg10[%c1_19, %c17_20, %c0_21] : memref<18x18x128xf32, #tpu.memory_space<vmem>>, vector<16x1x128xf32>
    tpu.vector_store %arg10[%c1_19, %c17_20, %c0_21], %17 {strides = array<i32>} : memref<18x18x128xf32, #tpu.memory_space<vmem>>, vector<16x1x128xf32>,
    %19 = vector.shape_cast %10 : vector<256x128xf32> to vector<16x16x128xf32>
    %c1_22 = arith.constant 1 : index
    %c1_23 = arith.constant 1 : index
    %c0_24 = arith.constant 0 : index
    %20 = vector.load %arg10[%c1_22, %c1_23, %c0_24] : memref<18x18x128xf32, #tpu.memory_space<vmem>>, vector<16x16x128xf32>
    tpu.vector_store %arg10[%c1_22, %c1_23, %c0_24], %19 {strides = array<i32>} : memref<18x18x128xf32, #tpu.memory_space<vmem>>, vector<16x16x128xf32>,
    %cst_25 = arith.constant 0.000000e+00 : f32
    %21 = vector.broadcast %cst_25 : f32 to vector<256x128xf32>
    %c0_26 = arith.constant 0 : index
    %c0_27 = arith.constant 0 : index
    %c0_28 = arith.constant 0 : index
    %22 = vector.load %arg10[%c0_26, %c0_27, %c0_28] : memref<18x18x128xf32, #tpu.memory_space<vmem>>, vector<16x16x128xf32>
    %23 = vector.shape_cast %22 : vector<16x16x128xf32> to vector<256x128xf32>
    %24 = arith.truncf %23 : vector<256x128xf32> to vector<256x128xbf16>
    %c0_29 = arith.constant 0 : index
    %c0_30 = arith.constant 0 : index
    %c0_31 = arith.constant 0 : index
    %c0_32 = arith.constant 0 : index
    %25 = vector.load %arg4[%c0_29, %c0_30, %c0_31, %c0_32] : memref<3x3x128x128xbf16, #tpu.memory_space<vmem>>, vector<1x1x128x128xbf16>
    %26 = vector.shape_cast %25 : vector<1x1x128x128xbf16> to vector<128x128xbf16>
    %cst_33 = arith.constant dense<0.000000e+00> : vector<256x128xf32>
    %27 = tpu.matmul %24, %26, %cst_33 {dimension_numbers = #tpu.dot_dimension_numbers<[1], [0], [0], [1], [0, 0, 1, 1], [], []>} : vector<256x128xbf16>, vector<128x128xbf16>, vector<256x128xf32> -> vector<256x128xf32>
    %28 = arith.addf %21, %27 : vector<256x128xf32>
    %c0_34 = arith.constant 0 : index
    %c1_35 = arith.constant 1 : index
    %c0_36 = arith.constant 0 : index
    %29 = vector.load %arg10[%c0_34, %c1_35, %c0_36] : memref<18x18x128xf32, #tpu.memory_space<vmem>>, vector<16x16x128xf32>
    %30 = vector.shape_cast %29 : vector<16x16x128xf32> to vector<256x128xf32>
    %31 = arith.truncf %30 : vector<256x128xf32> to vector<256x128xbf16>
    %c0_37 = arith.constant 0 : index
    %c1_38 = arith.constant 1 : index
    %c0_39 = arith.constant 0 : index
    %c0_40 = arith.constant 0 : index
    %32 = vector.load %arg4[%c0_37, %c1_38, %c0_39, %c0_40] : memref<3x3x128x128xbf16, #tpu.memory_space<vmem>>, vector<1x1x128x128xbf16>
    %33 = vector.shape_cast %32 : vector<1x1x128x128xbf16> to vector<128x128xbf16>
    %cst_41 = arith.constant dense<0.000000e+00> : vector<256x128xf32>
    %34 = tpu.matmul %31, %33, %cst_41 {dimension_numbers = #tpu.dot_dimension_numbers<[1], [0], [0], [1], [0, 0, 1, 1], [], []>} : vector<256x128xbf16>, vector<128x128xbf16>, vector<256x128xf32> -> vector<256x128xf32>
    %35 = arith.addf %28, %34 : vector<256x128xf32>
    %c0_42 = arith.constant 0 : index
    %c2 = arith.constant 2 : index
    %c0_43 = arith.constant 0 : index
    %36 = vector.load %arg10[%c0_42, %c2, %c0_43] : memref<18x18x128xf32, #tpu.memory_space<vmem>>, vector<16x16x128xf32>
    %37 = vector.shape_cast %36 : vector<16x16x128xf32> to vector<256x128xf32>
    %38 = arith.truncf %37 : vector<256x128xf32> to vector<256x128xbf16>
    %c0_44 = arith.constant 0 : index
    %c2_45 = arith.constant 2 : index
    %c0_46 = arith.constant 0 : index
    %c0_47 = arith.constant 0 : index
    %39 = vector.load %arg4[%c0_44, %c2_45, %c0_46, %c0_47] : memref<3x3x128x128xbf16, #tpu.memory_space<vmem>>, vector<1x1x128x128xbf16>
    %40 = vector.shape_cast %39 : vector<1x1x128x128xbf16> to vector<128x128xbf16>
    %cst_48 = arith.constant dense<0.000000e+00> : vector<256x128xf32>
    %41 = tpu.matmul %38, %40, %cst_48 {dimension_numbers = #tpu.dot_dimension_numbers<[1], [0], [0], [1], [0, 0, 1, 1], [], []>} : vector<256x128xbf16>, vector<128x128xbf16>, vector<256x128xf32> -> vector<256x128xf32>
    %42 = arith.addf %35, %41 : vector<256x128xf32>
    %c1_49 = arith.constant 1 : index
    %c0_50 = arith.constant 0 : index
    %c0_51 = arith.constant 0 : index
    %43 = vector.load %arg10[%c1_49, %c0_50, %c0_51] : memref<18x18x128xf32, #tpu.memory_space<vmem>>, vector<16x16x128xf32>
    %44 = vector.shape_cast %43 : vector<16x16x128xf32> to vector<256x128xf32>
    %45 = arith.truncf %44 : vector<256x128xf32> to vector<256x128xbf16>
    %c1_52 = arith.constant 1 : index
    %c0_53 = arith.constant 0 : index
    %c0_54 = arith.constant 0 : index
    %c0_55 = arith.constant 0 : index
    %46 = vector.load %arg4[%c1_52, %c0_53, %c0_54, %c0_55] : memref<3x3x128x128xbf16, #tpu.memory_space<vmem>>, vector<1x1x128x128xbf16>
    %47 = vector.shape_cast %46 : vector<1x1x128x128xbf16> to vector<128x128xbf16>
    %cst_56 = arith.constant dense<0.000000e+00> : vector<256x128xf32>
    %48 = tpu.matmul %45, %47, %cst_56 {dimension_numbers = #tpu.dot_dimension_numbers<[1], [0], [0], [1], [0, 0, 1, 1], [], []>} : vector<256x128xbf16>, vector<128x128xbf16>, vector<256x128xf32> -> vector<256x128xf32>
    %49 = arith.addf %42, %48 : vector<256x128xf32>
    %c1_57 = arith.constant 1 : index
    %c1_58 = arith.constant 1 : index
    %c0_59 = arith.constant 0 : index
    %50 = vector.load %arg10[%c1_57, %c1_58, %c0_59] : memref<18x18x128xf32, #tpu.memory_space<vmem>>, vector<16x16x128xf32>
    %51 = vector.shape_cast %50 : vector<16x16x128xf32> to vector<256x128xf32>
    %52 = arith.truncf %51 : vector<256x128xf32> to vector<256x128xbf16>
    %c1_60 = arith.constant 1 : index
    %c1_61 = arith.constant 1 : index
    %c0_62 = arith.constant 0 : index
    %c0_63 = arith.constant 0 : index
    %53 = vector.load %arg4[%c1_60, %c1_61, %c0_62, %c0_63] : memref<3x3x128x128xbf16, #tpu.memory_space<vmem>>, vector<1x1x128x128xbf16>
    %54 = vector.shape_cast %53 : vector<1x1x128x128xbf16> to vector<128x128xbf16>
    %cst_64 = arith.constant dense<0.000000e+00> : vector<256x128xf32>
    %55 = tpu.matmul %52, %54, %cst_64 {dimension_numbers = #tpu.dot_dimension_numbers<[1], [0], [0], [1], [0, 0, 1, 1], [], []>} : vector<256x128xbf16>, vector<128x128xbf16>, vector<256x128xf32> -> vector<256x128xf32>
    %56 = arith.addf %49, %55 : vector<256x128xf32>
    %c1_65 = arith.constant 1 : index
    %c2_66 = arith.constant 2 : index
    %c0_67 = arith.constant 0 : index
    %57 = vector.load %arg10[%c1_65, %c2_66, %c0_67] : memref<18x18x128xf32, #tpu.memory_space<vmem>>, vector<16x16x128xf32>
    %58 = vector.shape_cast %57 : vector<16x16x128xf32> to vector<256x128xf32>
    %59 = arith.truncf %58 : vector<256x128xf32> to vector<256x128xbf16>
    %c1_68 = arith.constant 1 : index
    %c2_69 = arith.constant 2 : index
    %c0_70 = arith.constant 0 : index
    %c0_71 = arith.constant 0 : index
    %60 = vector.load %arg4[%c1_68, %c2_69, %c0_70, %c0_71] : memref<3x3x128x128xbf16, #tpu.memory_space<vmem>>, vector<1x1x128x128xbf16>
    %61 = vector.shape_cast %60 : vector<1x1x128x128xbf16> to vector<128x128xbf16>
    %cst_72 = arith.constant dense<0.000000e+00> : vector<256x128xf32>
    %62 = tpu.matmul %59, %61, %cst_72 {dimension_numbers = #tpu.dot_dimension_numbers<[1], [0], [0], [1], [0, 0, 1, 1], [], []>} : vector<256x128xbf16>, vector<128x128xbf16>, vector<256x128xf32> -> vector<256x128xf32>
    %63 = arith.addf %56, %62 : vector<256x128xf32>
    %c2_73 = arith.constant 2 : index
    %c0_74 = arith.constant 0 : index
    %c0_75 = arith.constant 0 : index
    %64 = vector.load %arg10[%c2_73, %c0_74, %c0_75] : memref<18x18x128xf32, #tpu.memory_space<vmem>>, vector<16x16x128xf32>
    %65 = vector.shape_cast %64 : vector<16x16x128xf32> to vector<256x128xf32>
    %66 = arith.truncf %65 : vector<256x128xf32> to vector<256x128xbf16>
    %c2_76 = arith.constant 2 : index
    %c0_77 = arith.constant 0 : index
    %c0_78 = arith.constant 0 : index
    %c0_79 = arith.constant 0 : index
    %67 = vector.load %arg4[%c2_76, %c0_77, %c0_78, %c0_79] : memref<3x3x128x128xbf16, #tpu.memory_space<vmem>>, vector<1x1x128x128xbf16>
    %68 = vector.shape_cast %67 : vector<1x1x128x128xbf16> to vector<128x128xbf16>
    %cst_80 = arith.constant dense<0.000000e+00> : vector<256x128xf32>
    %69 = tpu.matmul %66, %68, %cst_80 {dimension_numbers = #tpu.dot_dimension_numbers<[1], [0], [0], [1], [0, 0, 1, 1], [], []>} : vector<256x128xbf16>, vector<128x128xbf16>, vector<256x128xf32> -> vector<256x128xf32>
    %70 = arith.addf %63, %69 : vector<256x128xf32>
    %c2_81 = arith.constant 2 : index
    %c1_82 = arith.constant 1 : index
    %c0_83 = arith.constant 0 : index
    %71 = vector.load %arg10[%c2_81, %c1_82, %c0_83] : memref<18x18x128xf32, #tpu.memory_space<vmem>>, vector<16x16x128xf32>
    %72 = vector.shape_cast %71 : vector<16x16x128xf32> to vector<256x128xf32>
    %73 = arith.truncf %72 : vector<256x128xf32> to vector<256x128xbf16>
    %c2_84 = arith.constant 2 : index
    %c1_85 = arith.constant 1 : index
    %c0_86 = arith.constant 0 : index
    %c0_87 = arith.constant 0 : index
    %74 = vector.load %arg4[%c2_84, %c1_85, %c0_86, %c0_87] : memref<3x3x128x128xbf16, #tpu.memory_space<vmem>>, vector<1x1x128x128xbf16>
    %75 = vector.shape_cast %74 : vector<1x1x128x128xbf16> to vector<128x128xbf16>
    %cst_88 = arith.constant dense<0.000000e+00> : vector<256x128xf32>
    %76 = tpu.matmul %73, %75, %cst_88 {dimension_numbers = #tpu.dot_dimension_numbers<[1], [0], [0], [1], [0, 0, 1, 1], [], []>} : vector<256x128xbf16>, vector<128x128xbf16>, vector<256x128xf32> -> vector<256x128xf32>
    %77 = arith.addf %70, %76 : vector<256x128xf32>
    %c2_89 = arith.constant 2 : index
    %c2_90 = arith.constant 2 : index
    %c0_91 = arith.constant 0 : index
    %78 = vector.load %arg10[%c2_89, %c2_90, %c0_91] : memref<18x18x128xf32, #tpu.memory_space<vmem>>, vector<16x16x128xf32>
    %79 = vector.shape_cast %78 : vector<16x16x128xf32> to vector<256x128xf32>
    %80 = arith.truncf %79 : vector<256x128xf32> to vector<256x128xbf16>
    %c2_92 = arith.constant 2 : index
    %c2_93 = arith.constant 2 : index
    %c0_94 = arith.constant 0 : index
    %c0_95 = arith.constant 0 : index
    %81 = vector.load %arg4[%c2_92, %c2_93, %c0_94, %c0_95] : memref<3x3x128x128xbf16, #tpu.memory_space<vmem>>, vector<1x1x128x128xbf16>
    %82 = vector.shape_cast %81 : vector<1x1x128x128xbf16> to vector<128x128xbf16>
    %cst_96 = arith.constant dense<0.000000e+00> : vector<256x128xf32>
    %83 = tpu.matmul %80, %82, %cst_96 {dimension_numbers = #tpu.dot_dimension_numbers<[1], [0], [0], [1], [0, 0, 1, 1], [], []>} : vector<256x128xbf16>, vector<128x128xbf16>, vector<256x128xf32> -> vector<256x128xf32>
    %84 = arith.addf %77, %83 : vector<256x128xf32>
    %c0_97 = arith.constant 0 : index
    %c0_98 = arith.constant 0 : index
    %85 = vector.load %arg5[%c0_97, %c0_98] : memref<1x128xf32, #tpu.memory_space<vmem>>, vector<1x128xf32>
    %86 = vector.broadcast %85 : vector<1x128xf32> to vector<256x128xf32>
    %87 = arith.addf %84, %86 : vector<256x128xf32>
    %cst_99 = arith.constant 0.000000e+00 : f32
    %88 = vector.broadcast %cst_99 : f32 to vector<256x128xf32>
    %89 = arith.maximumf %87, %88 : vector<256x128xf32>
    %90 = arith.truncf %89 : vector<256x128xf32> to vector<256x128xbf16>
    %c0_100 = arith.constant 0 : index
    %c0_101 = arith.constant 0 : index
    %91 = vector.load %arg6[%c0_100, %c0_101] : memref<128x128xbf16, #tpu.memory_space<vmem>>, vector<128x128xbf16>
    %cst_102 = arith.constant dense<0.000000e+00> : vector<256x128xf32>
    %92 = tpu.matmul %90, %91, %cst_102 {dimension_numbers = #tpu.dot_dimension_numbers<[1], [0], [0], [1], [0, 0, 1, 1], [], []>} : vector<256x128xbf16>, vector<128x128xbf16>, vector<256x128xf32> -> vector<256x128xf32>
    %93 = arith.truncf %2 : vector<256x16xf32> to vector<256x16xbf16>
    %c0_103 = arith.constant 0 : index
    %c0_104 = arith.constant 0 : index
    %94 = vector.load %arg8[%c0_103, %c0_104] : memref<16x128xbf16, #tpu.memory_space<vmem>>, vector<16x128xbf16>
    %cst_105 = arith.constant dense<0.000000e+00> : vector<256x128xf32>
    %95 = tpu.matmul %93, %94, %cst_105 {dimension_numbers = #tpu.dot_dimension_numbers<[1], [0], [0], [1], [0, 0, 1, 1], [], []>} : vector<256x16xbf16>, vector<16x128xbf16>, vector<256x128xf32> -> vector<256x128xf32>
    %96 = arith.addf %92, %95 : vector<256x128xf32>
    %c0_106 = arith.constant 0 : index
    %c0_107 = arith.constant 0 : index
    %97 = vector.load %arg7[%c0_106, %c0_107] : memref<1x128xf32, #tpu.memory_space<vmem>>, vector<1x128xf32>
    %98 = vector.broadcast %97 : vector<1x128xf32> to vector<256x128xf32>
    %99 = arith.addf %96, %98 : vector<256x128xf32>
    %100 = vector.shape_cast %99 : vector<256x128xf32> to vector<16x16x128xf32>
    %c0_108 = arith.constant 0 : index
    %c0_109 = arith.constant 0 : index
    %c0_110 = arith.constant 0 : index
    %c0_111 = arith.constant 0 : index
    %101 = vector.load %arg9[%c0_108, %c0_109, %c0_110, %c0_111] : memref<1x16x16x128xf32, #tpu.memory_space<vmem>>, vector<1x16x16x128xf32>
    %102 = vector.shape_cast %101 : vector<1x16x16x128xf32> to vector<16x16x128xf32>
    %103 = vector.shape_cast %100 : vector<16x16x128xf32> to vector<1x16x16x128xf32>
    tpu.vector_store %arg9[%c0_108, %c0_109, %c0_110, %c0_111], %103 {strides = array<i32>} : memref<1x16x16x128xf32, #tpu.memory_space<vmem>>, vector<1x16x16x128xf32>,
    return
  }
  func.func @transform_0(%arg0: i32) -> (i32, i32, i32, i32) {
    %c0_i32 = arith.constant 0 : i32
    %c0_i32_0 = arith.constant 0 : i32
    %c0_i32_1 = arith.constant 0 : i32
    %c0_i32_2 = arith.constant 0 : i32
    return %arg0, %c0_i32, %c0_i32_0, %c0_i32_1 : i32, i32, i32, i32
  }
  func.func @transform_1(%arg0: i32) -> (i32, i32) {
    %c0_i32 = arith.constant 0 : i32
    %c0_i32_0 = arith.constant 0 : i32
    %c0_i32_1 = arith.constant 0 : i32
    return %c0_i32, %c0_i32_0 : i32, i32
  }
  func.func @transform_2(%arg0: i32) -> (i32, i32) {
    %c0_i32 = arith.constant 0 : i32
    %c0_i32_0 = arith.constant 0 : i32
    %c0_i32_1 = arith.constant 0 : i32
    return %c0_i32, %c0_i32_0 : i32, i32
  }
  func.func @transform_3(%arg0: i32) -> (i32, i32, i32, i32) {
    %c0_i32 = arith.constant 0 : i32
    %c0_i32_0 = arith.constant 0 : i32
    %c0_i32_1 = arith.constant 0 : i32
    %c0_i32_2 = arith.constant 0 : i32
    %c0_i32_3 = arith.constant 0 : i32
    return %c0_i32, %c0_i32_0, %c0_i32_1, %c0_i32_2 : i32, i32, i32, i32
  }
  func.func @transform_4(%arg0: i32) -> (i32, i32) {
    %c0_i32 = arith.constant 0 : i32
    %c0_i32_0 = arith.constant 0 : i32
    %c0_i32_1 = arith.constant 0 : i32
    return %c0_i32, %c0_i32_0 : i32, i32
  }
  func.func @transform_5(%arg0: i32) -> (i32, i32) {
    %c0_i32 = arith.constant 0 : i32
    %c0_i32_0 = arith.constant 0 : i32
    %c0_i32_1 = arith.constant 0 : i32
    return %c0_i32, %c0_i32_0 : i32, i32
  }
  func.func @transform_6(%arg0: i32) -> (i32, i32) {
    %c0_i32 = arith.constant 0 : i32
    %c0_i32_0 = arith.constant 0 : i32
    %c0_i32_1 = arith.constant 0 : i32
    return %c0_i32, %c0_i32_0 : i32, i32
  }
  func.func @transform_7(%arg0: i32) -> (i32, i32) {
    %c0_i32 = arith.constant 0 : i32
    %c0_i32_0 = arith.constant 0 : i32
    %c0_i32_1 = arith.constant 0 : i32
    return %c0_i32, %c0_i32_0 : i32, i32
  }
  func.func @transform_8(%arg0: i32) -> (i32, i32, i32, i32) {
    %c0_i32 = arith.constant 0 : i32
    %c0_i32_0 = arith.constant 0 : i32
    %c0_i32_1 = arith.constant 0 : i32
    %c0_i32_2 = arith.constant 0 : i32
    return %arg0, %c0_i32, %c0_i32_0, %c0_i32_1 : i32, i32, i32, i32
  }
}

</mosaic_0001>

<bundles_post_ra>
// kernel: tpu_custom_call.1
= control target key start
LH: loop header
LB: loop body
LE: loop exit
PB: predicated region body
PF: predicated region fallthrough
CT: control target
= control target key end

     0   :  { %s6658_s0 = inlined_call_operand.hbm [shape: f32[2,16,16,16], index: 0, kind: input, shape index: {}]   ;;  %s6659_s1 = inlined_call_operand.hbm [shape: bf16[16,128], index: 1, kind: input, shape index: {}]   ;;  %s6660_s2 = inlined_call_operand.vmem [shape: f32[1,128], index: 2, kind: input, shape index: {}]   ;;  %s6661_s3 = inlined_call_operand.hbm [shape: bf16[3,3,128,128], index: 3, kind: input, shape index: {}]   ;;  %s6662_s4 = inlined_call_operand.vmem [shape: f32[1,128], index: 4, kind: input, shape index: {}]   ;;  %s6663_s5 = inlined_call_operand.hbm [shape: bf16[128,128], index: 5, kind: input, shape index: {}]   ;;  %s6664_s6 = inlined_call_operand.vmem [shape: f32[1,128], index: 6, kind: input, shape index: {}]   ;;  %s6665_s7 = inlined_call_operand.vmem [shape: bf16[16,128], index: 7, kind: input, shape index: {}]   ;;  %s6666_s8 = inlined_call_operand.hbm [shape: f32[2,16,16,128], index: 8, kind: output, shape index: {}]  }
   0x1   :  { %6680 = sst [smem:[#allocation27_spill]] %s6659_s1 }
   0x2   :  { %6681 = sst [smem:[#allocation28_spill]] %s6661_s3 }
   0x3   :  { %13 = vsyncpa [#allocation4], 0 }
   0x4   :  { %15 = vsyncpa [#allocation4 + $0x1], 0 }
   0x5   :  { %16 = vsyncpa [#allocation7], 0 }
   0x6   :  { %17 = vsyncpa [#allocation10], 0 }
   0x7   :  { %18 = vsyncpa [#allocation5], 0 }
   0x8   :  { %20 = vsyncpa [#allocation5 + $0x1], 0  ;;  %s5486_s27 = smov 0   ;;  %s5488_s28 = smov 0  }
   0x9   :  { %s5490_s29 = smov 0   ;;  %s5492_s30 = smov 0  }
   0xa LB: > { %s5507_s9 = sadd.s32 4294967295, %s5426_s30   ;;  %s4104_s10 = sadd.s32 4294967294, %s5426_s30   ;;  %s5426_s30 = sphi %s5492_s30, %s6745_s30   ;;  %s5422_s29 = sphi %s5490_s29, %s6744_s29   ;;  %s5418_s28 = sphi %s5488_s28, %s6743_s28   ;;  %s5414_s27 = sphi %s5486_s27, %s6742_s27  }
   0xb   : > { %p46_p0 = scmp.ne.s32.totalorder %s5418_s28, %s5414_s27  ;;  %p6667_p1 = scmp.eq.s32.totalorder %s5507_s9, 0 }
   0xc   : > { %p223_p3 = scmp.eq.s32.totalorder %s4104_s10, 1  ;;  %p4105_p5 = scmp.ge.s32.totalorder %s5426_s30, 1 }
   0xd   : > { %p5516_p4 = por %p6667_p1, %p46_p0  ;;  %p230_p7 = scmp.lt.s32.totalorder %s5426_s30, 3 }
   0xe   : > { %p5521_p6 = por %p223_p3, %p46_p0  ;;  %s5428_s14 = smov [#allocation6]  }
   0xf   : > { %s6682_s11 = scalar_select %p5516_p4, 1, 0 }
  0x10   : > { %s6683_s12 = scalar_select %p5521_p6, 1, 0 }
  0x11   : > { %p5526_p8 = pnand %p4105_p5, %p230_p7  ;;  %s242_s15 = sshll.u32 %s5428_s14, 4  ;;  %s243_s15 = int_to_ptr.vmem [resolvable:$true] %s242_s15 }
  0x12   : > { %s5429_s17 = smov [#allocation8]   ;;  %s5430_s19 = smov [#allocation9]  }
  0x13   : > { %s6684_s13 = scalar_select %p5526_p8, 1, 0 }
  0x14   : > { %p5097_p9 = pneg %p5526_p8  ;;  %s258_s18 = sshll.u32 %s5429_s17, 4  ;;  %s259_s18 = int_to_ptr.vmem [resolvable:$true] %s258_s18 }
  0x15   : > { %s274_s20 = sshll.u32 %s5430_s19, 4  ;;  %s5259_s21 = scalar_lea.vmem %s243_s15, 128  ;;  %s275_s20 = int_to_ptr.vmem [resolvable:$true] %s274_s20 }
  0x16   : > { %p5535_p11 = pnand %p5097_p9, %p6667_p1  ;;  %p5260_p13 = scmp.ne.s32.totalorder %s243_s15, %s5259_s21 }
  0x17   : > { %p5267_p5 = scmp.lt.s32.totalorder %s243_s15, %s243_s15  ;;  %p5268_p7 = scmp.lt.s32.totalorder %s5259_s21, %s5259_s21 }
  0x18   : > { %p5250_p12 = pneg %p5535_p11 }
  0x19   : > { %p5269_p9 = por %p5268_p7, %p5267_p5 }
  0x1a   : > { %p5262_p0 = pnand %p5260_p13, %p5250_p12 }
  0x1c   : > { %p5263_p3 = pneg %p5262_p0 }
  0x1e   : > { %p5270_p10 = pnand %p5269_p9, %p5263_p3 }
  0x20   : > { %5273 = shalt.err (!%p5270_p10)
}
  0x21   : > { %s5431_s22 = smov 64   ;;  %s5432_s23 = smov 4  }
  0x22   : > { %s6686_s1 = sld [smem:[#allocation27_spill]]  ;;  %s5285_s26 = scalar_lea.vmem %s259_s18, 9216 }
  0x23   : > { %p5286_p1 = scmp.ne.s32.totalorder %s259_s18, %s5285_s26  ;;  %p5293_p2 = scmp.lt.s32.totalorder %s259_s18, %s259_s18 }
  0x24   : > { %p5294_p6 = scmp.lt.s32.totalorder %s5285_s26, %s5285_s26 }
  0x25   : > { %p5288_p13 = pnand %p5286_p1, %p5250_p12 }
  0x26   : > { %p5295_p5 = por %p5294_p6, %p5293_p2 }
  0x27   : > { %p5289_p0 = pneg %p5288_p13 }
  0x28   : > { %5100 = dma.hbm_to_vmem [thread:$0]  (!%p5535_p11), %s6686_s1, 128, %s243_s15, [#allocation7], %s5431_s22, %s5431_s22, %s5432_s23  }
  0x29   : > { %p5296_p3 = pnand %p5295_p5, %p5289_p0 }
  0x2b   : > { %5299 = shalt.err (!%p5296_p3)
}
  0x2c   : > { %s6687_s3 = sld [smem:[#allocation28_spill]]  ;;  %s5311_s15 = scalar_lea.vmem %s275_s20, 1024 }
  0x2d   : > { %p5312_p10 = scmp.ne.s32.totalorder %s275_s20, %s5311_s15  ;;  %p5319_p9 = scmp.lt.s32.totalorder %s275_s20, %s275_s20 }
  0x2e   : > { %p5320_p13 = scmp.lt.s32.totalorder %s5311_s15, %s5311_s15 }
  0x2f   : > { %p5314_p7 = pnand %p5312_p10, %p5250_p12 }
  0x30   : > { %p5321_p4 = por %p5320_p13, %p5319_p9 }
  0x31   : > { %p5315_p1 = pneg %p5314_p7 }
  0x32   : > { %5103 = dma.hbm_to_vmem [thread:$0]  (!%p5535_p11), %s6687_s3, 9216, %s259_s18, [#allocation7], %s5431_s22, %s5431_s22, %s5432_s23  }
  0x33   : > { %p5322_p2 = pnand %p5321_p4, %p5315_p1 }
  0x35   : > { %5325 = shalt.err (!%p5322_p2)
}
  0x36   : > { %5106 = dma.hbm_to_vmem [thread:$0]  (!%p5535_p11), %s6663_s5, 1024, %s275_s20, [#allocation10], %s5431_s22, %s5431_s22, %s5432_s23  }
  0x37   : > { %s5566_s18 = sadd.s32 1, %s5426_s30   ;;  %s33_s16 = sadd.s32 1, %s5422_s29 }
  0x38   : > { %s30_s21 = ssub.s32 %s5426_s30, %s5566_s18  ;;  %p40_p6 = scmp.ne.s32.totalorder %s5422_s29, %s5418_s28 }
  0x39   : > { %p31_p4 = scmp.eq.s32.totalorder %s30_s21, 0  ;;  %p41_p12 = scmp.eq.s32.totalorder %s5426_s30, 0 }
  0x3a   : > { %p5118_p0 = scmp.lt.s32.totalorder %s5426_s30, 2  ;;  %p6688_p3 = scmp.eq.s32.totalorder %s5507_s9, 1 }
  0x3b   : > { %s5576_s24 = scalar_select %p31_p4, %s5422_s29, %s33_s16  }
  0x3c   : > { %p42_p5 = por %p41_p12, %p40_p6  ;;  %p5580_p10 = por %p6688_p3, %p40_p6 }
  0x3d   : > { %s294_s26 = sand.u32 1, %s5422_s29   ;;  %s4241_s10 = sshll.u32 %s5426_s30, 12 }
  0x3e   : > { %s6689_s25 = scalar_select %p5580_p10, 1, 0 }
  0x3f   : > { %s4110_s20 = sshll.u32 %s294_s26, 8  ;;  %s5589_s14 = scalar_lea.hbm %s6658_s0, %s4241_s10 }
  0x40   : > { %s298_s15 = scalar_lea.vmem [#allocation3], %s4110_s20  ;;  %p5591_p11 = pnand %p5118_p0, %p42_p5 }
  0x41   : > { %s305_s17 = sshll.u32 %s298_s15, 4  ;;  %s5597_s21 = scalar_lea.sflag [#allocation4], %s294_s26  ;;  %s5595_s17 = int_to_ptr.vmem [resolvable:$true] %s305_s17 }
  0x42   : > { %s5326_s16 = scalar_lea.hbm %s5589_s14, 4096  ;;  %p5328_p1 = pneg %p5591_p11 }
  0x43   : > { %p5327_p7 = scmp.ne.s32.totalorder %s5589_s14, %s5326_s16  ;;  %s5331_s20 = scalar_lea.hbm %s6658_s0, 8192 }
  0x44   : > { %p5332_p2 = scmp.lt.s32.totalorder %s5589_s14, %s6658_s0  ;;  %p5333_p4 = scmp.lt.s32.totalorder %s5331_s20, %s5326_s16 }
  0x45   : > { %p5329_p9 = pnand %p5328_p1, %p5327_p7 }
  0x46   : > { %p5334_p6 = por %p5333_p4, %p5332_p2 }
  0x47   : > { %p5330_p13 = pneg %p5329_p9 }
  0x49   : > { %p5335_p12 = pnand %p5334_p6, %p5330_p13 }
  0x4b   : > { %5338 = shalt.err (!%p5335_p12)
}
  0x4c   : > { %s5339_s26 = scalar_lea.vmem %s5595_s17, 4096  ;;  %s5433_s1 = smov [#allocation3]  }
  0x4d   : > { %p5340_p0 = scmp.ne.s32.totalorder %s5595_s17, %s5339_s26  ;;  %s5344_s3 = sshll.u32 %s5433_s1, 4  ;;  %s5345_s3 = int_to_ptr.vmem [resolvable:$false] %s5344_s3 }
  0x4e   : > { %s5346_s10 = scalar_lea.vmem %s5345_s3, 8192  ;;  %p5347_p7 = scmp.lt.s32.totalorder %s5595_s17, %s5345_s3 }
  0x4f   : > { %p5342_p5 = pnand %p5340_p0, %p5328_p1  ;;  %p5348_p9 = scmp.lt.s32.totalorder %s5346_s10, %s5339_s26 }
  0x51   : > { %p5343_p3 = pneg %p5342_p5  ;;  %p5349_p10 = por %p5348_p9, %p5347_p7 }
  0x53   : > { %p5350_p8 = pnand %p5349_p10, %p5343_p3 }
  0x55   : > { %5353 = shalt.err (!%p5350_p8)
}
  0x56   : > { %s5434_s16 = smov 128   ;;  %s5435_s22 = smov 8  }
  0x57   : > { %5110 = dma.hbm_to_vmem [thread:$0]  (!%p5591_p11), %s5589_s14, 4096, %s5595_s17, %s5597_s21, %s5434_s16, %s5434_s16, %s5435_s22  }
  0x58   : > { %p6691_p1 = scmp.ne.s32.totalorder %s6684_s13, 0 }
  0x5a   : > { %317 = sbr.rel (%p6691_p1) target bundleno = 1060 (0x424), region = 52 }
  0x5f   : > { %s5621_s1 = sand.u32 1, %s5418_s28   ;;  %p6692_p8 = scmp.ne.s32.totalorder %s6682_s11, 0 }
  0x60   : > { %s4114_s3 = sshll.u32 %s5621_s1, 8  ;;  %s320_s20 = scalar_lea.sflag [#allocation4], %s5621_s1 }
  0x61   : > { %s5627_s23 = scalar_lea.vmem [#allocation3], %s4114_s3 }
  0x62   : > { %5397 = dma.done.wait (%p6692_p8), %s320_s20, 4096  }
  0x63   : > { %5399 = vsyncadd (%p6692_p8), %s320_s20, 4294963200  ;;  %p6693_p10 = scmp.eq.s32.totalorder %s5507_s9, 0 }
  0x65   : > { %5401 = dma.done.wait (%p6693_p10), [#allocation7], 9344   ;;  %p6694_p11 = pmov %p6693_p10 }
  0x66   : > { %p6695_p13 = pmov %p6693_p10 }
  0x67   : > { %5403 = vsyncadd (%p6694_p11), [#allocation7], 4294957952 }
  0x68   : > { %5405 = dma.done.wait (%p6695_p13), [#allocation10], 1024   ;;  %p6696_p2 = pmov %p6693_p10 }
  0x69   : > { %v5165_v0 = vld [vmem:[#allocation6] sm:$0xff]   ;;  %v370_v2 = vld [vmem:[%s5627_s23 + $0x8] sm:$0xff]  ;;  %vm432_vm0 = vcmask 130048   ;;  %v371_v3 = vld [vmem:[%s5627_s23 + $0x10] sm:$0xff]  ;;  %v5436_v61 = vmov 0.0   ;;  %s6536_s10 = scalar_lea.vmem [#allocation11], %s4114_s3 }
  0x6a   : > { %5407 = vsyncadd (%p6696_p2), [#allocation10], 4294966272  ;;  %v369_v1 = vld [vmem:[%s5627_s23] sm:$0xff]  ;;  %4517 = vmatprep.subr.bf16.mxu0 %v5165_v0  ;;  %v372_v5 = vld [vmem:[%s5627_s23 + $0x18] sm:$0xff]  ;;  %674 = vst [vmem:[#allocation2] sm:$0xff] %v5436_v61  ;;  %s4242_s16 = sshll.u32 %s5507_s9, 12 }
  0x6b   : > { %v5644_v4 = vpack.c.bf16 %v370_v2, %v369_v1  ;;  %v373_v6 = vld [vmem:[%s5627_s23 + $0x20] sm:$0xff]  ;;  %v374_v7 = vld [vmem:[%s5627_s23 + $0x28] sm:$0xff]  ;;  %4518 = vmatpush3.bf16.msra.mxu0 %v5165_v0  ;;  %v5649_v8 = vpack.c.bf16 %v372_v5, %v371_v3  ;;  %v375_v10 = vld [vmem:[%s5627_s23 + $0x30] sm:$0xff]  ;;  %675 = vst [vmem:[#allocation2 + $0x8] sm:$0xff] %v5436_v61  ;;  %s4002_s22 = sshll.u32 %s6536_s10, 4  ;;  %s3989_s9 = scalar_lea.sflag [#allocation5], %s5621_s1  ;;  %s6612_s22 = int_to_ptr.vmem [resolvable:$true] %s4002_s22 }
  0x6c   : > { %v5651_v9 = vpack.c.bf16 %v374_v7, %v373_v6  ;;  %v376_v11 = vld [vmem:[%s5627_s23 + $0x38] sm:$0xff]  ;;  %v377_v12 = vld [vmem:[%s5627_s23 + $0x40] sm:$0xff]  ;;  %v378_v13 = vld [vmem:[%s5627_s23 + $0x48] sm:$0xff]  ;;  %676 = vst [vmem:[#allocation2 + $0x10] sm:$0x3] %v5436_v61  ;;  %v5437_v6 = vmov 0.0|0.0  }
  0x6d   : > { %4519 = vmatprep.mubr.msk.bf16.mxu0 %vm432_vm0, %v5644_v4  ;;  %v5663_v14 = vpack.c.bf16 %v376_v11, %v375_v10  ;;  %v5665_v15 = vpack.c.bf16 %v378_v13, %v377_v12  ;;  %v5166_v16 = vld [vmem:[#allocation8 + $0x38] sm:$0xff]   ;;  %v379_v17 = vld [vmem:[%s5627_s23 + $0x50] sm:$0xff]  ;;  %v380_v18 = vld [vmem:[%s5627_s23 + $0x58] sm:$0xff]  ;;  %678 = vst [vmem:[#allocation2 + $0x198] sm:$0xff] %v5436_v61  ;;  %s5354_s11 = scalar_lea.vmem %s6612_s22, 4096  ;;  %p6739_p6 = scmp.ne.s32.totalorder %s6689_s25, 0 }
  0x6e   : > { %4520 = vmatmul.mubr.msk.bf16.vlgmr.msra.gmra.mxu0 %vm432_vm0, %v5649_v8  ;;  %v5167_v19 = vld [vmem:[#allocation8 + $0x30] sm:$0xff]   ;;  %v381_v20 = vld [vmem:[%s5627_s23 + $0x60] sm:$0xff]  ;;  %4599 = vmatprep.subr.bf16.mxu0 %v5166_v16  ;;  %v382_v21 = vld [vmem:[%s5627_s23 + $0x68] sm:$0xff]  ;;  %v5675_v24 = vpack.c.bf16 %v380_v18, %v379_v17  ;;  %679 = vst [vmem:[#allocation2 + $0x1a0] sm:$0xff] %v5436_v61  ;;  %p5355_p4 = scmp.ne.s32.totalorder %s6612_s22, %s5354_s11  ;;  %s5438_s13 = smov [#allocation11]  }
  0x6f   : > { %4523 = vmatprep.mubr.msk.bf16.mxu0 %vm432_vm0, %v5651_v9  ;;  %4600 = vmatpush3.bf16.msra.mxu0 %v5166_v16  ;;  %v5168_v22 = vld [vmem:[#allocation8 + $0x28] sm:$0xff]   ;;  %v5171_v23 = vld [vmem:[#allocation8 + $0x78] sm:$0xff]   ;;  %v5172_v25 = vld [vmem:[#allocation8 + $0x70] sm:$0xff]   ;;  %v5677_v26 = vpack.c.bf16 %v382_v21, %v381_v20  ;;  %680 = vst [vmem:[#allocation2 + $0x1a8] sm:$0x3] %v5436_v61  ;;  %s5358_s14 = sshll.u32 %s5438_s13, 4  ;;  %s5359_s14 = int_to_ptr.vmem [resolvable:$false] %s5358_s14 }
  0x70   : > { %4601 = vmatprep.subr.bf16.mxu0 %v5167_v19  ;;  %v5169_v27 = vld [vmem:[#allocation8 + $0x20] sm:$0xff]   ;;  %4551 = vmatprep.subr.bf16.mxu1 %v5171_v23  ;;  %v5174_v28 = vld [vmem:[#allocation8 + $0x68] sm:$0xff]   ;;  %v384_v30 = vld [vmem:[%s5627_s23 + $0x78] sm:$0xff]  ;;  %682 = vst [vmem:[#allocation2 + $0x18] sm:$0x1] %v5436_v61  ;;  %p5356_p12 = pnand %p5355_p4, %p6739_p6  ;;  %s5360_s17 = scalar_lea.vmem %s5359_s14, 8192 }
  0x71   : > { %4552 = vmatpush3.bf16.msra.mxu1 %v5171_v23  ;;  %v383_v29 = vld [vmem:[%s5627_s23 + $0x70] sm:$0xff]  ;;  %v385_v31 = vld [vmem:[%s5627_s23 + $0x80] sm:$0xff]  ;;  %v386_v32 = vld [vmem:[%s5627_s23 + $0x88] sm:$0xff]  ;;  %683 = vst [vmem:[#allocation2 + $0x30] sm:$0x1] %v5436_v61  ;;  %p5361_p5 = scmp.lt.s32.totalorder %s6612_s22, %s5359_s14  ;;  %p5362_p3 = scmp.lt.s32.totalorder %s5360_s17, %s5354_s11 }
  0x72   : > { %4553 = vmatprep.subr.bf16.mxu1 %v5172_v25  ;;  %v5170_v33 = vld [vmem:[#allocation8 + $0x18] sm:$0xff]   ;;  %v5687_v34 = vpack.c.bf16 %v384_v30, %v383_v29  ;;  %v5173_v35 = vld [vmem:[#allocation8 + $0x10] sm:$0xff]   ;;  %v5689_v36 = vpack.c.bf16 %v386_v32, %v385_v31  ;;  %v387_v37 = vld [vmem:[%s5627_s23 + $0x90] sm:$0xff]  ;;  %684 = vst [vmem:[#allocation2 + $0x48] sm:$0x1] %v5436_v61  ;;  %p5357_p0 = pneg %p5356_p12 }
  0x73   : > { %4602 = vmatpush3.bf16.msra.mxu0 %v5167_v19  ;;  %v388_v38 = vld [vmem:[%s5627_s23 + $0x98] sm:$0xff]  ;;  %v389_v39 = vld [vmem:[%s5627_s23 + $0xa0] sm:$0xff]  ;;  %v390_v40 = vld [vmem:[%s5627_s23 + $0xa8] sm:$0xff]  ;;  %685 = vst [vmem:[#allocation2 + $0x60] sm:$0x1] %v5436_v61  ;;  %p5363_p7 = por %p5362_p3, %p5361_p5 }
  0x74   : > { %4603 = vmatprep.subr.bf16.mxu0 %v5168_v22  ;;  %6697 = vst [vmem:[#allocation16_spill] sm:$0xff] %v5687_v34  ;;  %6698 = vst [vmem:[#allocation17_spill] sm:$0xff] %v5689_v36  ;;  %v5699_v41 = vpack.c.bf16 %v388_v38, %v387_v37  ;;  %v5701_v42 = vpack.c.bf16 %v390_v40, %v389_v39  ;;  %v391_v43 = vld [vmem:[%s5627_s23 + $0xb0] sm:$0xff]  ;;  %v392_v44 = vld [vmem:[%s5627_s23 + $0xb8] sm:$0xff] }
  0x75   : > { %4554 = vmatpush3.bf16.msra.mxu1 %v5172_v25  ;;  %v393_v45 = vld [vmem:[%s5627_s23 + $0xc0] sm:$0xff]  ;;  %v394_v46 = vld [vmem:[%s5627_s23 + $0xc8] sm:$0xff]  ;;  %v5711_v47 = vpack.c.bf16 %v392_v44, %v391_v43  ;;  %v395_v49 = vld [vmem:[%s5627_s23 + $0xd0] sm:$0xff]  ;;  %686 = vst [vmem:[#allocation2 + $0x78] sm:$0x1] %v5436_v61  ;;  %p5364_p9 = pnand %p5363_p7, %p5357_p0 }
  0x76   : > { %4524 = vmatmul.mubr.msk.bf16.gmra.mxu0 %vm432_vm0, %v5663_v14  ;;  %4555 = vmatprep.subr.bf16.mxu1 %v5174_v28  ;;  %6699 = vst [vmem:[#allocation18_spill] sm:$0xff] %v5699_v41  ;;  %6700 = vst [vmem:[#allocation19_spill] sm:$0xff] %v5701_v42  ;;  %v5713_v48 = vpack.c.bf16 %v394_v46, %v393_v45  ;;  %v396_v50 = vld [vmem:[%s5627_s23 + $0xd8] sm:$0xff]  ;;  %v397_v51 = vld [vmem:[%s5627_s23 + $0xe0] sm:$0xff] }
  0x77   : > { %4527 = vmatprep.mubr.msk.bf16.mxu0 %vm432_vm0, %v5665_v15  ;;  %4604 = vmatpush3.bf16.msra.mxu0 %v5168_v22  ;;  %6701 = vst [vmem:[#allocation20_spill] sm:$0xff] %v5711_v47  ;;  %v398_v52 = vld [vmem:[%s5627_s23 + $0xe8] sm:$0xff]  ;;  %v5723_v53 = vpack.c.bf16 %v396_v50, %v395_v49  ;;  %v399_v55 = vld [vmem:[%s5627_s23 + $0xf0] sm:$0xff]  ;;  %v400_v56 = vld [vmem:[%s5627_s23 + $0xf8] sm:$0xff]  ;;  %s6610_s23 = scalar_lea.hbm %s6666_s8, %s4242_s16 }
  0x78   : > { %4605 = vmatprep.subr.bf16.mxu0 %v5169_v27  ;;  %6702 = vst [vmem:[#allocation21_spill] sm:$0xff] %v5713_v48  ;;  %v5725_v54 = vpack.c.bf16 %v398_v52, %v397_v51  ;;  %v5733_v57 = vpack.c.bf16 %v400_v56, %v399_v55  ;;  %v5175_v58 = vld [vmem:[#allocation8 + $0x60] sm:$0xff]   ;;  %v5177_v59 = vld [vmem:[#allocation8 + $0x58] sm:$0xff]   ;;  %v5178_v60 = vld [vmem:[#allocation8 + $0x50] sm:$0xff]  }
  0x79   : > { %4556 = vmatpush3.bf16.msra.mxu1 %v5174_v28  ;;  %6703 = vst [vmem:[#allocation22_spill] sm:$0xff] %v5723_v53  ;;  %687 = vst [vmem:[#allocation2 + $0x90] sm:$0x1] %v5436_v61  ;;  %v5180_v62 = vld [vmem:[#allocation8 + $0x48] sm:$0xff]   ;;  %v5181_v63 = vld [vmem:[#allocation8 + $0x40] sm:$0xff]  }
  0x7a   : > { %6704 = vst [vmem:[#allocation23_spill] sm:$0xff] %v5725_v54  ;;  %6705 = vst [vmem:[#allocation24_spill] sm:$0xff] %v5733_v57  ;;  %4557 = vmatprep.subr.bf16.mxu1 %v5175_v58  ;;  %v5176_v0 = vld [vmem:[#allocation8 + $0x8] sm:$0xff]   ;;  %v811_v2 = vld [vmem:[#allocation2 + $0x9] sm:$0xff] }
  0x7b   : > { %4606 = vmatpush3.bf16.msra.mxu0 %v5169_v27  ;;  %688 = vst [vmem:[#allocation2 + $0xa8] sm:$0x1] %v5436_v61  ;;  %689 = vst [vmem:[#allocation2 + $0xc0] sm:$0x1] %v5436_v61  ;;  %v810_v1 = vld [vmem:[#allocation2 + $0x1] sm:$0xff]  ;;  %v5179_v5 = vld [vmem:[#allocation8] sm:$0xff]  }
  0x7c   : > { %4607 = vmatprep.subr.bf16.mxu0 %v5170_v33  ;;  %690 = vst [vmem:[#allocation2 + $0xd8] sm:$0x1] %v5436_v61  ;;  %691 = vst [vmem:[#allocation2 + $0xf0] sm:$0x1] %v5436_v61  ;;  %v842_v3 = vpack.c.bf16 %v811_v2, %v810_v1  ;;  %v5737_v7 = vld [vmem:[#allocation8 + $0xf8] sm:$0xff]   ;;  %v5187_v46 = vld [vmem:[#allocation8 + $0xa8] sm:$0xff]  }
  0x7d   : > { %4558 = vmatpush3.bf16.msra.mxu1 %v5175_v58  ;;  %692 = vst [vmem:[#allocation2 + $0x108] sm:$0x1] %v5436_v61  ;;  %693 = vst [vmem:[#allocation2 + $0x120] sm:$0x1] %v5436_v61  ;;  %v5183_v10 = vld [vmem:[#allocation8 + $0xb8] sm:$0xff]  }
  0x7e   : > { %4528 = vmatmul.mubr.msk.bf16.gmra.mxu0 %vm432_vm0, %v5675_v24  ;;  %4559 = vmatprep.subr.bf16.mxu1 %v5177_v59  ;;  %694 = vst [vmem:[#allocation2 + $0x138] sm:$0x1] %v5436_v61  ;;  %695 = vst [vmem:[#allocation2 + $0x150] sm:$0x1] %v5436_v61  ;;  %v5743_v11 = vld [vmem:[%s6660_s2] ss:$0 sm:$0xff] }
  0x7f   : > { %4531 = vmatprep.mubr.msk.bf16.mxu0 %vm432_vm0, %v5677_v26  ;;  %4608 = vmatpush3.bf16.msra.mxu0 %v5170_v33  ;;  %696 = vst [vmem:[#allocation2 + $0x168] sm:$0x1] %v5436_v61  ;;  %697 = vst [vmem:[#allocation2 + $0x180] sm:$0x1] %v5436_v61 }
  0x80   : > { %4609 = vmatprep.subr.bf16.mxu0 %v5173_v35  ;;  %698 = vst [vmem:[#allocation2 + $0x29] sm:$0x1] %v5436_v61  ;;  %699 = vst [vmem:[#allocation2 + $0x41] sm:$0x1] %v5436_v61  ;;  %4567 = vmatprep.mubr.bf16.mxu1 %v842_v3 }
  0x81   : > { %4560 = vmatpush3.bf16.msra.mxu1 %v5177_v59  ;;  %700 = vst [vmem:[#allocation2 + $0x59] sm:$0x1] %v5436_v61  ;;  %701 = vst [vmem:[#allocation2 + $0x71] sm:$0x1] %v5436_v61 }
  0x82   : > { %4561 = vmatprep.subr.bf16.mxu1 %v5178_v60  ;;  %702 = vst [vmem:[#allocation2 + $0x89] sm:$0x1] %v5436_v61  ;;  %703 = vst [vmem:[#allocation2 + $0xa1] sm:$0x1] %v5436_v61 }
  0x83   : > { %4610 = vmatpush3.bf16.msra.mxu0 %v5173_v35  ;;  %704 = vst [vmem:[#allocation2 + $0xb9] sm:$0x1] %v5436_v61  ;;  %705 = vst [vmem:[#allocation2 + $0xd1] sm:$0x1] %v5436_v61  ;;  %v5185_v35 = vld [vmem:[#allocation8 + $0xb0] sm:$0xff]  }
  0x84   : > { %706 = vst [vmem:[#allocation2 + $0xe9] sm:$0x1] %v5436_v61  ;;  %707 = vst [vmem:[#allocation2 + $0x101] sm:$0x1] %v5436_v61  ;;  %4611 = vmatprep.subr.bf16.mxu0 %v5176_v0 }
  0x85   : > { %4562 = vmatpush3.bf16.msra.mxu1 %v5178_v60  ;;  %708 = vst [vmem:[#allocation2 + $0x119] sm:$0x1] %v5436_v61  ;;  %709 = vst [vmem:[#allocation2 + $0x131] sm:$0x1] %v5436_v61 }
  0x86   : > { %4532 = vmatmul.mubr.msk.bf16.gmra.mxu0 %vm432_vm0, %v5687_v34  ;;  %710 = vst [vmem:[#allocation2 + $0x149] sm:$0x1] %v5436_v61  ;;  %711 = vst [vmem:[#allocation2 + $0x161] sm:$0x1] %v5436_v61  ;;  %4563 = vmatprep.subr.bf16.mxu1 %v5180_v62 }
  0x87   : > { %4535 = vmatprep.mubr.msk.bf16.mxu0 %vm432_vm0, %v5689_v36  ;;  %712 = vst [vmem:[#allocation2 + $0x179] sm:$0x1] %v5436_v61  ;;  %713 = vst [vmem:[#allocation2 + $0x191] sm:$0x1] %v5436_v61  ;;  %4612 = vmatpush3.bf16.msra.mxu0 %v5176_v0 }
  0x88   : > { %4613 = vmatprep.subr.bf16.mxu0 %v5179_v5 }
  0x89   : > { %4564 = vmatpush3.bf16.msra.mxu1 %v5180_v62 }
  0x8a   : > { %4565 = vmatprep.subr.bf16.mxu1 %v5181_v63 }
  0x8b   : > { %4614 = vmatpush3.bf16.msra.mxu0 %v5179_v5 }
  0x8c   : > { %4695 = vmatprep.subr.bf16.mxu0 %v5737_v7 }
  0x8d   : > { %4566 = vmatpush3.bf16.msra.mxu1 %v5181_v63  ;;  %v5184_v63 = vld [vmem:[#allocation8 + $0xf0] sm:$0xff]  }
  0x8e   : > { %4536 = vmatmul.mubr.msk.bf16.gmra.mxu0 %vm432_vm0, %v5699_v41  ;;  %4647 = vmatprep.subr.bf16.mxu1 %v5183_v10 }
  0x8f   : > { %4539 = vmatprep.mubr.msk.bf16.mxu0 %vm432_vm0, %v5701_v42 }
  0x96   : > { %4540 = vmatmul.mubr.msk.bf16.gmra.mxu0 %vm432_vm0, %v5711_v47 }
  0x97   : > { %4543 = vmatprep.mubr.msk.bf16.mxu0 %vm432_vm0, %v5713_v48 }
  0x9e   : > { %4544 = vmatmul.mubr.msk.bf16.gmra.mxu0 %vm432_vm0, %v5723_v53 }
  0x9f   : > { %4547 = vmatprep.mubr.msk.bf16.mxu0 %vm432_vm0, %v5725_v54 }
  0xa6   : > { %4548 = vmatmul.mubr.msk.bf16.gmra.mxu0 %vm432_vm0, %v5733_v57 }
  0xa7   : > { %4615 = vmatprep.mubr.bf16.mxu0 %v5437_v6 }
 0x12e   : > { %v4521_v12 = vpop.f32.mrf.mxu0 }
 0x12f   : > { %v524_v13 = vadd.f32 %v4521_v12, %v5743_v11 }
 0x130   : > { %v515_v16 = vpop.f32.mrf.mxu0 }
 0x131   : > { %v644_v17 = vmax.f32 %v524_v13, 0.0  ;;  %v516_v18 = vadd.f32 %v5743_v11, %v515_v16 }
 0x132   : > { %v4522_v19 = vpop.f32.mrf.mxu0 }
 0x133   : > { %716 = vst [vmem:[#allocation2 + $0x31] sm:$0xff] %v644_v17  ;;  %v642_v20 = vmax.f32 %v516_v18, 0.0  ;;  %v527_v21 = vadd.f32 %v4522_v19, %v5743_v11 }
 0x134   : > { %v518_v22 = vpop.f32.mrf.mxu0 }
 0x135   : > { %714 = vst [vmem:[#allocation2 + $0x19] sm:$0xff] %v642_v20  ;;  %v645_v23 = vmax.f32 %v527_v21, 0.0  ;;  %v519_v25 = vadd.f32 %v5743_v11, %v518_v22 }
 0x136   : > { %v4525_v27 = vpop.f32.mrf.mxu0 }
 0x137   : > { %717 = vst [vmem:[#allocation2 + $0x39] sm:$0xff] %v645_v23  ;;  %v643_v28 = vmax.f32 %v519_v25, 0.0  ;;  %v540_v29 = vadd.f32 %v4525_v27, %v5743_v11  ;;  %v844_v38 = vpack.c.bf16 %v645_v23, %v644_v17  ;;  %v5186_v17 = vld [vmem:[#allocation8 + $0xe8] sm:$0xff]  }
 0x138   : > { %v531_v30 = vpop.f32.mrf.mxu0 }
 0x139   : > { %715 = vst [vmem:[#allocation2 + $0x21] sm:$0xff] %v643_v28  ;;  %v648_v31 = vmax.f32 %v540_v29, 0.0  ;;  %v532_v32 = vadd.f32 %v5743_v11, %v531_v30  ;;  %v843_v33 = vpack.c.bf16 %v643_v28, %v642_v20 }
 0x13a   : > { %v4526_v37 = vpop.f32.mrf.mxu0  ;;  %v750_v62 = vld [vmem:[#allocation2 + $0x30] sm:$0xff] }
 0x13b   : > { %720 = vst [vmem:[#allocation2 + $0x61] sm:$0xff] %v648_v31  ;;  %v646_v39 = vmax.f32 %v532_v32, 0.0  ;;  %v543_v40 = vadd.f32 %v4526_v37, %v5743_v11  ;;  %4568 = vmatmul.mubr.bf16.vlgmr.msra.gmra.mxu1 %v843_v33 }
 0x13c   : > { %v534_v43 = vpop.f32.mrf.mxu0  ;;  %4571 = vmatprep.mubr.bf16.mxu1 %v844_v38  ;;  %4648 = vmatpush3.bf16.msra.mxu1 %v5183_v10  ;;  %v748_v56 = vld [vmem:[#allocation2 + $0x18] sm:$0xff] }
 0x13d   : > { %718 = vst [vmem:[#allocation2 + $0x49] sm:$0xff] %v646_v39  ;;  %v649_v44 = vmax.f32 %v543_v40, 0.0  ;;  %v535_v45 = vadd.f32 %v5743_v11, %v534_v43  ;;  %4649 = vmatprep.subr.bf16.mxu1 %v5185_v35  ;;  %v5189_v10 = vld [vmem:[#allocation8 + $0xa0] sm:$0xff]   ;;  %v5193_v43 = vld [vmem:[#allocation8 + $0x90] sm:$0xff]  }
 0x13e   : > { %v4529_v49 = vpop.f32.mrf.mxu0  ;;  %v751_v52 = vld [vmem:[#allocation2 + $0x38] sm:$0xff] }
 0x13f   : > { %721 = vst [vmem:[#allocation2 + $0x69] sm:$0xff] %v649_v44  ;;  %v647_v50 = vmax.f32 %v535_v45, 0.0  ;;  %v556_v51 = vadd.f32 %v4529_v49, %v5743_v11  ;;  %v5757_v2 = vpack.c.bf16 %v751_v52, %v750_v62  ;;  %v846_v6 = vpack.c.bf16 %v649_v44, %v648_v31  ;;  %v5188_v31 = vld [vmem:[#allocation8 + $0xe0] sm:$0xff]  }
 0x140   : > { %v547_v55 = vpop.f32.mrf.mxu0  ;;  %v749_v58 = vld [vmem:[#allocation2 + $0x20] sm:$0xff]  ;;  %4650 = vmatpush3.bf16.msra.mxu1 %v5185_v35  ;;  %v5191_v35 = vld [vmem:[#allocation8 + $0x98] sm:$0xff]  }
 0x141   : > { %719 = vst [vmem:[#allocation2 + $0x51] sm:$0xff] %v647_v50  ;;  %v652_v59 = vmax.f32 %v556_v51, 0.0  ;;  %v548_v60 = vadd.f32 %v5743_v11, %v547_v55  ;;  %v5755_v61 = vpack.c.bf16 %v749_v58, %v748_v56  ;;  %v845_v0 = vpack.c.bf16 %v647_v50, %v646_v39  ;;  %4651 = vmatprep.subr.bf16.mxu1 %v5187_v46 }
 0x142   : > { %v4530_v1 = vpop.f32.mrf.mxu0  ;;  %v754_v29 = vld [vmem:[#allocation2 + $0x60] sm:$0xff] }
 0x143   : > { %724 = vst [vmem:[#allocation2 + $0x91] sm:$0xff] %v652_v59  ;;  %v650_v3 = vmax.f32 %v548_v60, 0.0  ;;  %v559_v5 = vadd.f32 %v4530_v1, %v5743_v11  ;;  %4616 = vmatmul.mubr.bf16.vlgmr.msra.gmra.mxu0 %v5755_v61  ;;  %4572 = vmatmul.mubr.bf16.gmra.mxu1 %v845_v0 }
 0x144   : > { %4696 = vmatpush3.bf16.msra.mxu0 %v5737_v7  ;;  %v550_v12 = vpop.f32.mrf.mxu0  ;;  %4619 = vmatprep.mubr.bf16.mxu0 %v5757_v2  ;;  %v752_v7 = vld [vmem:[#allocation2 + $0x48] sm:$0xff] }
 0x145   : > { %722 = vst [vmem:[#allocation2 + $0x79] sm:$0xff] %v650_v3  ;;  %v653_v13 = vmax.f32 %v559_v5, 0.0  ;;  %v551_v16 = vadd.f32 %v5743_v11, %v550_v12  ;;  %4697 = vmatprep.subr.bf16.mxu0 %v5184_v63  ;;  %4575 = vmatprep.mubr.bf16.mxu1 %v846_v6  ;;  %v5192_v6 = vld [vmem:[#allocation8 + $0xd0] sm:$0xff]  }
 0x146   : > { %v4533_v18 = vpop.f32.mrf.mxu0  ;;  %4652 = vmatpush3.bf16.msra.mxu1 %v5187_v46  ;;  %v755_v21 = vld [vmem:[#allocation2 + $0x68] sm:$0xff]  ;;  %v5190_v46 = vld [vmem:[#allocation8 + $0xd8] sm:$0xff]  }
 0x147   : > { %725 = vst [vmem:[#allocation2 + $0x99] sm:$0xff] %v653_v13  ;;  %v651_v19 = vmax.f32 %v551_v16, 0.0  ;;  %v572_v20 = vadd.f32 %v4533_v18, %v5743_v11  ;;  %4653 = vmatprep.subr.bf16.mxu1 %v5189_v10  ;;  %v5768_v33 = vpack.c.bf16 %v755_v21, %v754_v29  ;;  %v848_v39 = vpack.c.bf16 %v653_v13, %v652_v59  ;;  %v5197_v21 = vld [vmem:[#allocation8 + $0x80] sm:$0xff]  }
 0x148   : > { %v563_v22 = vpop.f32.mrf.mxu0  ;;  %v753_v23 = vld [vmem:[#allocation2 + $0x50] sm:$0xff]  ;;  %4698 = vmatpush3.bf16.msra.mxu0 %v5184_v63 }
 0x149   : > { %723 = vst [vmem:[#allocation2 + $0x81] sm:$0xff] %v651_v19  ;;  %v656_v25 = vmax.f32 %v572_v20, 0.0  ;;  %v564_v27 = vadd.f32 %v5743_v11, %v563_v22  ;;  %v5766_v28 = vpack.c.bf16 %v753_v23, %v752_v7  ;;  %4699 = vmatprep.subr.bf16.mxu0 %v5186_v17  ;;  %v847_v30 = vpack.c.bf16 %v651_v19, %v650_v3  ;;  %v5194_v20 = vld [vmem:[#allocation8 + $0xc8] sm:$0xff]   ;;  %v3133_v42 = vld [vmem:[#allocation2 + $0x52] sm:$0xff] }
 0x14a   : > { %v4534_v32 = vpop.f32.mrf.mxu0  ;;  %4654 = vmatpush3.bf16.msra.mxu1 %v5189_v10  ;;  %v758_v63 = vld [vmem:[#allocation2 + $0x90] sm:$0xff]  ;;  %v5195_v10 = vld [vmem:[#allocation8 + $0x88] sm:$0xff]  }
 0x14b   : > { %728 = vst [vmem:[#allocation2 + $0xc1] sm:$0xff] %v656_v25  ;;  %v654_v37 = vmax.f32 %v564_v27, 0.0  ;;  %v575_v38 = vadd.f32 %v4534_v32, %v5743_v11  ;;  %4620 = vmatmul.mubr.bf16.gmra.mxu0 %v5766_v28  ;;  %4576 = vmatmul.mubr.bf16.gmra.mxu1 %v847_v30 }
 0x14c   : > { %v566_v40 = vpop.f32.mrf.mxu0  ;;  %4623 = vmatprep.mubr.bf16.mxu0 %v5768_v33  ;;  %4700 = vmatpush3.bf16.msra.mxu0 %v5186_v17  ;;  %v756_v56 = vld [vmem:[#allocation2 + $0x78] sm:$0xff] }
 0x14d   : > { %726 = vst [vmem:[#allocation2 + $0xa9] sm:$0xff] %v654_v37  ;;  %v657_v44 = vmax.f32 %v575_v38, 0.0  ;;  %v567_v45 = vadd.f32 %v5743_v11, %v566_v40  ;;  %4579 = vmatprep.mubr.bf16.mxu1 %v848_v39  ;;  %4701 = vmatprep.subr.bf16.mxu0 %v5188_v31 }
 0x14e   : > { %v4537_v49 = vpop.f32.mrf.mxu0  ;;  %4655 = vmatprep.subr.bf16.mxu1 %v5191_v35  ;;  %v759_v52 = vld [vmem:[#allocation2 + $0x98] sm:$0xff] }
 0x14f   : > { %729 = vst [vmem:[#allocation2 + $0xc9] sm:$0xff] %v657_v44  ;;  %v5774_v50 = vmax.f32 %v567_v45, 0.0  ;;  %v588_v51 = vadd.f32 %v4537_v49, %v5743_v11  ;;  %4656 = vmatpush3.bf16.msra.mxu1 %v5191_v35  ;;  %v5782_v3 = vpack.c.bf16 %v759_v52, %v758_v63  ;;  %v850_v5 = vpack.c.bf16 %v657_v44, %v656_v25  ;;  %v5798_v44 = vld [vmem:[#allocation8 + $0x138] sm:$0xff]  }
 0x150   : > { %v579_v55 = vpop.f32.mrf.mxu0  ;;  %v757_v58 = vld [vmem:[#allocation2 + $0x80] sm:$0xff]  ;;  %4702 = vmatpush3.bf16.msra.mxu0 %v5188_v31  ;;  %4657 = vmatprep.subr.bf16.mxu1 %v5193_v43 }
 0x151   : > { %727 = vst [vmem:[#allocation2 + $0xb1] sm:$0xff] %v5774_v50  ;;  %v660_v59 = vmax.f32 %v588_v51, 0.0  ;;  %v580_v60 = vadd.f32 %v5743_v11, %v579_v55  ;;  %v5779_v62 = vpack.c.bf16 %v757_v58, %v756_v56  ;;  %v849_v0 = vpack.c.bf16 %v5774_v50, %v654_v37  ;;  %4703 = vmatprep.subr.bf16.mxu0 %v5190_v46  ;;  %v5804_v56 = vld [vmem:[#allocation8 + $0x178] sm:$0xff]   ;;  %v3137_v57 = vld [vmem:[#allocation2 + $0x82] sm:$0xff] }
 0x152   : > { %v4538_v1 = vpop.f32.mrf.mxu0  ;;  %v762_v35 = vld [vmem:[#allocation2 + $0xc0] sm:$0xff] }
 0x153   : > { %732 = vst [vmem:[#allocation2 + $0xf1] sm:$0xff] %v660_v59  ;;  %v658_v12 = vmax.f32 %v580_v60, 0.0  ;;  %v591_v13 = vadd.f32 %v4538_v1, %v5743_v11  ;;  %4624 = vmatmul.mubr.bf16.gmra.mxu0 %v5779_v62  ;;  %4580 = vmatmul.mubr.bf16.gmra.mxu1 %v849_v0 }
 0x154   : > { %v582_v16 = vpop.f32.mrf.mxu0  ;;  %4627 = vmatprep.mubr.bf16.mxu0 %v5782_v3  ;;  %4583 = vmatprep.mubr.bf16.mxu1 %v850_v5  ;;  %v760_v27 = vld [vmem:[#allocation2 + $0xa8] sm:$0xff] }
 0x155   : > { %730 = vst [vmem:[#allocation2 + $0xd9] sm:$0xff] %v658_v12  ;;  %v661_v17 = vmax.f32 %v591_v13, 0.0  ;;  %v583_v18 = vadd.f32 %v5743_v11, %v582_v16  ;;  %4704 = vmatpush3.bf16.msra.mxu0 %v5190_v46  ;;  %4658 = vmatpush3.bf16.msra.mxu1 %v5193_v43  ;;  %v5196_v43 = vld [vmem:[#allocation8 + $0xc0] sm:$0xff]  }
 0x156   : > { %v4541_v19 = vpop.f32.mrf.mxu0  ;;  %4705 = vmatprep.subr.bf16.mxu0 %v5192_v6  ;;  %4659 = vmatprep.subr.bf16.mxu1 %v5195_v10  ;;  %v763_v23 = vld [vmem:[#allocation2 + $0xc8] sm:$0xff] }
 0x157   : > { %733 = vst [vmem:[#allocation2 + $0xf9] sm:$0xff] %v661_v17  ;;  %v5788_v22 = vmax.f32 %v583_v18, 0.0  ;;  %v604_v7 = vadd.f32 %v4541_v19, %v5743_v11  ;;  %v5796_v39 = vpack.c.bf16 %v763_v23, %v762_v35  ;;  %v852_v40 = vpack.c.bf16 %v661_v17, %v660_v59 }
 0x158   : > { %v595_v25 = vpop.f32.mrf.mxu0  ;;  %v761_v29 = vld [vmem:[#allocation2 + $0xb0] sm:$0xff] }
 0x159   : > { %731 = vst [vmem:[#allocation2 + $0xe1] sm:$0xff] %v5788_v22  ;;  %v664_v30 = vmax.f32 %v604_v7, 0.0  ;;  %v596_v31 = vadd.f32 %v5743_v11, %v595_v25  ;;  %v5793_v32 = vpack.c.bf16 %v761_v29, %v760_v27  ;;  %v851_v37 = vpack.c.bf16 %v5788_v22, %v658_v12  ;;  %4706 = vmatpush3.bf16.msra.mxu0 %v5192_v6 }
 0x15a   : > { %4660 = vmatpush3.bf16.msra.mxu1 %v5195_v10  ;;  %v4542_v38 = vpop.f32.mrf.mxu0  ;;  %4707 = vmatprep.subr.bf16.mxu0 %v5194_v20  ;;  %v766_v12 = vld [vmem:[#allocation2 + $0xf0] sm:$0xff] }
 0x15b   : > { %4661 = vmatprep.subr.bf16.mxu1 %v5197_v21  ;;  %736 = vst [vmem:[#allocation2 + $0x121] sm:$0xff] %v664_v30  ;;  %v662_v45 = vmax.f32 %v596_v31, 0.0  ;;  %v607_v46 = vadd.f32 %v4542_v38, %v5743_v11  ;;  %4628 = vmatmul.mubr.bf16.gmra.mxu0 %v5793_v32 }
 0x15c   : > { %4584 = vmatmul.mubr.bf16.gmra.mxu1 %v851_v37  ;;  %v598_v49 = vpop.f32.mrf.mxu0  ;;  %4631 = vmatprep.mubr.bf16.mxu0 %v5796_v39  ;;  %v764_v0 = vld [vmem:[#allocation2 + $0xd8] sm:$0xff] }
 0x15d   : > { %4587 = vmatprep.mubr.bf16.mxu1 %v852_v40  ;;  %734 = vst [vmem:[#allocation2 + $0x109] sm:$0xff] %v662_v45  ;;  %v665_v51 = vmax.f32 %v607_v46, 0.0  ;;  %v599_v52 = vadd.f32 %v5743_v11, %v598_v49  ;;  %4708 = vmatpush3.bf16.msra.mxu0 %v5194_v20 }
 0x15e   : > { %4662 = vmatpush3.bf16.msra.mxu1 %v5197_v21  ;;  %v4545_v55 = vpop.f32.mrf.mxu0  ;;  %4709 = vmatprep.subr.bf16.mxu0 %v5196_v43  ;;  %v767_v60 = vld [vmem:[#allocation2 + $0xf8] sm:$0xff] }
 0x15f   : > { %4743 = vmatprep.subr.bf16.mxu1 %v5798_v44  ;;  %737 = vst [vmem:[#allocation2 + $0x129] sm:$0xff] %v665_v51  ;;  %v663_v58 = vmax.f32 %v599_v52, 0.0  ;;  %v620_v59 = vadd.f32 %v4545_v55, %v5743_v11  ;;  %v5813_v17 = vpack.c.bf16 %v767_v60, %v766_v12  ;;  %v854_v18 = vpack.c.bf16 %v665_v51, %v664_v30 }
 0x160   : > { %v611_v63 = vpop.f32.mrf.mxu0  ;;  %v765_v1 = vld [vmem:[#allocation2 + $0xe0] sm:$0xff] }
 0x161   : > { %735 = vst [vmem:[#allocation2 + $0x111] sm:$0xff] %v663_v58  ;;  %v668_v5 = vmax.f32 %v620_v59, 0.0  ;;  %v612_v6 = vadd.f32 %v5743_v11, %v611_v63  ;;  %v5809_v10 = vpack.c.bf16 %v765_v1, %v764_v0  ;;  %v5811_v13 = vpack.c.bf16 %v663_v58, %v662_v45  ;;  %4710 = vmatpush3.bf16.msra.mxu0 %v5196_v43  ;;  %v1293_v0 = vld [vmem:[#allocation2 + $0x2] sm:$0xff]  ;;  %v1294_v1 = vld [vmem:[#allocation2 + $0xa] sm:$0xff] }
 0x162   : > { %v4546_v16 = vpop.f32.mrf.mxu0  ;;  %4791 = vmatprep.subr.bf16.mxu0 %v5804_v56  ;;  %v770_v45 = vld [vmem:[#allocation2 + $0x120] sm:$0xff] }
 0x163   : > { %740 = vst [vmem:[#allocation2 + $0x151] sm:$0xff] %v668_v5  ;;  %v666_v19 = vmax.f32 %v612_v6, 0.0  ;;  %v623_v20 = vadd.f32 %v4546_v16, %v5743_v11  ;;  %4632 = vmatmul.mubr.bf16.gmra.mxu0 %v5809_v10 }
 0x164   : > { %4588 = vmatmul.mubr.bf16.gmra.mxu1 %v5811_v13  ;;  %v614_v21 = vpop.f32.mrf.mxu0  ;;  %4635 = vmatprep.mubr.bf16.mxu0 %v5813_v17  ;;  %v768_v35 = vld [vmem:[#allocation2 + $0x108] sm:$0xff] }
 0x165   : > { %4591 = vmatprep.mubr.bf16.mxu1 %v854_v18  ;;  %738 = vst [vmem:[#allocation2 + $0x139] sm:$0xff] %v666_v19  ;;  %v669_v7 = vmax.f32 %v623_v20, 0.0  ;;  %v615_v23 = vadd.f32 %v5743_v11, %v614_v21 }
 0x166   : > { %v4549_v25 = vpop.f32.mrf.mxu0  ;;  %v771_v30 = vld [vmem:[#allocation2 + $0x128] sm:$0xff] }
 0x167   : > { %741 = vst [vmem:[#allocation2 + $0x159] sm:$0xff] %v669_v7  ;;  %v667_v27 = vmax.f32 %v615_v23, 0.0  ;;  %v636_v29 = vadd.f32 %v4549_v25, %v5743_v11  ;;  %v5827_v51 = vpack.c.bf16 %v771_v30, %v770_v45  ;;  %v5829_v52 = vpack.c.bf16 %v669_v7, %v668_v5  ;;  %v1296_v25 = vld [vmem:[#allocation2 + $0x22] sm:$0xff]  ;;  %v1299_v45 = vld [vmem:[#allocation2 + $0x4a] sm:$0xff] }
 0x168   : > { %v627_v31 = vpop.f32.mrf.mxu0  ;;  %v769_v37 = vld [vmem:[#allocation2 + $0x110] sm:$0xff] }
 0x169   : > { %739 = vst [vmem:[#allocation2 + $0x141] sm:$0xff] %v667_v27  ;;  %v672_v38 = vmax.f32 %v636_v29, 0.0  ;;  %v628_v40 = vadd.f32 %v5743_v11, %v627_v31  ;;  %v5823_v43 = vpack.c.bf16 %v769_v37, %v768_v35  ;;  %v5825_v46 = vpack.c.bf16 %v667_v27, %v666_v19  ;;  %v1297_v27 = vld [vmem:[#allocation2 + $0x32] sm:$0xff]  ;;  %v1298_v29 = vld [vmem:[#allocation2 + $0x3a] sm:$0xff] }
 0x16a   : > { %v4550_v49 = vpop.f32.mrf.mxu0  ;;  %v1325_v19 = vpack.c.bf16 %v1294_v1, %v1293_v0  ;;  %v774_v21 = vld [vmem:[#allocation2 + $0x150] sm:$0xff]  ;;  %v5205_v0 = vld [vmem:[#allocation8 + $0x120] sm:$0xff]  }
 0x16b   : > { %744 = vst [vmem:[#allocation2 + $0x181] sm:$0xff] %v672_v38  ;;  %v670_v55 = vmax.f32 %v628_v40, 0.0  ;;  %v639_v58 = vadd.f32 %v4550_v49, %v5743_v11  ;;  %4636 = vmatmul.mubr.bf16.gmra.mxu0 %v5823_v43  ;;  %v5201_v40 = vld [vmem:[#allocation8 + $0x130] sm:$0xff]   ;;  %v1300_v49 = vld [vmem:[#allocation2 + $0x52] sm:$0xff]  ;;  %v1303_v1 = vld [vmem:[#allocation2 + $0x7a] sm:$0xff] }
 0x16c   : > { %4592 = vmatmul.mubr.bf16.gmra.mxu1 %v5825_v46  ;;  %v630_v59 = vpop.f32.mrf.mxu0  ;;  %4639 = vmatprep.mubr.bf16.mxu0 %v5827_v51  ;;  %v772_v16 = vld [vmem:[#allocation2 + $0x138] sm:$0xff] }
 0x16d   : > { %4595 = vmatprep.mubr.bf16.mxu1 %v5829_v52  ;;  %742 = vst [vmem:[#allocation2 + $0x169] sm:$0xff] %v670_v55  ;;  %v673_v60 = vmax.f32 %v639_v58, 0.0  ;;  %v631_v63 = vadd.f32 %v5743_v11, %v630_v59  ;;  %v1295_v11 = vld [vmem:[#allocation2 + $0x1a] sm:$0xff]  ;;  %v1301_v58 = vld [vmem:[#allocation2 + $0x62] sm:$0xff]  ;;  %v1302_v59 = vld [vmem:[#allocation2 + $0x6a] sm:$0xff] }
 0x16e   : > { %v775_v6 = vld [vmem:[#allocation2 + $0x158] sm:$0xff]  ;;  %v5850_v37 = vpack.c.bf16 %v1296_v25, %v1295_v11  ;;  %v1307_v11 = vld [vmem:[#allocation2 + $0xaa] sm:$0xff] }
 0x16f   : > { %745 = vst [vmem:[#allocation2 + $0x189] sm:$0xff] %v673_v60  ;;  %v671_v5 = vmax.f32 %v631_v63, 0.0  ;;  %v5837_v12 = vpack.c.bf16 %v673_v60, %v672_v38  ;;  %v5843_v23 = vpack.c.bf16 %v775_v6, %v774_v21  ;;  %v5852_v38 = vpack.c.bf16 %v1298_v29, %v1297_v27  ;;  %v5200_v60 = vld [vmem:[#allocation8 + $0x170] sm:$0xff]   ;;  %v1305_v6 = vld [vmem:[#allocation2 + $0x92] sm:$0xff] }
 0x170   : > { %v773_v18 = vld [vmem:[#allocation2 + $0x140] sm:$0xff]  ;;  %v5859_v63 = vpack.c.bf16 %v1300_v49, %v1299_v45  ;;  %v5206_v21 = vld [vmem:[#allocation8 + $0x158] sm:$0xff]  }
 0x171   : > { %743 = vst [vmem:[#allocation2 + $0x171] sm:$0xff] %v671_v5  ;;  %v5839_v20 = vpack.c.bf16 %v773_v18, %v772_v16  ;;  %v5841_v7 = vpack.c.bf16 %v671_v5, %v670_v55  ;;  %v5203_v55 = vld [vmem:[#allocation8 + $0x128] sm:$0xff]   ;;  %v5204_v18 = vld [vmem:[#allocation8 + $0x160] sm:$0xff]   ;;  %v1310_v29 = vld [vmem:[#allocation2 + $0xca] sm:$0xff] }
 0x172   : > { %v1304_v5 = vld [vmem:[#allocation2 + $0x82] sm:$0xff]  ;;  %v1308_v25 = vld [vmem:[#allocation2 + $0xb2] sm:$0xff]  ;;  %v1311_v45 = vld [vmem:[#allocation2 + $0xda] sm:$0xff] }
 0x173   : > { %4640 = vmatmul.mubr.bf16.gmra.mxu0 %v5839_v20  ;;  %v5868_v16 = vpack.c.bf16 %v1304_v5, %v1303_v1  ;;  %v1309_v27 = vld [vmem:[#allocation2 + $0xc2] sm:$0xff]  ;;  %v1316_v1 = vld [vmem:[#allocation2 + $0x112] sm:$0xff] }
 0x174   : > { %4596 = vmatmul.mubr.bf16.gmra.mxu1 %v5841_v7  ;;  %4643 = vmatprep.mubr.bf16.mxu0 %v5843_v23  ;;  %v776_v30 = vld [vmem:[#allocation2 + $0x168] sm:$0xff]  ;;  %v5214_v5 = vld [vmem:[#allocation8 + $0x1f8] sm:$0xff]  }
 0x175   : > { %4663 = vmatprep.mubr.bf16.mxu1 %v1325_v19  ;;  %v5207_v19 = vld [vmem:[#allocation8 + $0x118] sm:$0xff]   ;;  %v1312_v49 = vld [vmem:[#allocation2 + $0xe2] sm:$0xff] }
 0x178   : > { %v777_v31 = vld [vmem:[#allocation2 + $0x170] sm:$0xff] }
 0x179   : > { %v5848_v35 = vpack.c.bf16 %v777_v31, %v776_v30  ;;  %v5878_v30 = vpack.c.bf16 %v1310_v29, %v1309_v27  ;;  %v5211_v31 = vld [vmem:[#allocation8 + $0x108] sm:$0xff]   ;;  %v3156_v41 = vld [vmem:[#allocation2 + $0x16a] sm:$0xff] }
 0x17a   : > { %v1906_v27 = vld [vmem:[#allocation2 + $0x21] sm:$0xff] }
 0x17b   : > { %4644 = vmatmul.mubr.bf16.gmra.mxu0 %v5848_v35 }
 0x17c   : > { %4664 = vmatmul.mubr.bf16.vlgmr.msra.gmra.mxu1 %v5850_v37  ;;  %4711 = vmatprep.mubr.bf16.mxu0 %v5755_v61  ;;  %v5863_v61 = vpack.c.bf16 %v1302_v59, %v1301_v58  ;;  %v1313_v58 = vld [vmem:[#allocation2 + $0xf2] sm:$0xff]  ;;  %v1314_v59 = vld [vmem:[#allocation2 + $0xfa] sm:$0xff] }
 0x17d   : > { %4667 = vmatprep.mubr.bf16.mxu1 %v5852_v38  ;;  %4744 = vmatpush3.bf16.msra.mxu1 %v5798_v44  ;;  %v5202_v44 = vld [vmem:[#allocation8 + $0x168] sm:$0xff]  }
 0x17e   : > { %4745 = vmatprep.subr.bf16.mxu1 %v5201_v40 }
 0x181   : > { %4746 = vmatpush3.bf16.msra.mxu1 %v5201_v40  ;;  %v5210_v40 = vld [vmem:[#allocation8 + $0x148] sm:$0xff]  }
 0x182   : > { %4747 = vmatprep.subr.bf16.mxu1 %v5203_v55 }
 0x183   : > { %4712 = vmatmul.mubr.bf16.vlgmr.msra.gmra.mxu0 %v5757_v2  ;;  %v1306_v2 = vld [vmem:[#allocation2 + $0x9a] sm:$0xff] }
 0x184   : > { %4668 = vmatmul.mubr.bf16.gmra.mxu1 %v5859_v63  ;;  %4792 = vmatpush3.bf16.msra.mxu0 %v5804_v56  ;;  %v5209_v56 = vld [vmem:[#allocation8 + $0x110] sm:$0xff]  }
 0x185   : > { %4715 = vmatprep.mubr.bf16.mxu0 %v5766_v28  ;;  %4793 = vmatprep.subr.bf16.mxu0 %v5200_v60  ;;  %v5872_v28 = vpack.c.bf16 %v1306_v2, %v1305_v6  ;;  %v1317_v6 = vld [vmem:[#allocation2 + $0x122] sm:$0xff]  ;;  %v1318_v2 = vld [vmem:[#allocation2 + $0x12a] sm:$0xff] }
 0x186   : > { %4671 = vmatprep.mubr.bf16.mxu1 %v5863_v61  ;;  %4748 = vmatpush3.bf16.msra.mxu1 %v5203_v55  ;;  %v5213_v55 = vld [vmem:[#allocation8 + $0x100] sm:$0xff]  }
 0x187   : > { %4749 = vmatprep.subr.bf16.mxu1 %v5205_v0 }
 0x188   : > { %4794 = vmatpush3.bf16.msra.mxu0 %v5200_v60  ;;  %v5884_v60 = vpack.c.bf16 %v1312_v49, %v1311_v45  ;;  %v1910_v45 = vld [vmem:[#allocation2 + $0x51] sm:$0xff] }
 0x189   : > { %4795 = vmatprep.subr.bf16.mxu0 %v5202_v44  ;;  %v1907_v49 = vld [vmem:[#allocation2 + $0x31] sm:$0xff] }
 0x18a   : > { %4750 = vmatpush3.bf16.msra.mxu1 %v5205_v0  ;;  %v5215_v0 = vld [vmem:[#allocation8 + $0x1b8] sm:$0xff]  }
 0x18b   : > { %4716 = vmatmul.mubr.bf16.gmra.mxu0 %v5768_v33  ;;  %4751 = vmatprep.subr.bf16.mxu1 %v5207_v19  ;;  %v5876_v33 = vpack.c.bf16 %v1308_v25, %v1307_v11 }
 0x18c   : > { %4672 = vmatmul.mubr.bf16.gmra.mxu1 %v5868_v16  ;;  %4719 = vmatprep.mubr.bf16.mxu0 %v5779_v62  ;;  %v5208_v62 = vld [vmem:[#allocation8 + $0x150] sm:$0xff]  }
 0x18d   : > { %4796 = vmatpush3.bf16.msra.mxu0 %v5202_v44  ;;  %4675 = vmatprep.mubr.bf16.mxu1 %v5872_v28  ;;  %v1315_v44 = vld [vmem:[#allocation2 + $0x10a] sm:$0xff] }
 0x18e   : > { %4797 = vmatprep.subr.bf16.mxu0 %v5204_v18  ;;  %4752 = vmatpush3.bf16.msra.mxu1 %v5207_v19  ;;  %v5894_v19 = vpack.c.bf16 %v1318_v2, %v1317_v6  ;;  %v1914_v6 = vld [vmem:[#allocation2 + $0x81] sm:$0xff] }
 0x18f   : > { %4753 = vmatprep.subr.bf16.mxu1 %v5209_v56  ;;  %v5216_v2 = vld [vmem:[#allocation8 + $0x1f0] sm:$0xff]  }
 0x191   : > { %4798 = vmatpush3.bf16.msra.mxu0 %v5204_v18  ;;  %v5892_v18 = vpack.c.bf16 %v1316_v1, %v1315_v44  ;;  %v5217_v44 = vld [vmem:[#allocation8 + $0x1b0] sm:$0xff]  }
 0x192   : > { %4799 = vmatprep.subr.bf16.mxu0 %v5206_v21  ;;  %4754 = vmatpush3.bf16.msra.mxu1 %v5209_v56  ;;  %v1321_v56 = vld [vmem:[#allocation2 + $0x152] sm:$0xff]  ;;  %v1911_v1 = vld [vmem:[#allocation2 + $0x61] sm:$0xff] }
 0x193   : > { %4720 = vmatmul.mubr.bf16.gmra.mxu0 %v5782_v3  ;;  %4755 = vmatprep.subr.bf16.mxu1 %v5211_v31  ;;  %v5886_v3 = vpack.c.bf16 %v1314_v59, %v1313_v58  ;;  %v1909_v59 = vld [vmem:[#allocation2 + $0x49] sm:$0xff] }
 0x194   : > { %4676 = vmatmul.mubr.bf16.gmra.mxu1 %v5876_v33  ;;  %4723 = vmatprep.mubr.bf16.mxu0 %v5793_v32  ;;  %v5212_v32 = vld [vmem:[#allocation8 + $0x140] sm:$0xff]  }
 0x195   : > { %4679 = vmatprep.mubr.bf16.mxu1 %v5878_v30  ;;  %4800 = vmatpush3.bf16.msra.mxu0 %v5206_v21  ;;  %v1322_v21 = vld [vmem:[#allocation2 + $0x15a] sm:$0xff] }
 0x196   : > { %4801 = vmatprep.subr.bf16.mxu0 %v5208_v62  ;;  %4756 = vmatpush3.bf16.msra.mxu1 %v5211_v31  ;;  %v5902_v25 = vpack.c.bf16 %v1322_v21, %v1321_v56  ;;  %v1916_v21 = vld [vmem:[#allocation2 + $0x99] sm:$0xff] }
 0x197   : > { %4757 = vmatprep.subr.bf16.mxu1 %v5213_v55 }
 0x199   : > { %4802 = vmatpush3.bf16.msra.mxu0 %v5208_v62  ;;  %v1905_v62 = vld [vmem:[#allocation2 + $0x19] sm:$0xff] }
 0x19a   : > { %4803 = vmatprep.subr.bf16.mxu0 %v5210_v40  ;;  %4758 = vmatpush3.bf16.msra.mxu1 %v5213_v55  ;;  %v1937_v31 = vpack.c.bf16 %v1906_v27, %v1905_v62  ;;  %v5220_v27 = vld [vmem:[#allocation8 + $0x1e0] sm:$0xff]   ;;  %v5223_v62 = vld [vmem:[#allocation8 + $0x198] sm:$0xff]  }
 0x19b   : > { %4724 = vmatmul.mubr.bf16.gmra.mxu0 %v5796_v39  ;;  %4839 = vmatprep.subr.bf16.mxu1 %v5215_v0  ;;  %v1319_v39 = vld [vmem:[#allocation2 + $0x13a] sm:$0xff] }
 0x19c   : > { %4680 = vmatmul.mubr.bf16.gmra.mxu1 %v5884_v60  ;;  %4727 = vmatprep.mubr.bf16.mxu0 %v5809_v10  ;;  %v1320_v10 = vld [vmem:[#allocation2 + $0x142] sm:$0xff] }
 0x19d   : > { %4683 = vmatprep.mubr.bf16.mxu1 %v5886_v3  ;;  %4804 = vmatpush3.bf16.msra.mxu0 %v5210_v40  ;;  %v5900_v11 = vpack.c.bf16 %v1320_v10, %v1319_v39  ;;  %v1908_v40 = vld [vmem:[#allocation2 + $0x39] sm:$0xff] }
 0x19e   : > { %4805 = vmatprep.subr.bf16.mxu0 %v5212_v32  ;;  %v5915_v58 = vpack.c.bf16 %v1908_v40, %v1907_v49  ;;  %v1913_v10 = vld [vmem:[#allocation2 + $0x79] sm:$0xff] }
 0x19f   : > { %v5927_v56 = vpack.c.bf16 %v1914_v6, %v1913_v10  ;;  %v5940_v40 = vld [vmem:[#allocation2 + $0xd9] sm:$0xff] }
 0x1a0   : > { %v1924_v49 = vld [vmem:[#allocation2 + $0xf9] sm:$0xff] }
 0x1a1   : > { %4806 = vmatpush3.bf16.msra.mxu0 %v5212_v32  ;;  %v5917_v32 = vpack.c.bf16 %v1910_v45, %v1909_v59  ;;  %v1919_v45 = vld [vmem:[#allocation2 + $0xc1] sm:$0xff] }
 0x1a2   : > { %4887 = vmatprep.subr.bf16.mxu0 %v5214_v5  ;;  %v5226_v59 = vld [vmem:[#allocation8 + $0x1c8] sm:$0xff]  }
 0x1a3   : > { %4728 = vmatmul.mubr.bf16.gmra.mxu0 %v5813_v17  ;;  %v1323_v17 = vld [vmem:[#allocation2 + $0x16a] sm:$0xff]  ;;  %v2522_v10 = vld [vmem:[#allocation2 + $0x60] sm:$0xff] }
 0x1a4   : > { %4684 = vmatmul.mubr.bf16.gmra.mxu1 %v5892_v18  ;;  %4731 = vmatprep.mubr.bf16.mxu0 %v5823_v43  ;;  %v1324_v43 = vld [vmem:[#allocation2 + $0x172] sm:$0xff] }
 0x1a5   : > { %4687 = vmatprep.mubr.bf16.mxu1 %v5894_v19  ;;  %v5908_v29 = vpack.c.bf16 %v1324_v43, %v1323_v17  ;;  %v1915_v17 = vld [vmem:[#allocation2 + $0x91] sm:$0xff]  ;;  %v5931_v43 = vld [vmem:[#allocation2 + $0xa9] sm:$0xff] }
 0x1ab   : > { %4732 = vmatmul.mubr.bf16.gmra.mxu0 %v5827_v51  ;;  %v1630_v51 = vld [vmem:[#allocation2 + $0x188] sm:$0xff] }
 0x1ac   : > { %4688 = vmatmul.mubr.bf16.gmra.mxu1 %v5900_v11  ;;  %4735 = vmatprep.mubr.bf16.mxu0 %v5839_v20  ;;  %v1629_v20 = vld [vmem:[#allocation2 + $0x180] sm:$0xff] }
 0x1ad   : > { %4691 = vmatprep.mubr.bf16.mxu1 %v5902_v25  ;;  %v5913_v55 = vpack.c.bf16 %v1630_v51, %v1629_v20  ;;  %v1920_v51 = vld [vmem:[#allocation2 + $0xc9] sm:$0xff]  ;;  %v5227_v20 = vld [vmem:[#allocation8 + $0x188] sm:$0xff]  }
 0x1b3   : > { %4736 = vmatmul.mubr.bf16.gmra.mxu0 %v5843_v23  ;;  %v1912_v23 = vld [vmem:[#allocation2 + $0x69] sm:$0xff] }
 0x1b4   : > { %4692 = vmatmul.mubr.bf16.gmra.mxu1 %v5908_v29  ;;  %4739 = vmatprep.mubr.bf16.mxu0 %v5848_v35  ;;  %v5219_v35 = vld [vmem:[#allocation8 + $0x1a8] sm:$0xff]   ;;  %v5923_v39 = vpack.c.bf16 %v1912_v23, %v1911_v1  ;;  %v1923_v23 = vld [vmem:[#allocation2 + $0xf1] sm:$0xff] }
 0x1b5   : > { %4759 = vmatprep.mubr.bf16.mxu1 %v1937_v31  ;;  %v5222_v31 = vld [vmem:[#allocation8 + $0x1d8] sm:$0xff]   ;;  %v1927_v1 = vld [vmem:[#allocation2 + $0x121] sm:$0xff] }
 0x1bb   : > { %4740 = vmatmul.mubr.bf16.gmra.mxu0 %v5913_v55 }
 0x1bc   : > { %4760 = vmatmul.mubr.bf16.vlgmr.msra.gmra.mxu1 %v5915_v58  ;;  %4807 = vmatprep.mubr.bf16.mxu0 %v5850_v37  ;;  %v5221_v37 = vld [vmem:[#allocation8 + $0x1a0] sm:$0xff]  }
 0x1bd   : > { %4763 = vmatprep.mubr.bf16.mxu1 %v5917_v32  ;;  %4840 = vmatpush3.bf16.msra.mxu1 %v5215_v0  ;;  %v5218_v0 = vld [vmem:[#allocation8 + $0x1e8] sm:$0xff]  }
 0x1be   : > { %4841 = vmatprep.subr.bf16.mxu1 %v5217_v44 }
 0x1c1   : > { %4842 = vmatpush3.bf16.msra.mxu1 %v5217_v44  ;;  %v5229_v44 = vld [vmem:[#allocation8 + $0x180] sm:$0xff]  }
 0x1c2   : > { %4843 = vmatprep.subr.bf16.mxu1 %v5219_v35 }
 0x1c3   : > { %4808 = vmatmul.mubr.bf16.vlgmr.msra.gmra.mxu0 %v5852_v38  ;;  %v5933_v38 = vpack.c.bf16 %v1916_v21, %v1915_v17  ;;  %v2524_v17 = vld [vmem:[#allocation2 + $0x78] sm:$0xff] }
 0x1c4   : > { %4764 = vmatmul.mubr.bf16.gmra.mxu1 %v5923_v39  ;;  %4888 = vmatpush3.bf16.msra.mxu0 %v5214_v5  ;;  %v5225_v5 = vld [vmem:[#allocation8 + $0x190] sm:$0xff]  }
 0x1c5   : > { %4811 = vmatprep.mubr.bf16.mxu0 %v5859_v63  ;;  %4889 = vmatprep.subr.bf16.mxu0 %v5216_v2  ;;  %v1943_v63 = vpack.c.bf16 %v5774_v50, %v5931_v43  ;;  %v1945_v50 = vpack.c.bf16 %v5788_v22, %v5940_v40  ;;  %v5228_v22 = vld [vmem:[#allocation8 + $0x1c0] sm:$0xff]  }
 0x1c6   : > { %4767 = vmatprep.mubr.bf16.mxu1 %v5927_v56  ;;  %4844 = vmatpush3.bf16.msra.mxu1 %v5219_v35  ;;  %v5949_v35 = vpack.c.bf16 %v1924_v49, %v1923_v23 }
 0x1c7   : > { %4845 = vmatprep.subr.bf16.mxu1 %v5221_v37 }
 0x1c8   : > { %4890 = vmatpush3.bf16.msra.mxu0 %v5216_v2  ;;  %v2520_v2 = vld [vmem:[#allocation2 + $0x48] sm:$0xff] }
 0x1c9   : > { %4891 = vmatprep.subr.bf16.mxu0 %v5218_v0 }
 0x1ca   : > { %4846 = vmatpush3.bf16.msra.mxu1 %v5221_v37  ;;  %v5231_v37 = vld [vmem:[#allocation8 + $0x230] sm:$0xff]  }
 0x1cb   : > { %4812 = vmatmul.mubr.bf16.gmra.mxu0 %v5863_v61  ;;  %4847 = vmatprep.subr.bf16.mxu1 %v5223_v62  ;;  %v5942_v61 = vpack.c.bf16 %v1920_v51, %v1919_v45  ;;  %v5233_v45 = vld [vmem:[#allocation8 + $0x220] sm:$0xff]  }
 0x1cc   : > { %4768 = vmatmul.mubr.bf16.gmra.mxu1 %v5933_v38  ;;  %4815 = vmatprep.mubr.bf16.mxu0 %v5868_v16  ;;  %v5224_v16 = vld [vmem:[#allocation8 + $0x1d0] sm:$0xff]  }
 0x1cd   : > { %4892 = vmatpush3.bf16.msra.mxu0 %v5218_v0  ;;  %4771 = vmatprep.mubr.bf16.mxu1 %v1943_v63 }
 0x1ce   : > { %4893 = vmatprep.subr.bf16.mxu0 %v5220_v27  ;;  %4848 = vmatpush3.bf16.msra.mxu1 %v5223_v62 }
 0x1cf   : > { %4849 = vmatprep.subr.bf16.mxu1 %v5225_v5 }
 0x1d1   : > { %4894 = vmatpush3.bf16.msra.mxu0 %v5220_v27  ;;  %v2527_v27 = vld [vmem:[#allocation2 + $0x98] sm:$0xff] }
 0x1d2   : > { %4895 = vmatprep.subr.bf16.mxu0 %v5222_v31  ;;  %4850 = vmatpush3.bf16.msra.mxu1 %v5225_v5  ;;  %v2526_v5 = vld [vmem:[#allocation2 + $0x90] sm:$0xff] }
 0x1d3   : > { %4816 = vmatmul.mubr.bf16.gmra.mxu0 %v5872_v28  ;;  %4851 = vmatprep.subr.bf16.mxu1 %v5227_v20  ;;  %v5951_v28 = vld [vmem:[#allocation8 + $0x238] sm:$0xff]  }
 0x1d4   : > { %4772 = vmatmul.mubr.bf16.gmra.mxu1 %v5942_v61  ;;  %4819 = vmatprep.mubr.bf16.mxu0 %v5876_v33  ;;  %v1928_v33 = vld [vmem:[#allocation2 + $0x129] sm:$0xff] }
 0x1d5   : > { %4775 = vmatprep.mubr.bf16.mxu1 %v1945_v50  ;;  %4896 = vmatpush3.bf16.msra.mxu0 %v5222_v31  ;;  %v5958_v6 = vpack.c.bf16 %v1928_v33, %v1927_v1  ;;  %v2531_v33 = vld [vmem:[#allocation2 + $0xc8] sm:$0xff] }
 0x1d6   : > { %4897 = vmatprep.subr.bf16.mxu0 %v5224_v16  ;;  %4852 = vmatpush3.bf16.msra.mxu1 %v5227_v20 }
 0x1d7   : > { %4853 = vmatprep.subr.bf16.mxu1 %v5229_v44 }
 0x1d9   : > { %4898 = vmatpush3.bf16.msra.mxu0 %v5224_v16 }
 0x1da   : > { %4899 = vmatprep.subr.bf16.mxu0 %v5226_v59  ;;  %4854 = vmatpush3.bf16.msra.mxu1 %v5229_v44 }
 0x1db   : > { %4820 = vmatmul.mubr.bf16.gmra.mxu0 %v5878_v30  ;;  %5065 = vmatprep.subr.bf16.mxu1 %v5951_v28  ;;  %v2518_v30 = vld [vmem:[#allocation2 + $0x30] sm:$0xff] }
 0x1dc   : > { %4776 = vmatmul.mubr.bf16.gmra.mxu1 %v5949_v35  ;;  %4823 = vmatprep.mubr.bf16.mxu0 %v5884_v60 }
 0x1dd   : > { %4779 = vmatprep.mubr.bf16.mxu1 %v5811_v13  ;;  %4900 = vmatpush3.bf16.msra.mxu0 %v5226_v59  ;;  %v2519_v13 = vld [vmem:[#allocation2 + $0x38] sm:$0xff]  ;;  %v2529_v59 = vld [vmem:[#allocation2 + $0xb0] sm:$0xff] }
 0x1de   : > { %4901 = vmatprep.subr.bf16.mxu0 %v5228_v22  ;;  %v2550_v60 = vpack.c.bf16 %v2519_v13, %v2518_v30  ;;  %v2530_v30 = vld [vmem:[#allocation2 + $0xc0] sm:$0xff] }
 0x1e1   : > { %4902 = vmatpush3.bf16.msra.mxu0 %v5228_v22  ;;  %v2528_v22 = vld [vmem:[#allocation2 + $0xa8] sm:$0xff] }
 0x1e2   : > { %4935 = vmatprep.subr.bf16.mxu0 %v5951_v28 }
 0x1e3   : > { %4824 = vmatmul.mubr.bf16.gmra.mxu0 %v5886_v3  ;;  %v2241_v3 = vld [vmem:[#allocation2 + $0x182] sm:$0xff] }
 0x1e4   : > { %4780 = vmatmul.mubr.bf16.gmra.mxu1 %v5958_v6  ;;  %4827 = vmatprep.mubr.bf16.mxu0 %v5892_v18  ;;  %v2521_v18 = vld [vmem:[#allocation2 + $0x50] sm:$0xff] }
 0x1e5   : > { %4783 = vmatprep.mubr.bf16.mxu1 %v5825_v46  ;;  %v2242_v46 = vld [vmem:[#allocation2 + $0x18a] sm:$0xff] }
 0x1eb   : > { %4828 = vmatmul.mubr.bf16.gmra.mxu0 %v5894_v19  ;;  %v2523_v19 = vld [vmem:[#allocation2 + $0x68] sm:$0xff] }
 0x1ec   : > { %4784 = vmatmul.mubr.bf16.gmra.mxu1 %v5829_v52  ;;  %4831 = vmatprep.mubr.bf16.mxu0 %v5900_v11  ;;  %v5972_v52 = vpack.c.bf16 %v2242_v46, %v2241_v3  ;;  %v2551_v11 = vpack.c.bf16 %v2521_v18, %v2520_v2  ;;  %v2556_v18 = vpack.c.bf16 %v2531_v33, %v2530_v30  ;;  %v5235_v2 = vld [vmem:[#allocation8 + $0x210] sm:$0xff]  }
 0x1ed   : > { %4787 = vmatprep.mubr.bf16.mxu1 %v5841_v7  ;;  %v2552_v7 = vpack.c.bf16 %v2523_v19, %v2522_v10  ;;  %v2536_v30 = vld [vmem:[#allocation2 + $0x108] sm:$0xff] }
 0x1f3   : > { %4832 = vmatmul.mubr.bf16.gmra.mxu0 %v5902_v25  ;;  %v2525_v25 = vld [vmem:[#allocation2 + $0x80] sm:$0xff] }
 0x1f4   : > { %4788 = vmatmul.mubr.bf16.gmra.mxu1 %v5837_v12  ;;  %4835 = vmatprep.mubr.bf16.mxu0 %v5908_v29  ;;  %v5232_v29 = vld [vmem:[#allocation8 + $0x228] sm:$0xff]   ;;  %v2553_v63 = vpack.c.bf16 %v2525_v25, %v2524_v17  ;;  %v2535_v25 = vld [vmem:[#allocation2 + $0xf8] sm:$0xff] }
 0x1f5   : > { %4855 = vmatprep.mubr.bf16.mxu1 %v2550_v60  ;;  %v5234_v60 = vld [vmem:[#allocation8 + $0x218] sm:$0xff]   ;;  %v2532_v17 = vld [vmem:[#allocation2 + $0xd8] sm:$0xff] }
 0x1fb   : > { %4836 = vmatmul.mubr.bf16.gmra.mxu0 %v5972_v52  ;;  %v4569_v0 = vpop.f32.mrf.mxu1 }
 0x1fc   : > { %4856 = vmatmul.mubr.bf16.vlgmr.msra.gmra.mxu1 %v2551_v11  ;;  %4903 = vmatprep.mubr.bf16.mxu0 %v5915_v58  ;;  %v2554_v58 = vpack.c.bf16 %v2527_v27, %v2526_v5 }
 0x1fd   : > { %4859 = vmatprep.mubr.bf16.mxu1 %v2552_v7  ;;  %v957_v12 = vpop.f32.mrf.mxu1  ;;  %5073 = vmatpush3.bf16.msra.mxu1 %v5951_v28 }
 0x1fe   : > { %5066 = vmatprep.subr.bf16.mxu1 %v5231_v37 }
 0x1ff   : > { %v4570_v21 = vpop.f32.mrf.mxu1 }
 0x201   : > { %v960_v62 = vpop.f32.mrf.mxu1  ;;  %5074 = vmatpush3.bf16.msra.mxu1 %v5231_v37 }
 0x202   : > { %5067 = vmatprep.subr.bf16.mxu1 %v5232_v29 }
 0x203   : > { %v4617_v31 = vpop.f32.mrf.mxu0  ;;  %4904 = vmatmul.mubr.bf16.vlgmr.msra.gmra.mxu0 %v5917_v32  ;;  %v4573_v51 = vpop.f32.mrf.mxu1 }
 0x204   : > { %4860 = vmatmul.mubr.bf16.gmra.mxu1 %v2553_v63  ;;  %v5978_v50 = vadd.f32 %v4617_v31, %v4569_v0  ;;  %4936 = vmatpush3.bf16.msra.mxu0 %v5951_v28  ;;  %v2533_v0 = vld [vmem:[#allocation2 + $0xe0] sm:$0xff]  ;;  %v2534_v63 = vld [vmem:[#allocation2 + $0xf0] sm:$0xff] }
 0x205   : > { %4907 = vmatprep.mubr.bf16.mxu0 %v5923_v39  ;;  %v1166_v16 = vpop.f32.mrf.mxu0  ;;  %4937 = vmatprep.subr.bf16.mxu0 %v5231_v37  ;;  %v973_v20 = vpop.f32.mrf.mxu1  ;;  %v2555_v39 = vpack.c.bf16 %v2529_v59, %v2528_v22  ;;  %v2558_v31 = vpack.c.bf16 %v2535_v25, %v2534_v63  ;;  %v5237_v22 = vld [vmem:[#allocation8 + $0x200] sm:$0xff]   ;;  %v2842_v63 = vld [vmem:[#allocation2 + $0x109] sm:$0xff] }
 0x206   : > { %4863 = vmatprep.mubr.bf16.mxu1 %v2554_v58  ;;  %v5982_v49 = vadd.f32 %v1166_v16, %v957_v12  ;;  %5075 = vmatpush3.bf16.msra.mxu1 %v5232_v29  ;;  %v2843_v25 = vld [vmem:[#allocation2 + $0x111] sm:$0xff] }
 0x207   : > { %v4618_v44 = vpop.f32.mrf.mxu0  ;;  %v4574_v32 = vpop.f32.mrf.mxu1  ;;  %5068 = vmatprep.subr.bf16.mxu1 %v5233_v45 }
 0x208   : > { %v5984_v23 = vadd.f32 %v4618_v44, %v4570_v21  ;;  %4938 = vmatpush3.bf16.msra.mxu0 %v5231_v37  ;;  %v2835_v37 = vld [vmem:[#allocation2 + $0xb1] sm:$0xff]  ;;  %v2839_v44 = vld [vmem:[#allocation2 + $0xe1] sm:$0xff] }
 0x209   : > { %v1169_v1 = vpop.f32.mrf.mxu0  ;;  %v976_v28 = vpop.f32.mrf.mxu1  ;;  %4939 = vmatprep.subr.bf16.mxu0 %v5232_v29 }
 0x20a   : > { %v5986_v13 = vadd.f32 %v1169_v1, %v960_v62  ;;  %5076 = vmatpush3.bf16.msra.mxu1 %v5233_v45  ;;  %v2557_v62 = vpack.c.bf16 %v2533_v0, %v2532_v17  ;;  %v2541_v17 = vld [vmem:[#allocation2 + $0x140] sm:$0xff] }
 0x20b   : > { %v4621_v3 = vpop.f32.mrf.mxu0  ;;  %4908 = vmatmul.mubr.bf16.gmra.mxu0 %v5927_v56  ;;  %v4577_v46 = vpop.f32.mrf.mxu1  ;;  %5069 = vmatprep.subr.bf16.mxu1 %v5234_v60 }
 0x20c   : > { %4864 = vmatmul.mubr.bf16.gmra.mxu1 %v2555_v39  ;;  %v5989_v19 = vadd.f32 %v4621_v3, %v4573_v51  ;;  %4911 = vmatprep.mubr.bf16.mxu0 %v5933_v38  ;;  %v5236_v51 = vld [vmem:[#allocation8 + $0x208] sm:$0xff]  }
 0x20d   : > { %4940 = vmatpush3.bf16.msra.mxu0 %v5232_v29  ;;  %v1182_v11 = vpop.f32.mrf.mxu0  ;;  %4867 = vmatprep.mubr.bf16.mxu1 %v2556_v18  ;;  %v989_v10 = vpop.f32.mrf.mxu1  ;;  %v2861_v29 = vpack.c.bf16 %v2835_v37, %v5931_v43 }
 0x20e   : > { %4941 = vmatprep.subr.bf16.mxu0 %v5233_v45  ;;  %v5992_v7 = vadd.f32 %v1182_v11, %v973_v20  ;;  %5077 = vmatpush3.bf16.msra.mxu1 %v5234_v60 }
 0x20f   : > { %v4622_v12 = vpop.f32.mrf.mxu0  ;;  %v4578_v56 = vpop.f32.mrf.mxu1  ;;  %5070 = vmatprep.subr.bf16.mxu1 %v5235_v2 }
 0x210   : > { %v5994_v21 = vadd.f32 %v4622_v12, %v4574_v32  ;;  %v2537_v32 = vld [vmem:[#allocation2 + $0x110] sm:$0xff] }
 0x211   : > { %4942 = vmatpush3.bf16.msra.mxu0 %v5233_v45  ;;  %v1185_v38 = vpop.f32.mrf.mxu0  ;;  %v992_v27 = vpop.f32.mrf.mxu1  ;;  %v2559_v18 = vpack.c.bf16 %v2537_v32, %v2536_v30 }
 0x212   : > { %4943 = vmatprep.subr.bf16.mxu0 %v5234_v60  ;;  %v5997_v5 = vadd.f32 %v1185_v38, %v976_v28  ;;  %5078 = vmatpush3.bf16.msra.mxu1 %v5235_v2  ;;  %v2539_v28 = vld [vmem:[#allocation2 + $0x128] sm:$0xff] }
 0x213   : > { %v4625_v58 = vpop.f32.mrf.mxu0  ;;  %4912 = vmatmul.mubr.bf16.gmra.mxu0 %v2861_v29  ;;  %v4581_v16 = vpop.f32.mrf.mxu1  ;;  %5071 = vmatprep.subr.bf16.mxu1 %v5236_v51 }
 0x214   : > { %4868 = vmatmul.mubr.bf16.gmra.mxu1 %v2557_v62  ;;  %v5999_v20 = vadd.f32 %v4625_v58, %v4577_v46  ;;  %4915 = vmatprep.mubr.bf16.mxu0 %v5942_v61  ;;  %v2863_v61 = vpack.c.bf16 %v2839_v44, %v5940_v40  ;;  %v2542_v44 = vld [vmem:[#allocation2 + $0x150] sm:$0xff] }
 0x215   : > { %4871 = vmatprep.mubr.bf16.mxu1 %v2558_v31  ;;  %v1198_v45 = vpop.f32.mrf.mxu0  ;;  %v1005_v59 = vpop.f32.mrf.mxu1  ;;  %4944 = vmatpush3.bf16.msra.mxu0 %v5234_v60  ;;  %v2538_v60 = vld [vmem:[#allocation2 + $0x120] sm:$0xff]  ;;  %v2540_v31 = vld [vmem:[#allocation2 + $0x138] sm:$0xff] }
 0x216   : > { %v6002_v43 = vadd.f32 %v1198_v45, %v989_v10  ;;  %4945 = vmatprep.subr.bf16.mxu0 %v5235_v2  ;;  %5079 = vmatpush3.bf16.msra.mxu1 %v5236_v51  ;;  %v2560_v10 = vpack.c.bf16 %v2539_v28, %v2538_v60  ;;  %v2561_v45 = vpack.c.bf16 %v2541_v17, %v2540_v31 }
 0x217   : > { %v4626_v33 = vpop.f32.mrf.mxu0  ;;  %v4582_v1 = vpop.f32.mrf.mxu1  ;;  %5072 = vmatprep.subr.bf16.mxu1 %v5237_v22 }
 0x218   : > { %v6004_v39 = vadd.f32 %v4626_v33, %v4578_v56 }
 0x219   : > { %v1201_v3 = vpop.f32.mrf.mxu0  ;;  %v1008_v46 = vpop.f32.mrf.mxu1  ;;  %4946 = vmatpush3.bf16.msra.mxu0 %v5235_v2 }
 0x21a   : > { %v6007_v11 = vadd.f32 %v1201_v3, %v992_v27  ;;  %4947 = vmatprep.subr.bf16.mxu0 %v5236_v51  ;;  %5080 = vmatpush3.bf16.msra.mxu1 %v5237_v22  ;;  %v2543_v27 = vld [vmem:[#allocation2 + $0x158] sm:$0xff] }
 0x21b   : > { %v4629_v37 = vpop.f32.mrf.mxu0  ;;  %4916 = vmatmul.mubr.bf16.gmra.mxu0 %v2863_v61  ;;  %v2847_v61 = vld [vmem:[#allocation2 + $0x141] sm:$0xff] }
 0x21c   : > { %v4585_v0 = vpop.f32.mrf.mxu1  ;;  %4872 = vmatmul.mubr.bf16.gmra.mxu1 %v2559_v18  ;;  %v6009_v12 = vadd.f32 %v4629_v37, %v4581_v16  ;;  %4919 = vmatprep.mubr.bf16.mxu0 %v5949_v35  ;;  %v2865_v16 = vpack.c.bf16 %v2843_v25, %v2842_v63  ;;  %v2545_v18 = vld [vmem:[#allocation2 + $0x170] sm:$0xff]  ;;  %v2846_v37 = vld [vmem:[#allocation2 + $0x139] sm:$0xff] }
 0x21d   : > { %4875 = vmatprep.mubr.bf16.mxu1 %v2560_v10  ;;  %v1214_v40 = vpop.f32.mrf.mxu0  ;;  %4948 = vmatpush3.bf16.msra.mxu0 %v5236_v51  ;;  %v2867_v17 = vpack.c.bf16 %v2847_v61, %v2846_v37  ;;  %v2850_v37 = vld [vmem:[#allocation2 + $0x169] sm:$0xff] }
 0x21e   : > { %v1021_v56 = vpop.f32.mrf.mxu1  ;;  %v6012_v2 = vadd.f32 %v1214_v40, %v1005_v59  ;;  %4949 = vmatprep.subr.bf16.mxu0 %v5237_v22  ;;  %v2562_v59 = vpack.c.bf16 %v2543_v27, %v2542_v44  ;;  %v2544_v40 = vld [vmem:[#allocation2 + $0x168] sm:$0xff]  ;;  %v2851_v44 = vld [vmem:[#allocation2 + $0x171] sm:$0xff] }
 0x21f   : > { %v4630_v38 = vpop.f32.mrf.mxu0 }
 0x220   : > { %v4586_v29 = vpop.f32.mrf.mxu1  ;;  %v6014_v62 = vadd.f32 %v4630_v38, %v4582_v1 }
 0x221   : > { %v1217_v58 = vpop.f32.mrf.mxu0  ;;  %4950 = vmatpush3.bf16.msra.mxu0 %v5237_v22  ;;  %v2849_v22 = vld [vmem:[#allocation2 + $0x159] sm:$0xff] }
 0x222   : > { %v1024_v35 = vpop.f32.mrf.mxu1  ;;  %v6016_v51 = vadd.f32 %v1217_v58, %v1008_v46 }
 0x223   : > { %v4633_v32 = vpop.f32.mrf.mxu0  ;;  %4920 = vmatmul.mubr.bf16.gmra.mxu0 %v2865_v16 }
 0x224   : > { %v4589_v33 = vpop.f32.mrf.mxu1  ;;  %4876 = vmatmul.mubr.bf16.gmra.mxu1 %v2561_v45  ;;  %v6018_v28 = vadd.f32 %v4633_v32, %v4585_v0  ;;  %4923 = vmatprep.mubr.bf16.mxu0 %v5958_v6  ;;  %v2848_v0 = vld [vmem:[#allocation2 + $0x151] sm:$0xff]  ;;  %v2563_v6 = vpack.c.bf16 %v2545_v18, %v2544_v40  ;;  %v2853_v32 = vld [vmem:[#allocation2 + $0x189] sm:$0xff]  ;;  %v2869_v40 = vpack.c.bf16 %v2851_v44, %v2850_v37  ;;  %v3136_v37 = vld [vmem:[#allocation2 + $0x7a] sm:$0xff] }
 0x225   : > { %4879 = vmatprep.mubr.bf16.mxu1 %v2562_v59  ;;  %v1230_v1 = vpop.f32.mrf.mxu0  ;;  %v2868_v63 = vpack.c.bf16 %v2849_v22, %v2848_v0  ;;  %v3134_v18 = vld [vmem:[#allocation2 + $0x62] sm:$0xff]  ;;  %v3130_v44 = vld [vmem:[#allocation2 + $0x32] sm:$0xff] }
 0x226   : > { %v1037_v30 = vpop.f32.mrf.mxu1  ;;  %v6021_v3 = vadd.f32 %v1230_v1, %v1021_v56 }
 0x227   : > { %v4634_v60 = vpop.f32.mrf.mxu0 }
 0x228   : > { %v4590_v46 = vpop.f32.mrf.mxu1  ;;  %v6023_v10 = vadd.f32 %v4634_v60, %v4586_v29  ;;  %v3135_v60 = vld [vmem:[#allocation2 + $0x6a] sm:$0xff] }
 0x229   : > { %v1233_v25 = vpop.f32.mrf.mxu0 }
 0x22a   : > { %v6025_v38 = vpop.f32.mrf.mxu1  ;;  %v6027_v27 = vadd.f32 %v1233_v25, %v1024_v35  ;;  %v5247_v35 = vld [vmem:[#allocation2] sm:$0xff] }
 0x22b   : > { %v4637_v56 = vpop.f32.mrf.mxu0  ;;  %4924 = vmatmul.mubr.bf16.gmra.mxu0 %v2867_v17  ;;  %v2565_v61 = vpack.c.bf16 %v5247_v35, %v5247_v35  ;;  %v2852_v25 = vld [vmem:[#allocation2 + $0x181] sm:$0xff] }
 0x22c   : > { %v4593_v31 = vpop.f32.mrf.mxu1  ;;  %4880 = vmatmul.mubr.bf16.gmra.mxu1 %v2563_v6  ;;  %v6029_v58 = vadd.f32 %v4637_v56, %v4589_v33  ;;  %4927 = vmatprep.mubr.bf16.mxu0 %v2868_v63  ;;  %v2870_v17 = vpack.c.bf16 %v2853_v32, %v2852_v25  ;;  %v2854_v56 = vld [vmem:[#allocation2 + $0x199] sm:$0xff] }
 0x22d   : > { %4883 = vmatprep.mubr.bf16.mxu1 %v5913_v55  ;;  %v1246_v29 = vpop.f32.mrf.mxu0  ;;  %v3139_v25 = vld [vmem:[#allocation2 + $0x9a] sm:$0xff] }
 0x22e   : > { %v1053_v16 = vpop.f32.mrf.mxu1  ;;  %v6032_v45 = vadd.f32 %v1246_v29, %v1037_v30  ;;  %v3164_v30 = vpack.c.bf16 %v3135_v60, %v3134_v18  ;;  %v2855_v29 = vld [vmem:[#allocation2 + $0x1a1] sm:$0xff] }
 0x22f   : > { %v4638_v59 = vpop.f32.mrf.mxu0  ;;  %v2871_v32 = vpack.c.bf16 %v2855_v29, %v2854_v56  ;;  %v3131_v18 = vld [vmem:[#allocation2 + $0x3a] sm:$0xff] }
 0x230   : > { %v4594_v1 = vpop.f32.mrf.mxu1  ;;  %v6034_v22 = vadd.f32 %v4638_v59, %v4590_v46 }
 0x231   : > { %v6036_v33 = vpop.f32.mrf.mxu0 }
 0x232   : > { %v6038_v55 = vpop.f32.mrf.mxu1 }
 0x233   : > { %v4641_v0 = vpop.f32.mrf.mxu0  ;;  %4928 = vmatmul.mubr.bf16.gmra.mxu0 %v2869_v40  ;;  %v3138_v40 = vld [vmem:[#allocation2 + $0x92] sm:$0xff] }
 0x234   : > { %v4597_v6 = vpop.f32.mrf.mxu1  ;;  %4884 = vmatmul.mubr.bf16.gmra.mxu1 %v2565_v61  ;;  %v6040_v63 = vadd.f32 %v4641_v0, %v4593_v31  ;;  %4931 = vmatprep.mubr.bf16.mxu0 %v2870_v17  ;;  %v3162_v0 = vpack.c.bf16 %v3131_v18, %v3130_v44  ;;  %v3166_v53 = vpack.c.bf16 %v3139_v25, %v3138_v40  ;;  %v3140_v44 = vld [vmem:[#allocation2 + $0xaa] sm:$0xff]  ;;  %v3142_v40 = vld [vmem:[#allocation2 + $0xc2] sm:$0xff] }
 0x235   : > { %4955 = vmatprep.mubr.bf16.mxu1 %v3164_v30  ;;  %v1262_v46 = vpop.f32.mrf.mxu0  ;;  %v3165_v30 = vpack.c.bf16 %v3137_v57, %v3136_v37  ;;  %v3141_v37 = vld [vmem:[#allocation2 + $0xb2] sm:$0xff]  ;;  %v3143_v25 = vld [vmem:[#allocation2 + $0xca] sm:$0xff] }
 0x236   : > { %v1069_v59 = vpop.f32.mrf.mxu1  ;;  %v6042_v35 = vadd.f32 %v1262_v46, %v1053_v16 }
 0x237   : > { %v4642_v54 = vpop.f32.mrf.mxu0 }
 0x238   : > { %v4598_v60 = vpop.f32.mrf.mxu1  ;;  %v6044_v61 = vadd.f32 %v4642_v54, %v4594_v1  ;;  %v3132_v54 = vld [vmem:[#allocation2 + $0x4a] sm:$0xff] }
 0x239   : > { %v6046_v31 = vpop.f32.mrf.mxu0 }
 0x23a   : > { %v6048_v17 = vpop.f32.mrf.mxu1 }
 0x23b   : > { %v4645_v16 = vpop.f32.mrf.mxu0  ;;  %4932 = vmatmul.mubr.bf16.gmra.mxu0 %v2871_v32 }
 0x23c   : > { %v4665_v46 = vpop.f32.mrf.mxu1  ;;  %4956 = vmatmul.mubr.bf16.vlgmr.msra.gmra.mxu1 %v3165_v30  ;;  %v6050_v48 = vadd.f32 %v4645_v16, %v4597_v6  ;;  %4951 = vmatprep.mubr.bf16.mxu0 %v3162_v0  ;;  %v3167_v16 = vpack.c.bf16 %v3141_v37, %v3140_v44  ;;  %v3144_v44 = vld [vmem:[#allocation2 + $0xda] sm:$0xff]  ;;  %v3145_v37 = vld [vmem:[#allocation2 + $0xe2] sm:$0xff] }
 0x23d   : > { %v1569_v56 = vadd.f32 %v4665_v46, %v5978_v50  ;;  %4959 = vmatprep.mubr.bf16.mxu1 %v3166_v53  ;;  %v1278_v29 = vpop.f32.mrf.mxu0  ;;  %v3163_v53 = vpack.c.bf16 %v3133_v42, %v3132_v54  ;;  %v3168_v46 = vpack.c.bf16 %v3143_v25, %v3142_v40  ;;  %v3146_v40 = vld [vmem:[#allocation2 + $0xf2] sm:$0xff]  ;;  %v3147_v25 = vld [vmem:[#allocation2 + $0xfa] sm:$0xff] }
 0x23e   : > { %v1440_v1 = vpop.f32.mrf.mxu1  ;;  %v6053_v47 = vadd.f32 %v1278_v29, %v1069_v59 }
 0x23f   : > { %v1567_v57 = vadd.f32 %v1440_v1, %v5982_v49  ;;  %v4646_v18 = vpop.f32.mrf.mxu0 }
 0x240   : > { %v4666_v32 = vpop.f32.mrf.mxu1  ;;  %v6056_v6 = vadd.f32 %v4646_v18, %v4598_v60 }
 0x241   : > { %v1570_v30 = vadd.f32 %v4666_v32, %v5984_v23  ;;  %v6059_v50 = vpop.f32.mrf.mxu0 }
 0x242   : > { %v1443_v0 = vpop.f32.mrf.mxu1 }
 0x243   : > { %v6062_v59 = vadd.f32 %v1443_v0, %v5986_v13  ;;  %v4713_v49 = vpop.f32.mrf.mxu0  ;;  %4952 = vmatmul.mubr.bf16.vlgmr.msra.gmra.mxu0 %v3163_v53 }
 0x244   : > { %v4669_v29 = vpop.f32.mrf.mxu1  ;;  %4960 = vmatmul.mubr.bf16.gmra.mxu1 %v3167_v16  ;;  %v6064_v1 = vadd.f32 %v4713_v49, %v1569_v56  ;;  %4985 = vmatprep.mubr.msk.bf16.mxu0 %vm432_vm0, %v5644_v4  ;;  %v3169_v4 = vpack.c.bf16 %v3145_v37, %v3144_v44  ;;  %v3149_v44 = vld [vmem:[#allocation2 + $0x112] sm:$0xff] }
 0x245   : > { %v1573_v60 = vadd.f32 %v4669_v29, %v5989_v19  ;;  %4963 = vmatprep.mubr.bf16.mxu1 %v3168_v46  ;;  %v1746_v23 = vpop.f32.mrf.mxu0 }
 0x246   : > { %v1456_v42 = vpop.f32.mrf.mxu1  ;;  %v6069_v54 = vadd.f32 %v1746_v23, %v1567_v57  ;;  %v3170_v57 = vpack.c.bf16 %v3147_v25, %v3146_v40  ;;  %v3151_v40 = vld [vmem:[#allocation2 + $0x12a] sm:$0xff] }
 0x247   : > { %v1571_v13 = vadd.f32 %v1456_v42, %v5992_v7  ;;  %v4714_v18 = vpop.f32.mrf.mxu0 }
 0x248   : > { %v4670_v32 = vpop.f32.mrf.mxu1  ;;  %v6072_v56 = vadd.f32 %v4714_v18, %v1570_v30  ;;  %v3148_v18 = vld [vmem:[#allocation2 + $0x10a] sm:$0xff] }
 0x249   : > { %v1574_v19 = vadd.f32 %v4670_v32, %v5994_v21  ;;  %v6075_v53 = vpop.f32.mrf.mxu0  ;;  %v3150_v32 = vld [vmem:[#allocation2 + $0x122] sm:$0xff] }
 0x24a   : > { %v1459_v0 = vpop.f32.mrf.mxu1 }
 0x24b   : > { %v6078_v16 = vadd.f32 %v1459_v0, %v5997_v5  ;;  %v4717_v46 = vpop.f32.mrf.mxu0 }
 0x24c   : > { %v4673_v7 = vpop.f32.mrf.mxu1  ;;  %4964 = vmatmul.mubr.bf16.gmra.mxu1 %v3169_v4  ;;  %v6080_v49 = vadd.f32 %v4717_v46, %v1573_v60  ;;  %v3171_v4 = vpack.c.bf16 %v3149_v44, %v3148_v18  ;;  %v3153_v18 = vld [vmem:[#allocation2 + $0x142] sm:$0xff] }
 0x24d   : > { %v1577_v29 = vadd.f32 %v4673_v7, %v5999_v20  ;;  %4967 = vmatprep.mubr.bf16.mxu1 %v3170_v57  ;;  %v1762_v30 = vpop.f32.mrf.mxu0 }
 0x24e   : > { %v1472_v23 = vpop.f32.mrf.mxu1  ;;  %v6083_v42 = vadd.f32 %v1762_v30, %v1571_v13  ;;  %v3172_v13 = vpack.c.bf16 %v3151_v40, %v3150_v32  ;;  %v3155_v32 = vld [vmem:[#allocation2 + $0x15a] sm:$0xff] }
 0x24f   : > { %v1575_v21 = vadd.f32 %v1472_v23, %v6002_v43  ;;  %v4718_v37 = vpop.f32.mrf.mxu0 }
 0x250   : > { %v4674_v5 = vpop.f32.mrf.mxu1  ;;  %v6086_v25 = vadd.f32 %v4718_v37, %v1574_v19 }
 0x251   : > { %v1578_v60 = vadd.f32 %v4674_v5, %v6004_v39  ;;  %v6089_v0 = vpop.f32.mrf.mxu0  ;;  %v3152_v5 = vld [vmem:[#allocation2 + $0x13a] sm:$0xff] }
 0x252   : > { %v1475_v20 = vpop.f32.mrf.mxu1 }
 0x253   : > { %v6092_v57 = vadd.f32 %v1475_v20, %v6007_v11  ;;  %v4721_v46 = vpop.f32.mrf.mxu0  ;;  %v3154_v20 = vld [vmem:[#allocation2 + $0x152] sm:$0xff] }
 0x254   : > { %v4677_v43 = vpop.f32.mrf.mxu1  ;;  %4968 = vmatmul.mubr.bf16.gmra.mxu1 %v3171_v4  ;;  %v6094_v7 = vadd.f32 %v4721_v46, %v1577_v29  ;;  %v3174_v46 = vpack.c.bf16 %v3155_v32, %v3154_v20 }
 0x255   : > { %v1581_v30 = vadd.f32 %v4677_v43, %v6009_v12  ;;  %4971 = vmatprep.mubr.bf16.mxu1 %v3172_v13  ;;  %v1778_v19 = vpop.f32.mrf.mxu0  ;;  %v3173_v13 = vpack.c.bf16 %v3153_v18, %v3152_v5  ;;  %v3157_v5 = vld [vmem:[#allocation2 + $0x172] sm:$0xff] }
 0x256   : > { %v1488_v23 = vpop.f32.mrf.mxu1  ;;  %v6097_v37 = vadd.f32 %v1778_v19, %v1575_v21  ;;  %v5238_v21 = vld [vmem:[#allocation9 + $0x38] sm:$0xff]  }
 0x257   : > { %v1579_v39 = vadd.f32 %v1488_v23, %v6012_v2  ;;  %v4722_v44 = vpop.f32.mrf.mxu0  ;;  %5017 = vmatprep.subr.bf16.mxu1 %v5238_v21 }
 0x258   : > { %v4678_v11 = vpop.f32.mrf.mxu1  ;;  %v6100_v40 = vadd.f32 %v4722_v44, %v1578_v60  ;;  %5018 = vmatpush3.bf16.msra.mxu1 %v5238_v21 }
 0x259   : > { %v1582_v29 = vadd.f32 %v4678_v11, %v6014_v62  ;;  %v6103_v4 = vpop.f32.mrf.mxu0 }
 0x25a   : > { %v6105_v12 = vpop.f32.mrf.mxu1 }
 0x25b   : > { %v4725_v43 = vpop.f32.mrf.mxu0 }
 0x25c   : > { %v4681_v19 = vpop.f32.mrf.mxu1  ;;  %4972 = vmatmul.mubr.bf16.gmra.mxu1 %v3173_v13  ;;  %v6107_v2 = vadd.f32 %v4725_v43, %v1581_v30  ;;  %v5239_v43 = vld [vmem:[#allocation9 + $0x30] sm:$0xff]  }
 0x25d   : > { %v1585_v23 = vadd.f32 %v4681_v19, %v6018_v28  ;;  %4975 = vmatprep.mubr.bf16.mxu1 %v3174_v46  ;;  %v1794_v60 = vpop.f32.mrf.mxu0  ;;  %v3175_v46 = vpack.c.bf16 %v3157_v5, %v3156_v41  ;;  %5019 = vmatprep.subr.bf16.mxu1 %v5239_v43 }
 0x25e   : > { %v1504_v44 = vpop.f32.mrf.mxu1  ;;  %v6110_v62 = vadd.f32 %v1794_v60, %v1579_v39  ;;  %v3160_v60 = vld [vmem:[#allocation2 + $0x19a] sm:$0xff]  ;;  %5020 = vmatpush3.bf16.msra.mxu1 %v5239_v43 }
 0x25f   : > { %v1583_v11 = vadd.f32 %v1504_v44, %v6021_v3  ;;  %v4726_v18 = vpop.f32.mrf.mxu0 }
 0x260   : > { %v4682_v20 = vpop.f32.mrf.mxu1  ;;  %v6113_v32 = vadd.f32 %v4726_v18, %v1582_v29  ;;  %v3161_v29 = vld [vmem:[#allocation2 + $0x1a2] sm:$0xff] }
 0x261   : > { %v1586_v30 = vadd.f32 %v4682_v20, %v6023_v10  ;;  %v6116_v13 = vpop.f32.mrf.mxu0  ;;  %v3177_v36 = vpack.c.bf16 %v3161_v29, %v3160_v60 }
 0x262   : > { %v6118_v28 = vpop.f32.mrf.mxu1 }
 0x263   : > { %v4729_v19 = vpop.f32.mrf.mxu0 }
 0x264   : > { %v4685_v21 = vpop.f32.mrf.mxu1  ;;  %4976 = vmatmul.mubr.bf16.gmra.mxu1 %v3175_v46  ;;  %v6120_v39 = vadd.f32 %v4729_v19, %v1585_v23 }
 0x265   : > { %v1589_v3 = vadd.f32 %v4685_v21, %v6029_v58  ;;  %4979 = vmatprep.mubr.bf16.mxu1 %v5972_v52  ;;  %v1810_v44 = vpop.f32.mrf.mxu0  ;;  %v5240_v58 = vld [vmem:[#allocation9 + $0x28] sm:$0xff]  }
 0x266   : > { %v1520_v10 = vpop.f32.mrf.mxu1  ;;  %v6124_v18 = vadd.f32 %v1810_v44, %v1583_v11  ;;  %5021 = vmatprep.subr.bf16.mxu1 %v5240_v58 }
 0x267   : > { %v1587_v41 = vadd.f32 %v1520_v10, %v6032_v45  ;;  %v4730_v5 = vpop.f32.mrf.mxu0  ;;  %5022 = vmatpush3.bf16.msra.mxu1 %v5240_v58 }
 0x268   : > { %v4686_v20 = vpop.f32.mrf.mxu1  ;;  %v6127_v46 = vadd.f32 %v4730_v5, %v1586_v30  ;;  %v1250_v30 = vadd.f32 %v6036_v33, %v6025_v38 }
 0x269   : > { %v1590_v23 = vadd.f32 %v4686_v20, %v6034_v22  ;;  %v6130_v19 = vpop.f32.mrf.mxu0 }
 0x26a   : > { %v1523_v52 = vpop.f32.mrf.mxu1 }
 0x26b   : > { %v4733_v21 = vpop.f32.mrf.mxu0  ;;  %v1588_v20 = vadd.f32 %v1523_v52, %v1250_v30 }
 0x26c   : > { %v4689_v34 = vpop.f32.mrf.mxu1  ;;  %4980 = vmatmul.mubr.bf16.gmra.mxu1 %v3177_v36  ;;  %v6132_v43 = vadd.f32 %v4733_v21, %v1589_v3  ;;  %v5241_v3 = vld [vmem:[#allocation9 + $0x20] sm:$0xff]  }
 0x26d   : > { %v1593_v11 = vadd.f32 %v4689_v34, %v6040_v63  ;;  %v1826_v45 = vpop.f32.mrf.mxu0  ;;  %5023 = vmatprep.subr.bf16.mxu1 %v5241_v3 }
 0x26e   : > { %6706 = vst [vmem:[#allocation25_spill] sm:$0xff] %v6132_v43  ;;  %v1536_v44 = vpop.f32.mrf.mxu1  ;;  %v6137_v60 = vadd.f32 %v1826_v45, %v1587_v41  ;;  %5024 = vmatpush3.bf16.msra.mxu1 %v5241_v3  ;;  %v5242_v45 = vld [vmem:[#allocation9 + $0x18] sm:$0xff]  }
 0x26f   : > { %v1591_v22 = vadd.f32 %v1536_v44, %v6042_v35  ;;  %v4734_v29 = vpop.f32.mrf.mxu0  ;;  %5025 = vmatprep.subr.bf16.mxu1 %v5242_v45 }
 0x270   : > { %v4690_v10 = vpop.f32.mrf.mxu1  ;;  %v6140_v5 = vadd.f32 %v4734_v29, %v1590_v23  ;;  %v1266_v23 = vadd.f32 %v6046_v31, %v6038_v55 }
 0x271   : > { %v1594_v36 = vadd.f32 %v4690_v10, %v6044_v61  ;;  %v1829_v21 = vpop.f32.mrf.mxu0 }
 0x272   : > { %v1539_v34 = vpop.f32.mrf.mxu1  ;;  %v6143_v63 = vadd.f32 %v1829_v21, %v1588_v20  ;;  %5026 = vmatpush3.bf16.msra.mxu1 %v5242_v45 }
 0x273   : > { %v4737_v58 = vpop.f32.mrf.mxu0  ;;  %v1592_v10 = vadd.f32 %v1539_v34, %v1266_v23 }
 0x274   : > { %v4693_v43 = vpop.f32.mrf.mxu1  ;;  %v6145_v38 = vadd.f32 %v4737_v58, %v1593_v11  ;;  %v5243_v58 = vld [vmem:[#allocation9 + $0x10] sm:$0xff]  }
 0x275   : > { %v1597_v33 = vadd.f32 %v4693_v43, %v6050_v48  ;;  %v1842_v35 = vpop.f32.mrf.mxu0  ;;  %5027 = vmatprep.subr.bf16.mxu1 %v5243_v58 }
 0x276   : > { %v1552_v41 = vpop.f32.mrf.mxu1  ;;  %v6150_v52 = vadd.f32 %v1842_v35, %v1591_v22  ;;  %5028 = vmatpush3.bf16.msra.mxu1 %v5243_v58 }
 0x277   : > { %v1595_v61 = vadd.f32 %v1552_v41, %v6053_v47  ;;  %v4738_v44 = vpop.f32.mrf.mxu0 }
 0x278   : > { %v4694_v30 = vpop.f32.mrf.mxu1  ;;  %v6153_v29 = vadd.f32 %v4738_v44, %v1594_v36  ;;  %v1282_v36 = vadd.f32 %v6059_v50, %v6048_v17 }
 0x279   : > { %v1598_v11 = vadd.f32 %v4694_v30, %v6056_v6  ;;  %v1845_v20 = vpop.f32.mrf.mxu0 }
 0x27a   : > { %v1555_v48 = vpop.f32.mrf.mxu1  ;;  %v6156_v43 = vadd.f32 %v1845_v20, %v1592_v10 }
 0x27b   : > { %v4741_v3 = vpop.f32.mrf.mxu0  ;;  %v1596_v45 = vadd.f32 %v1555_v48, %v1282_v36 }
 0x27c   : > { %v4761_v55 = vpop.f32.mrf.mxu1  ;;  %v6158_v31 = vadd.f32 %v4741_v3, %v1597_v33 }
 0x27d   : > { %v2181_v47 = vadd.f32 %v4761_v55, %v6064_v1  ;;  %v1858_v22 = vpop.f32.mrf.mxu0 }
 0x27e   : > { %v2052_v21 = vpop.f32.mrf.mxu1  ;;  %v6163_v34 = vadd.f32 %v1858_v22, %v1595_v61 }
 0x27f   : > { %v2179_v6 = vadd.f32 %v2052_v21, %v6069_v54  ;;  %v4742_v35 = vpop.f32.mrf.mxu0 }
 0x280   : > { %v4762_v41 = vpop.f32.mrf.mxu1  ;;  %v6166_v23 = vadd.f32 %v4742_v35, %v1598_v11  ;;  %v1874_v11 = vadd.f32 %v6075_v53, %v6062_v59 }
 0x281   : > { %v2182_v33 = vadd.f32 %v4762_v41, %v6072_v56  ;;  %v1861_v44 = vpop.f32.mrf.mxu0 }
 0x282   : > { %v2055_v1 = vpop.f32.mrf.mxu1  ;;  %v6169_v30 = vadd.f32 %v1861_v44, %v1596_v45 }
 0x283   : > { %v4809_v10 = vpop.f32.mrf.mxu0  ;;  %v2180_v21 = vadd.f32 %v2055_v1, %v1874_v11 }
 0x284   : > { %v4765_v17 = vpop.f32.mrf.mxu1  ;;  %v6171_v50 = vadd.f32 %v4809_v10, %v2181_v47  ;;  %v5244_v47 = vld [vmem:[#allocation9 + $0x8] sm:$0xff]   ;;  %v5246_v10 = vld [vmem:[#allocation9] sm:$0xff]  }
 0x285   : > { %v2185_v54 = vadd.f32 %v4765_v17, %v6080_v49  ;;  %v2358_v61 = vpop.f32.mrf.mxu0  ;;  %5029 = vmatprep.subr.bf16.mxu1 %v5244_v47 }
 0x286   : > { %v2068_v20 = vpop.f32.mrf.mxu1  ;;  %v6176_v48 = vadd.f32 %v2358_v61, %v2179_v6  ;;  %5030 = vmatpush3.bf16.msra.mxu1 %v5244_v47  ;;  %v1580_v47 = vadd.f32 %v6105_v12, %v6016_v51 }
 0x287   : > { %v2183_v56 = vadd.f32 %v2068_v20, %v6083_v42  ;;  %v4810_v3 = vpop.f32.mrf.mxu0  ;;  %v5245_v42 = vld [vmem:[%s6665_s7] sm:$0xff]   ;;  %5031 = vmatprep.subr.bf16.mxu1 %v5246_v10 }
 0x288   : > { %v4766_v55 = vpop.f32.mrf.mxu1  ;;  %v6179_v22 = vadd.f32 %v4810_v3, %v2182_v33  ;;  %4983 = vmatprep.subr.bf16.mxu0 %v5245_v42 }
 0x289   : > { %v2186_v36 = vadd.f32 %v4766_v55, %v6086_v25  ;;  %v2361_v58 = vpop.f32.mrf.mxu0  ;;  %v1878_v25 = vadd.f32 %v6089_v0, %v6078_v16  ;;  %4984 = vmatpush3.bf16.msra.mxu0 %v5245_v42 }
 0x28a   : > { %v2071_v35 = vpop.f32.mrf.mxu1  ;;  %v6182_v49 = vadd.f32 %v2361_v58, %v2180_v21  ;;  %5032 = vmatpush3.bf16.msra.mxu1 %v5246_v10 }
 0x28b   : > { %v4813_v41 = vpop.f32.mrf.mxu0 }
 0x28c   : > { %v4769_v45 = vpop.f32.mrf.mxu1  ;;  %v6184_v59 = vadd.f32 %v4813_v41, %v2185_v54  ;;  %4986 = vmatmul.mubr.msk.bf16.vlgmr.msra.gmra.mxu0 %vm432_vm0, %v5649_v8 }
 0x28d   : > { %v2189_v53 = vadd.f32 %v4769_v45, %v6094_v7  ;;  %v2374_v6 = vpop.f32.mrf.mxu0  ;;  %v2184_v7 = vadd.f32 %v2071_v35, %v1878_v25  ;;  %4989 = vmatprep.mubr.msk.bf16.mxu0 %vm432_vm0, %v5651_v9  ;;  %v1886_v9 = vadd.f32 %v6116_v13, %v1580_v47 }
 0x28e   : > { %v2084_v33 = vpop.f32.mrf.mxu1  ;;  %v6192_v44 = vadd.f32 %v2374_v6, %v2183_v56 }
 0x28f   : > { %v2187_v1 = vadd.f32 %v2084_v33, %v6097_v37  ;;  %v4814_v17 = vpop.f32.mrf.mxu0 }
 0x290   : > { %v4770_v54 = vpop.f32.mrf.mxu1  ;;  %v6195_v61 = vadd.f32 %v4814_v17, %v2186_v36  ;;  %v1882_v36 = vadd.f32 %v6103_v4, %v6092_v57 }
 0x291   : > { %v2190_v20 = vadd.f32 %v4770_v54, %v6100_v40  ;;  %v2377_v11 = vpop.f32.mrf.mxu0 }
 0x292   : > { %v2087_v3 = vpop.f32.mrf.mxu1  ;;  %v6198_v55 = vadd.f32 %v2377_v11, %v2184_v7 }
 0x293   : > { %v4817_v16 = vpop.f32.mrf.mxu0 }
 0x294   : > { %v4773_v0 = vpop.f32.mrf.mxu1  ;;  %v6204_v37 = vadd.f32 %v4817_v16, %v2189_v53  ;;  %v2188_v53 = vadd.f32 %v2087_v3, %v1882_v36  ;;  %4990 = vmatmul.mubr.msk.bf16.gmra.mxu0 %vm432_vm0, %v5663_v14 }
 0x295   : > { %v2193_v56 = vadd.f32 %v4773_v0, %v6107_v2  ;;  %v2390_v21 = vpop.f32.mrf.mxu0  ;;  %4993 = vmatprep.mubr.msk.bf16.mxu0 %vm432_vm0, %v5665_v15 }
 0x296   : > { %v2100_v40 = vpop.f32.mrf.mxu1  ;;  %v6211_v58 = vadd.f32 %v2390_v21, %v2187_v1 }
 0x297   : > { %v2191_v8 = vadd.f32 %v2100_v40, %v6110_v62  ;;  %v4818_v35 = vpop.f32.mrf.mxu0 }
 0x298   : > { %v4774_v41 = vpop.f32.mrf.mxu1  ;;  %v6215_v45 = vadd.f32 %v4818_v35, %v2190_v20 }
 0x299   : > { %v2194_v2 = vadd.f32 %v4774_v41, %v6113_v32  ;;  %v2393_v42 = vpop.f32.mrf.mxu0  ;;  %v1584_v32 = vadd.f32 %v6118_v28, %v6027_v27 }
 0x29a   : > { %v2103_v6 = vpop.f32.mrf.mxu1  ;;  %v6218_v33 = vadd.f32 %v2393_v42, %v2188_v53  ;;  %v6709_v42 = vld [vmem:[#allocation17_spill] sm:$0xff] }
 0x29b   : > { %v2192_v57 = vadd.f32 %v2103_v6, %v1886_v9  ;;  %v4821_v51 = vpop.f32.mrf.mxu0  ;;  %v1890_v54 = vadd.f32 %v6130_v19, %v1584_v32  ;;  %v6707_v19 = vld [vmem:[#allocation25_spill] sm:$0xff]  ;;  %v6708_v9 = vld [vmem:[#allocation16_spill] sm:$0xff] }
 0x29c   : > { %v4777_v4 = vpop.f32.mrf.mxu1  ;;  %v6224_v12 = vadd.f32 %v4821_v51, %v2193_v56  ;;  %4994 = vmatmul.mubr.msk.bf16.gmra.mxu0 %vm432_vm0, %v5675_v24 }
 0x29d   : > { %v2197_v62 = vadd.f32 %v4777_v4, %v6120_v39  ;;  %v2406_v13 = vpop.f32.mrf.mxu0  ;;  %4997 = vmatprep.mubr.msk.bf16.mxu0 %vm432_vm0, %v5677_v26 }
 0x29e   : > { %v2116_v25 = vpop.f32.mrf.mxu1  ;;  %v6229_v1 = vadd.f32 %v2406_v13, %v2191_v8 }
 0x29f   : > { %v2195_v10 = vadd.f32 %v2116_v25, %v6124_v18  ;;  %v4822_v17 = vpop.f32.mrf.mxu0 }
 0x2a0   : > { %v4778_v14 = vpop.f32.mrf.mxu1  ;;  %v6233_v7 = vadd.f32 %v4822_v17, %v2194_v2 }
 0x2a1   : > { %v2198_v15 = vadd.f32 %v4778_v14, %v6127_v46  ;;  %v2409_v20 = vpop.f32.mrf.mxu0 }
 0x2a2   : > { %v2119_v11 = vpop.f32.mrf.mxu1  ;;  %v6236_v39 = vadd.f32 %v2409_v20, %v2192_v57  ;;  %v6711_v20 = vld [vmem:[#allocation19_spill] sm:$0xff] }
 0x2a3   : > { %v2196_v3 = vadd.f32 %v2119_v11, %v1890_v54  ;;  %v4825_v27 = vpop.f32.mrf.mxu0  ;;  %v6710_v54 = vld [vmem:[#allocation18_spill] sm:$0xff] }
 0x2a4   : > { %v4781_v28 = vpop.f32.mrf.mxu1  ;;  %v6242_v18 = vadd.f32 %v4825_v27, %v2197_v62  ;;  %4998 = vmatmul.mubr.msk.bf16.gmra.mxu0 %vm432_vm0, %v6708_v9 }
 0x2a5   : > { %v2201_v16 = vadd.f32 %v4781_v28, %v6707_v19  ;;  %v2422_v0 = vpop.f32.mrf.mxu0  ;;  %5001 = vmatprep.mubr.msk.bf16.mxu0 %vm432_vm0, %v6709_v42 }
 0x2a6   : > { %v2132_v56 = vpop.f32.mrf.mxu1  ;;  %v6245_v46 = vadd.f32 %v2422_v0, %v2195_v10 }
 0x2a7   : > { %v2199_v21 = vadd.f32 %v2132_v56, %v6137_v60  ;;  %v4826_v40 = vpop.f32.mrf.mxu0 }
 0x2a8   : > { %v4782_v36 = vpop.f32.mrf.mxu1  ;;  %v6248_v47 = vadd.f32 %v4826_v40, %v2198_v15 }
 0x2a9   : > { %v2202_v24 = vadd.f32 %v4782_v36, %v6140_v5  ;;  %v2425_v8 = vpop.f32.mrf.mxu0 }
 0x2aa   : > { %v2135_v35 = vpop.f32.mrf.mxu1  ;;  %v6251_v41 = vadd.f32 %v2425_v8, %v2196_v3 }
 0x2ab   : > { %v2200_v26 = vadd.f32 %v2135_v35, %v6143_v63  ;;  %v4829_v53 = vpop.f32.mrf.mxu0  ;;  %v6715_v35 = vld [vmem:[#allocation21_spill] sm:$0xff] }
 0x2ac   : > { %v4785_v2 = vpop.f32.mrf.mxu1  ;;  %v6258_v60 = vadd.f32 %v4829_v53, %v2201_v16  ;;  %5002 = vmatmul.mubr.msk.bf16.gmra.mxu0 %vm432_vm0, %v6710_v54 }
 0x2ad   : > { %v2205_v6 = vadd.f32 %v4785_v2, %v6145_v38  ;;  %v2438_v57 = vpop.f32.mrf.mxu0  ;;  %5005 = vmatprep.mubr.msk.bf16.mxu0 %vm432_vm0, %v6711_v20 }
 0x2ae   : > { %v2148_v5 = vpop.f32.mrf.mxu1  ;;  %v6261_v51 = vadd.f32 %v2438_v57, %v2199_v21 }
 0x2af   : > { %v2203_v4 = vadd.f32 %v2148_v5, %v6150_v52  ;;  %v4830_v62 = vpop.f32.mrf.mxu0 }
 0x2b0   : > { %v4786_v63 = vpop.f32.mrf.mxu1  ;;  %v6264_v13 = vadd.f32 %v4830_v62, %v2202_v24  ;;  %v6714_v24 = vld [vmem:[#allocation20_spill] sm:$0xff] }
 0x2b1   : > { %v2206_v25 = vadd.f32 %v4786_v63, %v6153_v29  ;;  %v2441_v32 = vpop.f32.mrf.mxu0 }
 0x2b2   : > { %v2151_v10 = vpop.f32.mrf.mxu1  ;;  %v6267_v17 = vadd.f32 %v2441_v32, %v2200_v26 }
 0x2b3   : > { %v2204_v14 = vadd.f32 %v2151_v10, %v6156_v43  ;;  %v4833_v38 = vpop.f32.mrf.mxu0 }
 0x2b4   : > { %v4789_v15 = vpop.f32.mrf.mxu1  ;;  %v6274_v52 = vadd.f32 %v4833_v38, %v2205_v6  ;;  %5006 = vmatmul.mubr.msk.bf16.gmra.mxu0 %vm432_vm0, %v6714_v24 }
 0x2b5   : > { %v2209_v11 = vadd.f32 %v4789_v15, %v6158_v31  ;;  %v2454_v3 = vpop.f32.mrf.mxu0  ;;  %5009 = vmatprep.mubr.msk.bf16.mxu0 %vm432_vm0, %v6715_v35 }
 0x2b6   : > { %v2164_v29 = vpop.f32.mrf.mxu1  ;;  %v6277_v27 = vadd.f32 %v2454_v3, %v2203_v4  ;;  %v6718_v4 = vld [vmem:[#allocation22_spill] sm:$0xff] }
 0x2b7   : > { %v2207_v28 = vadd.f32 %v2164_v29, %v6163_v34  ;;  %v4834_v19 = vpop.f32.mrf.mxu0 }
 0x2b8   : > { %6712 = vst [vmem:[#allocation25_spill] sm:$0xff] %v6277_v27  ;;  %v4790_v43 = vpop.f32.mrf.mxu1  ;;  %v6280_v16 = vadd.f32 %v4834_v19, %v2206_v25  ;;  %v6719_v25 = vld [vmem:[#allocation23_spill] sm:$0xff]  ;;  %v6720_v19 = vld [vmem:[#allocation24_spill] sm:$0xff] }
 0x2b9   : > { %v2210_v0 = vadd.f32 %v4790_v43, %v6166_v23  ;;  %v2457_v56 = vpop.f32.mrf.mxu0 }
 0x2ba   : > { %v2167_v21 = vpop.f32.mrf.mxu1  ;;  %v6283_v40 = vadd.f32 %v2457_v56, %v2204_v14 }
 0x2bb   : > { %v2208_v36 = vadd.f32 %v2167_v21, %v6169_v30  ;;  %v4837_v31 = vpop.f32.mrf.mxu0 }
 0x2bc   : > { %6713 = vst [vmem:[#allocation16_spill] sm:$0xff] %v6283_v40  ;;  %v4857_v8 = vpop.f32.mrf.mxu1  ;;  %v6290_v34 = vadd.f32 %v4837_v31, %v2209_v11  ;;  %5010 = vmatmul.mubr.msk.bf16.gmra.mxu0 %vm432_vm0, %v6718_v4 }
 0x2bd   : > { %v2794_v26 = vadd.f32 %v4857_v8, %v6171_v50  ;;  %v2470_v9 = vpop.f32.mrf.mxu0  ;;  %5013 = vmatprep.mubr.msk.bf16.mxu0 %vm432_vm0, %v6719_v25 }
 0x2be   : > { %v2665_v23 = vpop.f32.mrf.mxu1  ;;  %v6293_v53 = vadd.f32 %v2470_v9, %v2207_v28 }
 0x2bf   : > { %v4838_v2 = vpop.f32.mrf.mxu0  ;;  %v2792_v32 = vadd.f32 %v2665_v23, %v6176_v48 }
 0x2c0   : > { %6716 = vst [vmem:[#allocation17_spill] sm:$0xff] %v6293_v53  ;;  %v4858_v42 = vpop.f32.mrf.mxu1  ;;  %v6295_v6 = vadd.f32 %v4838_v2, %v2210_v0 }
 0x2c1   : > { %v2473_v30 = vpop.f32.mrf.mxu0  ;;  %v2795_v15 = vadd.f32 %v4858_v42, %v6179_v22 }
 0x2c2   : > { %v6297_v57 = vpop.f32.mrf.mxu1  ;;  %v6299_v5 = vadd.f32 %v2473_v30, %v2208_v36 }
 0x2c3   : > { %v4905_v62 = vpop.f32.mrf.mxu0 }
 0x2c4   : > { %6717 = vst [vmem:[#allocation18_spill] sm:$0xff] %v6299_v5  ;;  %v4861_v63 = vpop.f32.mrf.mxu1  ;;  %v6305_v50 = vadd.f32 %v4905_v62, %v2794_v26  ;;  %5014 = vmatmul.mubr.msk.bf16.gmra.mxu0 %vm432_vm0, %v6720_v19 }
 0x2c5   : > { %v2798_v10 = vadd.f32 %v4861_v63, %v6184_v59  ;;  %v2971_v14 = vpop.f32.mrf.mxu0 }
 0x2c6   : > { %v6309_v54 = vpop.f32.mrf.mxu1  ;;  %v6311_v38 = vadd.f32 %v2971_v14, %v2792_v32 }
 0x2c7   : > { %v4906_v20 = vpop.f32.mrf.mxu0 }
 0x2c8   : > { %v4862_v11 = vpop.f32.mrf.mxu1  ;;  %v6314_v3 = vadd.f32 %v4906_v20, %v2795_v15 }
 0x2c9   : > { %v6316_v29 = vpop.f32.mrf.mxu0  ;;  %v2799_v21 = vadd.f32 %v4862_v11, %v6195_v61 }
 0x2ca   : > { %v6318_v28 = vpop.f32.mrf.mxu1 }
 0x2cb   : > { %v4909_v48 = vpop.f32.mrf.mxu0 }
 0x2cc   : > { %v4865_v59 = vpop.f32.mrf.mxu1  ;;  %v6322_v43 = vadd.f32 %v4909_v48, %v2798_v10 }
 0x2cd   : > { %v2802_v0 = vadd.f32 %v4865_v59, %v6204_v37  ;;  %v6325_v56 = vpop.f32.mrf.mxu0 }
 0x2ce   : > { %v6327_v22 = vpop.f32.mrf.mxu1 }
 0x2cf   : > { %v4910_v36 = vpop.f32.mrf.mxu0 }
 0x2d0   : > { %v4866_v24 = vpop.f32.mrf.mxu1  ;;  %v6330_v31 = vadd.f32 %v4910_v36, %v2799_v21 }
 0x2d1   : > { %v6332_v8 = vpop.f32.mrf.mxu0  ;;  %v2803_v61 = vadd.f32 %v4866_v24, %v6215_v45 }
 0x2d2   : > { %v6334_v35 = vpop.f32.mrf.mxu1 }
 0x2d3   : > { %v4913_v26 = vpop.f32.mrf.mxu0 }
 0x2d4   : > { %v4869_v9 = vpop.f32.mrf.mxu1  ;;  %v6336_v23 = vadd.f32 %v4913_v26, %v2802_v0 }
 0x2d5   : > { %v2806_v37 = vadd.f32 %v4869_v9, %v6224_v12  ;;  %v6339_v2 = vpop.f32.mrf.mxu0 }
 0x2d6   : > { %v6341_v42 = vpop.f32.mrf.mxu1 }
 0x2d7   : > { %v4914_v30 = vpop.f32.mrf.mxu0 }
 0x2d8   : > { %v4870_v4 = vpop.f32.mrf.mxu1  ;;  %v6344_v62 = vadd.f32 %v4914_v30, %v2803_v61 }
 0x2d9   : > { %v6346_v63 = vpop.f32.mrf.mxu0  ;;  %v2807_v45 = vadd.f32 %v4870_v4, %v6233_v7 }
 0x2da   : > { %v6348_v25 = vpop.f32.mrf.mxu1 }
 0x2db   : > { %v4917_v32 = vpop.f32.mrf.mxu0 }
 0x2dc   : > { %v4873_v10 = vpop.f32.mrf.mxu1  ;;  %v6350_v14 = vadd.f32 %v4917_v32, %v2806_v37 }
 0x2dd   : > { %v2810_v12 = vadd.f32 %v4873_v10, %v6242_v18  ;;  %v6353_v15 = vpop.f32.mrf.mxu0 }
 0x2de   : > { %v6355_v20 = vpop.f32.mrf.mxu1 }
 0x2df   : > { %v4918_v11 = vpop.f32.mrf.mxu0 }
 0x2e0   : > { %v4874_v19 = vpop.f32.mrf.mxu1  ;;  %v6358_v48 = vadd.f32 %v4918_v11, %v2807_v45 }
 0x2e1   : > { %v6360_v59 = vpop.f32.mrf.mxu0  ;;  %v2811_v7 = vadd.f32 %v4874_v19, %v6248_v47 }
 0x2e2   : > { %v6362_v0 = vpop.f32.mrf.mxu1 }
 0x2e3   : > { %v4921_v21 = vpop.f32.mrf.mxu0 }
 0x2e4   : > { %v4877_v36 = vpop.f32.mrf.mxu1  ;;  %v6364_v24 = vadd.f32 %v4921_v21, %v2810_v12 }
 0x2e5   : > { %v2814_v18 = vadd.f32 %v4877_v36, %v6258_v60  ;;  %v6367_v26 = vpop.f32.mrf.mxu0 }
 0x2e6   : > { %v6369_v9 = vpop.f32.mrf.mxu1 }
 0x2e7   : > { %v4922_v37 = vpop.f32.mrf.mxu0 }
 0x2e8   : > { %v4878_v61 = vpop.f32.mrf.mxu1  ;;  %v6372_v30 = vadd.f32 %v4922_v37, %v2811_v7 }
 0x2e9   : > { %v6374_v4 = vpop.f32.mrf.mxu0  ;;  %v2815_v47 = vadd.f32 %v4878_v61, %v6264_v13 }
 0x2ea   : > { %v6376_v32 = vpop.f32.mrf.mxu1 }
 0x2eb   : > { %v4925_v10 = vpop.f32.mrf.mxu0 }
 0x2ec   : > { %v4881_v45 = vpop.f32.mrf.mxu1  ;;  %v6378_v12 = vadd.f32 %v4925_v10, %v2814_v18 }
 0x2ed   : > { %v2818_v60 = vadd.f32 %v4881_v45, %v6274_v52  ;;  %v6381_v11 = vpop.f32.mrf.mxu0 }
 0x2ee   : > { %v6383_v21 = vpop.f32.mrf.mxu1 }
 0x2ef   : > { %6721 = vst [vmem:[#allocation19_spill] sm:$0xff] %v6383_v21  ;;  %v4926_v19 = vpop.f32.mrf.mxu0 }
 0x2f0   : > { %v4882_v36 = vpop.f32.mrf.mxu1  ;;  %v6386_v7 = vadd.f32 %v4926_v19, %v2815_v47 }
 0x2f1   : > { %v6388_v37 = vpop.f32.mrf.mxu0  ;;  %v2819_v13 = vadd.f32 %v4882_v36, %v6280_v16 }
 0x2f2   : > { %v6390_v5 = vpop.f32.mrf.mxu1 }
 0x2f3   : > { %6722 = vst [vmem:[#allocation20_spill] sm:$0xff] %v6390_v5  ;;  %v4929_v53 = vpop.f32.mrf.mxu0 }
 0x2f4   : > { %v4885_v40 = vpop.f32.mrf.mxu1  ;;  %v6392_v18 = vadd.f32 %v4929_v53, %v2818_v60  ;;  %v2796_v53 = vadd.f32 %v6309_v54, %v6192_v44 }
 0x2f5   : > { %v2822_v52 = vadd.f32 %v4885_v40, %v6290_v34  ;;  %v6395_v10 = vpop.f32.mrf.mxu0  ;;  %v6413_v34 = vld [vmem:[%s6662_s4] ss:$0 sm:$0xff] }
 0x2f6   : > { %v6397_v45 = vpop.f32.mrf.mxu1  ;;  %v3102_v36 = vadd.f32 %v6325_v56, %v2796_v53 }
 0x2f7   : > { %6723 = vst [vmem:[#allocation21_spill] sm:$0xff] %v6397_v45  ;;  %v4930_v61 = vpop.f32.mrf.mxu0 }
 0x2f8   : > { %v4886_v21 = vpop.f32.mrf.mxu1  ;;  %v6400_v47 = vadd.f32 %v4930_v61, %v2819_v13 }
 0x2f9   : > { %v6402_v19 = vpop.f32.mrf.mxu0  ;;  %v2823_v44 = vadd.f32 %v4886_v21, %v6295_v6 }
 0x2fa   : > { %6724 = vst [vmem:[#allocation22_spill] sm:$0xff] %v6400_v47  ;;  %v6404_v27 = vpop.f32.mrf.mxu1 }
 0x2fb   : > { %6725 = vst [vmem:[#allocation23_spill] sm:$0xff] %v6404_v27  ;;  %v4933_v60 = vpop.f32.mrf.mxu0  ;;  %v2797_v27 = vadd.f32 %v6318_v28, %v6198_v55  ;;  %v2800_v55 = vadd.f32 %v6327_v22, %v6211_v58  ;;  %v2801_v58 = vadd.f32 %v6334_v35, %v6218_v33 }
 0x2fc   : > { %v4957_v5 = vpop.f32.mrf.mxu1  ;;  %v6408_v40 = vadd.f32 %v4933_v60, %v2822_v52 }
 0x2fd   : > { %v3410_v16 = vadd.f32 %v4957_v5, %v6322_v43  ;;  %v6417_v13 = vpop.f32.mrf.mxu0  ;;  %v3103_v45 = vadd.f32 %v6332_v8, %v2797_v27  ;;  %v3107_v33 = vadd.f32 %v6346_v63, %v2801_v58 }
 0x2fe   : > { %6726 = vst [vmem:[#allocation24_spill] sm:$0xff] %v6408_v40  ;;  %6727 = vst [vmem:[#allocation26_spill] sm:$0xff] %v6417_v13  ;;  %v3293_v61 = vpop.f32.mrf.mxu1 }
 0x2ff   : > { %v4934_v54 = vpop.f32.mrf.mxu0  ;;  %v3449_v52 = vadd.f32 %v6413_v34, %v3410_v16  ;;  %v3408_v60 = vadd.f32 %v3293_v61, %v3102_v36 }
 0x300   : > { %v4958_v40 = vpop.f32.mrf.mxu1  ;;  %v6424_v47 = vadd.f32 %v4934_v54, %v2823_v44 }
 0x301   : > { %v3411_v5 = vadd.f32 %v4958_v40, %v6330_v31  ;;  %v6427_v43 = vpop.f32.mrf.mxu0  ;;  %v3481_v28 = vmax.f32 %v3449_v52, 0.0  ;;  %v3447_v21 = vadd.f32 %v6413_v34, %v3408_v60  ;;  %v2793_v40 = vadd.f32 %v6297_v57, %v6182_v49 }
 0x302   : > { %v3296_v56 = vpop.f32.mrf.mxu1 }
 0x303   : > { %v3450_v53 = vadd.f32 %v6413_v34, %v3411_v5  ;;  %v3409_v13 = vadd.f32 %v3296_v56, %v3103_v45  ;;  %v4953_v6 = vpop.f32.mrf.mxu0  ;;  %v3106_v45 = vadd.f32 %v6339_v2, %v2800_v55  ;;  %v3099_v57 = vadd.f32 %v6316_v29, %v2793_v40 }
 0x304   : > { %v4961_v16 = vpop.f32.mrf.mxu1  ;;  %v3406_v27 = vadd.f32 %v4953_v6, %v6305_v50  ;;  %v2805_v40 = vadd.f32 %v6348_v25, %v6236_v39  ;;  %v2808_v39 = vadd.f32 %v6355_v20, %v6245_v46  ;;  %v2809_v46 = vadd.f32 %v6362_v0, %v6251_v41 }
 0x305   : > { %v3482_v8 = vmax.f32 %v3450_v53, 0.0  ;;  %v3448_v36 = vadd.f32 %v6413_v34, %v3409_v13  ;;  %v3414_v31 = vadd.f32 %v4961_v16, %v6336_v23  ;;  %v3277_v61 = vpop.f32.mrf.mxu0  ;;  %v3479_v13 = vmax.f32 %v3447_v21, 0.0 }
 0x306   : > { %v3309_v44 = vpop.f32.mrf.mxu1  ;;  %v3404_v22 = vadd.f32 %v3277_v61, %v6311_v38  ;;  %v3445_v52 = vadd.f32 %v6413_v34, %v3406_v27  ;;  %v2804_v38 = vadd.f32 %v6341_v42, %v6229_v1 }
 0x307   : > { %v6442_v54 = vpack.c.bf16 %v3482_v8, %v3481_v28  ;;  %v3480_v50 = vmax.f32 %v3448_v36, 0.0  ;;  %v4954_v60 = vpop.f32.mrf.mxu0  ;;  %v3453_v23 = vadd.f32 %v6413_v34, %v3414_v31  ;;  %v3412_v5 = vadd.f32 %v3309_v44, %v3106_v45 }
 0x308   : > { %v4962_v49 = vpop.f32.mrf.mxu1  ;;  %v3407_v2 = vadd.f32 %v4954_v60, %v6314_v3  ;;  %v3443_v6 = vadd.f32 %v6413_v34, %v3404_v22  ;;  %v3477_v29 = vmax.f32 %v3445_v52, 0.0  ;;  %v3110_v31 = vadd.f32 %v6353_v15, %v2804_v38 }
 0x309   : > { %v3415_v56 = vadd.f32 %v4962_v49, %v6344_v62  ;;  %v3280_v35 = vpop.f32.mrf.mxu0  ;;  %v3509_v55 = vpack.c.bf16 %v3480_v50, %v3479_v13  ;;  %v3485_v27 = vmax.f32 %v3453_v23, 0.0  ;;  %v3451_v3 = vadd.f32 %v6413_v34, %v3412_v5 }
 0x30a   : > { %v3312_v53 = vpop.f32.mrf.mxu1  ;;  %v3446_v28 = vadd.f32 %v6413_v34, %v3407_v2  ;;  %v3405_v21 = vadd.f32 %v3280_v35, %v3099_v57  ;;  %v3475_v44 = vmax.f32 %v3443_v6, 0.0  ;;  %v3111_v5 = vadd.f32 %v6360_v59, %v2805_v40 }
 0x30b   : > { %v3454_v16 = vadd.f32 %v6413_v34, %v3415_v56  ;;  %v3413_v62 = vadd.f32 %v3312_v53, %v3107_v33  ;;  %v3483_v52 = vmax.f32 %v3451_v3, 0.0  ;;  %v3114_v38 = vadd.f32 %v6367_v26, %v2808_v39 }
 0x30c   : > { %v4965_v8 = vpop.f32.mrf.mxu1  ;;  %v3478_v63 = vmax.f32 %v3446_v28, 0.0  ;;  %v3444_v36 = vadd.f32 %v6413_v34, %v3405_v21  ;;  %v3115_v26 = vadd.f32 %v6374_v4, %v2809_v46 }
 0x30d   : > { %v3486_v1 = vmax.f32 %v3454_v16, 0.0  ;;  %v3418_v42 = vadd.f32 %v4965_v8, %v6350_v14  ;;  %v3452_v45 = vadd.f32 %v6413_v34, %v3413_v62  ;;  %v2812_v8 = vadd.f32 %v6369_v9, %v6261_v51 }
 0x30e   : > { %v3325_v61 = vpop.f32.mrf.mxu1  ;;  %v3508_v58 = vpack.c.bf16 %v3478_v63, %v3477_v29  ;;  %v3476_v22 = vmax.f32 %v3444_v36, 0.0  ;;  %v2813_v51 = vadd.f32 %v6376_v32, %v6267_v17 }
 0x30f   : > { %v6462_v50 = vpack.c.bf16 %v3486_v1, %v3485_v27  ;;  %v3484_v13 = vmax.f32 %v3452_v45, 0.0  ;;  %v3416_v60 = vadd.f32 %v3325_v61, %v3110_v31  ;;  %v3457_v15 = vadd.f32 %v6413_v34, %v3418_v42 }
 0x310   : > { %v4966_v23 = vpop.f32.mrf.mxu1  ;;  %v3507_v14 = vpack.c.bf16 %v3476_v22, %v3475_v44  ;;  %v3118_v36 = vadd.f32 %v6381_v11, %v2812_v8  ;;  %v3119_v11 = vadd.f32 %v6388_v37, %v2813_v51 }
 0x311   : > { %v3419_v49 = vadd.f32 %v4966_v23, %v6358_v48  ;;  %v3511_v57 = vpack.c.bf16 %v3484_v13, %v3483_v52  ;;  %v3455_v2 = vadd.f32 %v6413_v34, %v3416_v60  ;;  %v3489_v35 = vmax.f32 %v3457_v15, 0.0  ;;  %v6728_v13 = vld [vmem:[#allocation25_spill] sm:$0xff]  ;;  %v6729_v60 = vld [vmem:[#allocation19_spill] sm:$0xff] }
 0x312   : > { %v3328_v25 = vpop.f32.mrf.mxu1  ;;  %5033 = vmatprep.mubr.bf16.mxu1 %v3507_v14  ;;  %v2816_v23 = vadd.f32 %v6729_v60, %v6728_v13 }
 0x313   : > { %v3458_v56 = vadd.f32 %v6413_v34, %v3419_v49  ;;  %v3417_v33 = vadd.f32 %v3328_v25, %v3111_v5  ;;  %5034 = vmatmul.mubr.bf16.vlgmr.msra.gmra.mxu1 %v3508_v58  ;;  %v3487_v28 = vmax.f32 %v3455_v2, 0.0  ;;  %v6730_v25 = vld [vmem:[#allocation16_spill] sm:$0xff] }
 0x314   : > { %v4969_v59 = vpop.f32.mrf.mxu1  ;;  %5037 = vmatprep.mubr.bf16.mxu1 %v3509_v55  ;;  %v3122_v14 = vadd.f32 %v6395_v10, %v2816_v23 }
 0x315   : > { %v3490_v53 = vmax.f32 %v3458_v56, 0.0  ;;  %v3456_v48 = vadd.f32 %v6413_v34, %v3417_v33  ;;  %v3422_v6 = vadd.f32 %v4969_v59, %v6364_v24 }
 0x316   : > { %v3341_v20 = vpop.f32.mrf.mxu1 }
 0x317   : > { %v3514_v21 = vpack.c.bf16 %v3490_v53, %v3489_v35  ;;  %v3488_v16 = vmax.f32 %v3456_v48, 0.0  ;;  %v3420_v29 = vadd.f32 %v3341_v20, %v3114_v38  ;;  %v3461_v3 = vadd.f32 %v6413_v34, %v3422_v6  ;;  %v6732_v48 = vld [vmem:[#allocation22_spill] sm:$0xff]  ;;  %v6733_v20 = vld [vmem:[#allocation17_spill] sm:$0xff] }
 0x318   : > { %v4970_v27 = vpop.f32.mrf.mxu1 }
 0x319   : > { %v3423_v55 = vadd.f32 %v4970_v27, %v6372_v30  ;;  %v3513_v62 = vpack.c.bf16 %v3488_v16, %v3487_v28  ;;  %v3459_v63 = vadd.f32 %v6413_v34, %v3420_v29  ;;  %v3493_v4 = vmax.f32 %v3461_v3, 0.0  ;;  %v6734_v28 = vld [vmem:[#allocation21_spill] sm:$0xff]  ;;  %v6735_v3 = vld [vmem:[#allocation26_spill] sm:$0xff] }
 0x31a   : > { %v3344_v24 = vpop.f32.mrf.mxu1  ;;  %v2820_v16 = vadd.f32 %v6734_v28, %v6733_v20 }
 0x31b   : > { %v3462_v41 = vadd.f32 %v6413_v34, %v3423_v55  ;;  %v3421_v0 = vadd.f32 %v3344_v24, %v3115_v26  ;;  %5038 = vmatmul.mubr.bf16.gmra.mxu1 %v6442_v54  ;;  %v3491_v40 = vmax.f32 %v3459_v63, 0.0  ;;  %v6736_v63 = vld [vmem:[#allocation24_spill] sm:$0xff] }
 0x31c   : > { %v4973_v1 = vpop.f32.mrf.mxu1  ;;  %5041 = vmatprep.mubr.bf16.mxu1 %v3511_v57  ;;  %v6731_v57 = vld [vmem:[#allocation20_spill] sm:$0xff]  ;;  %v3126_v55 = vadd.f32 %v6735_v3, %v2820_v16 }
 0x31d   : > { %v3494_v42 = vmax.f32 %v3462_v41, 0.0  ;;  %v3460_v30 = vadd.f32 %v6413_v34, %v3421_v0  ;;  %v3426_v31 = vadd.f32 %v4973_v1, %v6378_v12  ;;  %v2817_v2 = vadd.f32 %v6731_v57, %v6730_v25  ;;  %v6737_v0 = vld [vmem:[#allocation18_spill] sm:$0xff] }
 0x31e   : > { %v3357_v9 = vpop.f32.mrf.mxu1 }
 0x31f   : > { %v3516_v45 = vpack.c.bf16 %v3494_v42, %v3493_v4  ;;  %v3492_v61 = vmax.f32 %v3460_v30, 0.0  ;;  %v3424_v44 = vadd.f32 %v3357_v9, %v3118_v36  ;;  %v3465_v54 = vadd.f32 %v6413_v34, %v3426_v31  ;;  %v6738_v36 = vld [vmem:[#allocation23_spill] sm:$0xff] }
 0x320   : > { %v4974_v58 = vpop.f32.mrf.mxu1  ;;  %v3123_v10 = vadd.f32 %v6402_v19, %v2817_v2  ;;  %v2821_v1 = vadd.f32 %v6738_v36, %v6737_v0 }
 0x321   : > { %v3427_v22 = vadd.f32 %v4974_v58, %v6386_v7  ;;  %v3515_v52 = vpack.c.bf16 %v3492_v61, %v3491_v40  ;;  %v3463_v5 = vadd.f32 %v6413_v34, %v3424_v44  ;;  %v3497_v37 = vmax.f32 %v3465_v54, 0.0 }
 0x322   : > { %v3360_v12 = vpop.f32.mrf.mxu1  ;;  %v3127_v40 = vadd.f32 %v6427_v43, %v2821_v1 }
 0x323   : > { %v3466_v17 = vadd.f32 %v6413_v34, %v3427_v22  ;;  %v3425_v32 = vadd.f32 %v3360_v12, %v3119_v11  ;;  %5042 = vmatmul.mubr.bf16.gmra.mxu1 %v6462_v50  ;;  %v3495_v33 = vmax.f32 %v3463_v5, 0.0 }
 0x324   : > { %v4977_v15 = vpop.f32.mrf.mxu1  ;;  %5045 = vmatprep.mubr.bf16.mxu1 %v3513_v62 }
 0x325   : > { %v3498_v49 = vmax.f32 %v3466_v17, 0.0  ;;  %v3464_v7 = vadd.f32 %v6413_v34, %v3425_v32  ;;  %v3430_v39 = vadd.f32 %v4977_v15, %v6392_v18 }
 0x326   : > { %v3373_v56 = vpop.f32.mrf.mxu1 }
 0x327   : > { %v3518_v38 = vpack.c.bf16 %v3498_v49, %v3497_v37  ;;  %v3496_v59 = vmax.f32 %v3464_v7, 0.0  ;;  %v3428_v35 = vadd.f32 %v3373_v56, %v3122_v14  ;;  %v3469_v50 = vadd.f32 %v6413_v34, %v3430_v39 }
 0x328   : > { %v4978_v53 = vpop.f32.mrf.mxu1 }
 0x329   : > { %v3431_v6 = vadd.f32 %v4978_v53, %v6732_v48  ;;  %v3517_v46 = vpack.c.bf16 %v3496_v59, %v3495_v33  ;;  %v3467_v29 = vadd.f32 %v6413_v34, %v3428_v35  ;;  %v3501_v8 = vmax.f32 %v3469_v50, 0.0  ;;  %v6529_v59 = vld [vmem:[%s6664_s6] ss:$0 sm:$0xff] }
 0x32a   : > { %v3376_v18 = vpop.f32.mrf.mxu1 }
 0x32b   : > { %v3470_v27 = vadd.f32 %v6413_v34, %v3431_v6  ;;  %v3429_v26 = vadd.f32 %v3376_v18, %v3123_v10  ;;  %5046 = vmatmul.mubr.bf16.gmra.mxu1 %v3514_v21  ;;  %v3499_v42 = vmax.f32 %v3467_v29, 0.0 }
 0x32c   : > { %v4981_v62 = vpop.f32.mrf.mxu1  ;;  %5049 = vmatprep.mubr.bf16.mxu1 %v3515_v52 }
 0x32d   : > { %v3502_v19 = vmax.f32 %v3470_v27, 0.0  ;;  %v3468_v24 = vadd.f32 %v6413_v34, %v3429_v26  ;;  %v3434_v41 = vadd.f32 %v4981_v62, %v6736_v63 }
 0x32e   : > { %v3389_v4 = vpop.f32.mrf.mxu1 }
 0x32f   : > { %v3520_v30 = vpack.c.bf16 %v3502_v19, %v3501_v8  ;;  %v3500_v31 = vmax.f32 %v3468_v24, 0.0  ;;  %v3432_v51 = vadd.f32 %v3389_v4, %v3126_v55  ;;  %v3473_v21 = vadd.f32 %v6413_v34, %v3434_v41 }
 0x330   : > { %v4982_v9 = vpop.f32.mrf.mxu1 }
 0x331   : > { %v3435_v61 = vadd.f32 %v4982_v9, %v6424_v47  ;;  %v3519_v44 = vpack.c.bf16 %v3500_v31, %v3499_v42  ;;  %v3471_v11 = vadd.f32 %v6413_v34, %v3432_v51  ;;  %v3505_v52 = vmax.f32 %v3473_v21, 0.0 }
 0x332   : > { %v3392_v58 = vpop.f32.mrf.mxu1 }
 0x333   : > { %v3474_v54 = vadd.f32 %v6413_v34, %v3435_v61  ;;  %v3433_v22 = vadd.f32 %v3392_v58, %v3127_v40  ;;  %5050 = vmatmul.mubr.bf16.gmra.mxu1 %v3516_v45  ;;  %v3503_v23 = vmax.f32 %v3471_v11, 0.0 }
 0x334   : > { %5053 = vmatprep.mubr.bf16.mxu1 %v3517_v46 }
 0x335   : > { %v3506_v13 = vmax.f32 %v3474_v54, 0.0  ;;  %v3472_v60 = vadd.f32 %v6413_v34, %v3433_v22 }
 0x337   : > { %v3522_v12 = vpack.c.bf16 %v3506_v13, %v3505_v52  ;;  %v3504_v43 = vmax.f32 %v3472_v60, 0.0 }
 0x339   : > { %v3521_v5 = vpack.c.bf16 %v3504_v43, %v3503_v23 }
 0x33b   : > { %5054 = vmatmul.mubr.bf16.gmra.mxu1 %v3518_v38 }
 0x33c   : > { %5057 = vmatprep.mubr.bf16.mxu1 %v3519_v44 }
 0x343   : > { %5058 = vmatmul.mubr.bf16.gmra.mxu1 %v3520_v30 }
 0x344   : > { %5061 = vmatprep.mubr.bf16.mxu1 %v3521_v5 }
 0x34b   : > { %5062 = vmatmul.mubr.bf16.gmra.mxu1 %v3522_v12 }
 0x34c   : > { %v4987_v47 = vpop.f32.mrf.mxu0 }
 0x34e   : > { %v3581_v17 = vpop.f32.mrf.mxu0 }
 0x350   : > { %v4988_v32 = vpop.f32.mrf.mxu0 }
 0x352   : > { %v3584_v14 = vpop.f32.mrf.mxu0 }
 0x354   : > { %v4991_v15 = vpop.f32.mrf.mxu0 }
 0x356   : > { %v3597_v45 = vpop.f32.mrf.mxu0 }
 0x358   : > { %v4992_v37 = vpop.f32.mrf.mxu0 }
 0x35a   : > { %v3600_v49 = vpop.f32.mrf.mxu0 }
 0x35c   : > { %v4995_v7 = vpop.f32.mrf.mxu0 }
 0x35e   : > { %v3613_v34 = vpop.f32.mrf.mxu0 }
 0x360   : > { %v4996_v39 = vpop.f32.mrf.mxu0 }
 0x362   : > { %v3616_v25 = vpop.f32.mrf.mxu0 }
 0x364   : > { %v4999_v57 = vpop.f32.mrf.mxu0 }
 0x366   : > { %v6520_v2 = vpop.f32.mrf.mxu0 }
 0x368   : > { %v6522_v56 = vpop.f32.mrf.mxu0 }
 0x36a   : > { %v6524_v33 = vpop.f32.mrf.mxu0 }
 0x36c   : > { %v6531_v10 = vpop.f32.mrf.mxu0 }
 0x36e   : > { %v6540_v16 = vpop.f32.mrf.mxu0 }
 0x370   : > { %v5004_v62 = vpop.f32.mrf.mxu0 }
 0x372   : > { %v3648_v36 = vpop.f32.mrf.mxu0 }
 0x374   : > { %v5007_v9 = vpop.f32.mrf.mxu0 }
 0x376   : > { %v3661_v54 = vpop.f32.mrf.mxu0 }
 0x378   : > { %v5008_v43 = vpop.f32.mrf.mxu0 }
 0x3d3   : > { %v5035_v38 = vpop.f32.mrf.mxu1 }
 0x3d4   : > { %v3799_v35 = vadd.f32 %v5035_v38, %v4987_v47 }
 0x3d5   : > { %v3790_v53 = vpop.f32.mrf.mxu1 }
 0x3d6   : > { %v3926_v50 = vadd.f32 %v6529_v59, %v3799_v35  ;;  %v3791_v48 = vadd.f32 %v3790_v53, %v3581_v17 }
 0x3d7   : > { %v5036_v6 = vpop.f32.mrf.mxu1 }
 0x3d8   : > { %3958 = vst [vmem:[%s6536_s10 + $0x10] sm:$0xff] %v3926_v50  ;;  %v3924_v46 = vadd.f32 %v6529_v59, %v3791_v48  ;;  %v3802_v20 = vadd.f32 %v5036_v6, %v4988_v32 }
 0x3d9   : > { %v3793_v28 = vpop.f32.mrf.mxu1 }
 0x3da   : > { %3956 = vst [vmem:[%s6536_s10] sm:$0xff] %v3924_v46  ;;  %v3927_v18 = vadd.f32 %v6529_v59, %v3802_v20  ;;  %v3794_v29 = vadd.f32 %v3793_v28, %v3584_v14 }
 0x3db   : > { %v5039_v27 = vpop.f32.mrf.mxu1 }
 0x3dc   : > { %3959 = vst [vmem:[%s6536_s10 + $0x18] sm:$0xff] %v3927_v18  ;;  %v3925_v26 = vadd.f32 %v6529_v59, %v3794_v29  ;;  %v3815_v3 = vadd.f32 %v5039_v27, %v4991_v15 }
 0x3dd   : > { %v3806_v55 = vpop.f32.mrf.mxu1 }
 0x3de   : > { %3957 = vst [vmem:[%s6536_s10 + $0x8] sm:$0xff] %v3925_v26  ;;  %v3930_v8 = vadd.f32 %v6529_v59, %v3815_v3  ;;  %v3807_v19 = vadd.f32 %v3806_v55, %v3597_v45  ;;  %v3664_v45 = vpop.f32.mrf.mxu0 }
 0x3df   : > { %v5040_v24 = vpop.f32.mrf.mxu1 }
 0x3e0   : > { %3962 = vst [vmem:[%s6536_s10 + $0x30] sm:$0xff] %v3930_v8  ;;  %v3928_v63 = vadd.f32 %v6529_v59, %v3807_v19  ;;  %v3818_v41 = vadd.f32 %v5040_v24, %v4992_v37 }
 0x3e1   : > { %v3809_v0 = vpop.f32.mrf.mxu1 }
 0x3e2   : > { %3960 = vst [vmem:[%s6536_s10 + $0x20] sm:$0xff] %v3928_v63  ;;  %v3931_v1 = vadd.f32 %v6529_v59, %v3818_v41  ;;  %v3810_v4 = vadd.f32 %v3809_v0, %v3600_v49 }
 0x3e3   : > { %v5043_v42 = vpop.f32.mrf.mxu1 }
 0x3e4   : > { %3963 = vst [vmem:[%s6536_s10 + $0x38] sm:$0xff] %v3931_v1  ;;  %v3929_v30 = vadd.f32 %v6529_v59, %v3810_v4  ;;  %v3831_v31 = vadd.f32 %v5043_v42, %v4995_v7 }
 0x3e5   : > { %v3822_v51 = vpop.f32.mrf.mxu1 }
 0x3e6   : > { %3961 = vst [vmem:[%s6536_s10 + $0x28] sm:$0xff] %v3929_v30  ;;  %v3934_v40 = vadd.f32 %v6529_v59, %v3831_v31  ;;  %v3823_v21 = vadd.f32 %v3822_v51, %v3613_v34 }
 0x3e7   : > { %v5044_v61 = vpop.f32.mrf.mxu1 }
 0x3e8   : > { %3966 = vst [vmem:[%s6536_s10 + $0x50] sm:$0xff] %v3934_v40  ;;  %v3932_v44 = vadd.f32 %v6529_v59, %v3823_v21  ;;  %v3834_v58 = vadd.f32 %v5044_v61, %v4996_v39 }
 0x3e9   : > { %v3825_v11 = vpop.f32.mrf.mxu1 }
 0x3ea   : > { %3964 = vst [vmem:[%s6536_s10 + $0x40] sm:$0xff] %v3932_v44  ;;  %v3935_v22 = vadd.f32 %v6529_v59, %v3834_v58  ;;  %v3826_v52 = vadd.f32 %v3825_v11, %v3616_v25 }
 0x3eb   : > { %v5047_v13 = vpop.f32.mrf.mxu1 }
 0x3ec   : > { %3967 = vst [vmem:[%s6536_s10 + $0x58] sm:$0xff] %v3935_v22  ;;  %v3933_v60 = vadd.f32 %v6529_v59, %v3826_v52  ;;  %v3847_v23 = vadd.f32 %v5047_v13, %v4999_v57  ;;  %v5011_v57 = vpop.f32.mrf.mxu0 }
 0x3ed   : > { %v3838_v12 = vpop.f32.mrf.mxu1 }
 0x3ee   : > { %3965 = vst [vmem:[%s6536_s10 + $0x48] sm:$0xff] %v3933_v60  ;;  %v3938_v5 = vadd.f32 %v6529_v59, %v3847_v23  ;;  %v3839_v47 = vadd.f32 %v3838_v12, %v6520_v2  ;;  %v3677_v50 = vpop.f32.mrf.mxu0 }
 0x3ef   : > { %v5048_v17 = vpop.f32.mrf.mxu1 }
 0x3f0   : > { %3970 = vst [vmem:[%s6536_s10 + $0x70] sm:$0xff] %v3938_v5  ;;  %v3936_v32 = vadd.f32 %v6529_v59, %v3839_v47  ;;  %v3850_v14 = vadd.f32 %v5048_v17, %v6522_v56 }
 0x3f1   : > { %v3841_v15 = vpop.f32.mrf.mxu1 }
 0x3f2   : > { %3968 = vst [vmem:[%s6536_s10 + $0x60] sm:$0xff] %v3936_v32  ;;  %v3939_v37 = vadd.f32 %v6529_v59, %v3850_v14  ;;  %v3842_v49 = vadd.f32 %v3841_v15, %v6524_v33 }
 0x3f3   : > { %v5051_v7 = vpop.f32.mrf.mxu1 }
 0x3f4   : > { %3971 = vst [vmem:[%s6536_s10 + $0x78] sm:$0xff] %v3939_v37  ;;  %v3937_v34 = vadd.f32 %v6529_v59, %v3842_v49  ;;  %v3863_v39 = vadd.f32 %v5051_v7, %v6531_v10 }
 0x3f5   : > { %v3854_v25 = vpop.f32.mrf.mxu1 }
 0x3f6   : > { %3969 = vst [vmem:[%s6536_s10 + $0x68] sm:$0xff] %v3937_v34  ;;  %v3942_v2 = vadd.f32 %v6529_v59, %v3863_v39  ;;  %v3855_v56 = vadd.f32 %v3854_v25, %v6540_v16  ;;  %v5012_v16 = vpop.f32.mrf.mxu0 }
 0x3f7   : > { %v5052_v38 = vpop.f32.mrf.mxu1 }
 0x3f8   : > { %3974 = vst [vmem:[%s6536_s10 + $0x90] sm:$0xff] %v3942_v2  ;;  %v3940_v33 = vadd.f32 %v6529_v59, %v3855_v56  ;;  %v3866_v35 = vadd.f32 %v5052_v38, %v5004_v62  ;;  %v3680_v62 = vpop.f32.mrf.mxu0 }
 0x3f9   : > { %v3857_v53 = vpop.f32.mrf.mxu1 }
 0x3fa   : > { %3972 = vst [vmem:[%s6536_s10 + $0x80] sm:$0xff] %v3940_v33  ;;  %v3943_v10 = vadd.f32 %v6529_v59, %v3866_v35  ;;  %v3858_v48 = vadd.f32 %v3857_v53, %v3648_v36  ;;  %v5015_v0 = vpop.f32.mrf.mxu0 }
 0x3fb   : > { %v5055_v6 = vpop.f32.mrf.mxu1 }
 0x3fc   : > { %3975 = vst [vmem:[%s6536_s10 + $0x98] sm:$0xff] %v3943_v10  ;;  %v3941_v46 = vadd.f32 %v6529_v59, %v3858_v48  ;;  %v3879_v20 = vadd.f32 %v5055_v6, %v5007_v9  ;;  %v3693_v51 = vpop.f32.mrf.mxu0 }
 0x3fd   : > { %v3870_v28 = vpop.f32.mrf.mxu1 }
 0x3fe   : > { %3973 = vst [vmem:[%s6536_s10 + $0x88] sm:$0xff] %v3941_v46  ;;  %v3946_v18 = vadd.f32 %v6529_v59, %v3879_v20  ;;  %v3871_v29 = vadd.f32 %v3870_v28, %v3661_v54  ;;  %v5016_v11 = vpop.f32.mrf.mxu0 }
 0x3ff   : > { %v5056_v27 = vpop.f32.mrf.mxu1 }
 0x400   : > { %3978 = vst [vmem:[%s6536_s10 + $0xb0] sm:$0xff] %v3946_v18  ;;  %v3944_v26 = vadd.f32 %v6529_v59, %v3871_v29  ;;  %v3882_v3 = vadd.f32 %v5056_v27, %v5008_v43  ;;  %v3696_v12 = vpop.f32.mrf.mxu0 }
 0x401   : > { %v3873_v55 = vpop.f32.mrf.mxu1 }
 0x402   : > { %3976 = vst [vmem:[%s6536_s10 + $0xa0] sm:$0xff] %v3944_v26  ;;  %v3947_v8 = vadd.f32 %v6529_v59, %v3882_v3  ;;  %v3874_v19 = vadd.f32 %v3873_v55, %v3664_v45 }
 0x403   : > { %v5059_v24 = vpop.f32.mrf.mxu1 }
 0x404   : > { %3979 = vst [vmem:[%s6536_s10 + $0xb8] sm:$0xff] %v3947_v8  ;;  %v3945_v63 = vadd.f32 %v6529_v59, %v3874_v19  ;;  %v3895_v41 = vadd.f32 %v5059_v24, %v5011_v57 }
 0x405   : > { %v3886_v36 = vpop.f32.mrf.mxu1 }
 0x406   : > { %3977 = vst [vmem:[%s6536_s10 + $0xa8] sm:$0xff] %v3945_v63  ;;  %v3950_v1 = vadd.f32 %v6529_v59, %v3895_v41  ;;  %v3887_v4 = vadd.f32 %v3886_v36, %v3677_v50 }
 0x407   : > { %v5060_v42 = vpop.f32.mrf.mxu1 }
 0x408   : > { %3982 = vst [vmem:[%s6536_s10 + $0xd0] sm:$0xff] %v3950_v1  ;;  %v3948_v30 = vadd.f32 %v6529_v59, %v3887_v4  ;;  %v3898_v31 = vadd.f32 %v5060_v42, %v5012_v16 }
 0x409   : > { %v3889_v9 = vpop.f32.mrf.mxu1 }
 0x40a   : > { %3980 = vst [vmem:[%s6536_s10 + $0xc0] sm:$0xff] %v3948_v30  ;;  %v3951_v40 = vadd.f32 %v6529_v59, %v3898_v31  ;;  %v3890_v21 = vadd.f32 %v3889_v9, %v3680_v62 }
 0x40b   : > { %v5063_v61 = vpop.f32.mrf.mxu1 }
 0x40c   : > { %3983 = vst [vmem:[%s6536_s10 + $0xd8] sm:$0xff] %v3951_v40  ;;  %v3949_v44 = vadd.f32 %v6529_v59, %v3890_v21  ;;  %v3911_v58 = vadd.f32 %v5063_v61, %v5015_v0 }
 0x40d   : > { %v3902_v54 = vpop.f32.mrf.mxu1 }
 0x40e   : > { %3981 = vst [vmem:[%s6536_s10 + $0xc8] sm:$0xff] %v3949_v44  ;;  %v3954_v22 = vadd.f32 %v6529_v59, %v3911_v58  ;;  %v3903_v52 = vadd.f32 %v3902_v54, %v3693_v51 }
 0x40f   : > { %v5064_v13 = vpop.f32.mrf.mxu1 }
 0x410   : > { %3986 = vst [vmem:[%s6536_s10 + $0xf0] sm:$0xff] %v3954_v22  ;;  %v3952_v60 = vadd.f32 %v6529_v59, %v3903_v52  ;;  %v3914_v23 = vadd.f32 %v5064_v13, %v5016_v11 }
 0x411   : > { %v3905_v43 = vpop.f32.mrf.mxu1 }
 0x412   : > { %3984 = vst [vmem:[%s6536_s10 + $0xe0] sm:$0xff] %v3952_v60  ;;  %v3955_v5 = vadd.f32 %v6529_v59, %v3914_v23  ;;  %v3906_v47 = vadd.f32 %v3905_v43, %v3696_v12 }
 0x414   : > { %3987 = vst [vmem:[%s6536_s10 + $0xf8] sm:$0xff] %v3955_v5  ;;  %v3953_v17 = vadd.f32 %v6529_v59, %v3906_v47 }
 0x416   : > { %3985 = vst [vmem:[%s6536_s10 + $0xe8] sm:$0xff] %v3953_v17 }
 0x417   : > { %5367 = shalt.err (!%p5364_p9)
}
 0x418   : > { %s5368_s19 = scalar_lea.hbm %s6610_s23, 4096  ;;  %s5372_s26 = scalar_lea.hbm %s6666_s8, 8192 }
 0x419   : > { %p5369_p1 = scmp.ne.s32.totalorder %s6610_s23, %s5368_s19  ;;  %p5373_p11 = scmp.lt.s32.totalorder %s6610_s23, %s6666_s8 }
 0x41a   : > { %p5374_p13 = scmp.lt.s32.totalorder %s5372_s26, %s5368_s19 }
 0x41b   : > { %p5370_p8 = pnand %p5369_p1, %p6739_p6 }
 0x41c   : > { %p5375_p2 = por %p5374_p13, %p5373_p11 }
 0x41d   : > { %p5371_p10 = pneg %p5370_p8 }
 0x41f   : > { %p5376_p4 = pnand %p5375_p2, %p5371_p10 }
 0x421   : > { %5379 = shalt.err (!%p5376_p4)
}
 0x422   : > { %s5439_s3 = smov 128   ;;  %s5440_s20 = smov 8  }
 0x423   : > { %5095 = dma.vmem_to_hbm [thread:$0]  (%p6739_p6), %s6612_s22, 4096, %s6610_s23, %s3989_s9, %s5439_s3, %s5439_s3, %s5440_s20  }
 0x424 PF: > { %s4017_s11 = sand.u32 1, %s5414_s27   ;;  %p6740_p12 = scmp.ne.s32.totalorder %s6683_s12, 0 }
 0x425   : > { %p6741_p0 = scmp.ge.s32.totalorder %s5426_s30, 2  ;;  %s4018_s13 = scalar_lea.sflag [#allocation5], %s4017_s11 }
 0x427   : > { %p5112_p5 = pnand %p6741_p0, %p6740_p12 }
 0x429   : > { %p5113_p3 = pneg %p5112_p5 }
 0x42b   : > { %5409 = dma.done.wait (%p5113_p3), %s4018_s13, 4096  }
 0x42c   : > { %5411 = vsyncadd (%p5113_p3), %s4018_s13, 4294963200  ;;  %p23_p7 = scmp.ge.s32.totalorder %s5566_s18, 4   ;;  %s6742_s27 = smov %s5418_s28 }
 0x42d   : > { %s6743_s28 = smov %s5422_s29  ;;  %s6744_s29 = smov %s5576_s24 }
 0x42e   : > { %s6745_s30 = smov %s5566_s18  ;;  %25 = sbr.rel (!%p23_p7) target bundleno = 10 (0xa), region = 120 }
 0x433   :  { %4023 = vsyncpa [#allocation4], 1 }
 0x434   :  { %4025 = vsyncpa [#allocation4 + $0x1], 1 }
 0x435   :  { %4026 = vsyncpa [#allocation7], 1 }
 0x436   :  { %4027 = vsyncpa [#allocation10], 1 }
 0x437   :  { %4028 = vsyncpa [#allocation5], 1 }
 0x438   :  { %4030 = vsyncpa [#allocation5 + $0x1], 1 }

</bundles_post_ra>
